<compile_context>
chip_gen: v7x
topology: tpu7x:2x2x1
jax: 0.10.0
libtpu: 0.0.40
codegen_flags: <defaults>
</compile_context>

<pallas_src>
import functools

import jax
import jax.numpy as jnp
from jax import lax
from jax.experimental import pallas as pl
from jax.experimental.pallas import tpu as pltpu

LANES = 128  # TPU lane width; all conv channel dims are zero-padded to this.


# ----------------------------------------------------------------------------
# Pallas kernels
# ----------------------------------------------------------------------------

def _in_conv_kernel(c0_ref, c1_ref, x_ref, n_ref, w_ref, b_ref, o_ref,
                    pad_scr, acc_scr, *, H, W, CIN):
    """Fused q_sample + 3x3 SAME conv (9 shifted matmuls) + bias + SiLU.

    x_ref / n_ref are spatially pre-padded (H+2, W+2) so the zero border of the
    noisy image is free (c0*0 + c1*0 == 0).
    """
    # q_sample, elementwise in f32 (VPU), once per tile.
    noisy = c0_ref[...] * x_ref[0] + c1_ref[...] * n_ref[0]       # (H+2, W+2, CIN)
    pad_scr[...] = noisy.astype(pad_scr.dtype)                    # bf16 staging tile

    acc_scr[...] = jnp.zeros_like(acc_scr)
    for t in range(9):
        dh, dw = divmod(t, 3)
        a = pad_scr[dh:dh + H, dw:dw + W, :].reshape(H * W, CIN)  # W % 16 == 0
        acc_scr[...] += jnp.dot(a, w_ref[t * CIN:(t + 1) * CIN, :],
                                preferred_element_type=jnp.float32)

    z = acc_scr[...] + b_ref[...]            # (H*W, 128) + (1, 128) broadcast
    z = z * jax.nn.sigmoid(z)                # SiLU in f32
    o_ref[...] = z.reshape(1, 1, H * W, LANES).astype(o_ref.dtype)


def _up_conv_kernel(h_ref, u_ref, w_ref, b_ref, o_ref, pad_scr, acc_scr,
                    *, HIN, WIN):
    """Fused nearest 2x upsample + 3x3 SAME conv + (bias + temb) + SiLU."""
    C = LANES
    HO, WO = 2 * HIN, 2 * WIN

    ht = h_ref[0].reshape(HIN, WIN, C)                                   # bf16
    # 2x repeat along H (outer axis): broadcast + collapse of leading dims.
    hu = jnp.broadcast_to(ht[:, None], (HIN, 2, WIN, C)).reshape(HO, WIN, C)
    zrow = jnp.zeros((1, WIN, C), hu.dtype)
    hu = jnp.concatenate([zrow, hu, zrow], axis=0)                       # (HO+2, WIN, C)

    # 2x repeat along W plus zero column padding, expressed as a 0/1 matmul on
    # the MXU (avoids an unsupported sublane interleave/reshape).  The selection
    # matrix u_ref is precomputed on the host and VMEM-resident (constant block).
    ub = jnp.broadcast_to(u_ref[...][None], (HO + 2, WO + 2, WIN))
    up = lax.dot_general(ub, hu, (((2,), (1,)), ((0,), (0,))),
                         preferred_element_type=jnp.float32)             # (HO+2, WO+2, C)
    pad_scr[...] = up.astype(pad_scr.dtype)                              # bf16, incl. zero border

    acc_scr[...] = jnp.zeros_like(acc_scr)
    for t in range(9):
        dh, dw = divmod(t, 3)
        a = pad_scr[dh:dh + HO, dw:dw + WO, :].reshape(HO * WO, C)
        acc_scr[...] += jnp.dot(a, w_ref[t * C:(t + 1) * C, :],
                                preferred_element_type=jnp.float32)

    z = acc_scr[...] + b_ref[0]              # temb already folded into the bias
    z = z * jax.nn.sigmoid(z)                # SiLU in f32
    o_ref[...] = z.reshape(1, HO * WO, C).astype(o_ref.dtype)


# ----------------------------------------------------------------------------
# pallas_call wrappers
# ----------------------------------------------------------------------------

def _conv_in_call(c0s, c1s, x_pad, n_pad, w_p, b_p, H, W, CIN):
    """(S,1,1) coefs, padded images (B,H+2,W+2,CIN) -> (S*B, H*W, 128) bf16."""
    S = c0s.shape[0]
    B = x_pad.shape[0]
    HW = H * W
    kernel = functools.partial(_in_conv_kernel, H=H, W=W, CIN=CIN)
    # Grid is (B, S) with S innermost so the image / noise blocks (indexed only
    # by b) keep the same block index across consecutive steps -> no re-DMA.
    out = pl.pallas_call(
        kernel,
        out_shape=jax.ShapeDtypeStruct((S, B, HW, LANES), jnp.bfloat16),
        grid=(B, S),
        in_specs=[
            pl.BlockSpec((1, 1, 1), lambda b, s: (s, 0, 0)),                      # c0
            pl.BlockSpec((1, 1, 1), lambda b, s: (s, 0, 0)),                      # c1
            pl.BlockSpec((1, H + 2, W + 2, CIN), lambda b, s: (b, 0, 0, 0)),      # x
            pl.BlockSpec((1, H + 2, W + 2, CIN), lambda b, s: (b, 0, 0, 0)),      # noise
            pl.BlockSpec((9 * CIN, LANES), lambda b, s: (0, 0)),                  # weights
            pl.BlockSpec((1, LANES), lambda b, s: (0, 0)),                        # bias
        ],
        out_specs=pl.BlockSpec((1, 1, HW, LANES), lambda b, s: (s, b, 0, 0)),
        scratch_shapes=[
            pltpu.VMEM((H + 2, W + 2, CIN), jnp.bfloat16),   # padded noisy tile
            pltpu.VMEM((HW, LANES), jnp.float32),            # f32 accumulator
        ],
        compiler_params=pltpu.CompilerParams(
            dimension_semantics=("parallel", "parallel"),
            vmem_limit_bytes=32 * 1024 * 1024),
    )(c0s, c1s, x_pad, n_pad, w_p, b_p)
    return out.reshape(S * B, HW, LANES)


def _up_block_call(h, umat, w_p, bias_p, HIN, WIN):
    """h: (N, HIN*WIN, 128) bf16 -> (N, (2HIN)*(2WIN), 128) bf16."""
    N = h.shape[0]
    HO, WO = 2 * HIN, 2 * WIN
    kernel = functools.partial(_up_conv_kernel, HIN=HIN, WIN=WIN)
    return pl.pallas_call(
        kernel,
        out_shape=jax.ShapeDtypeStruct((N, HO * WO, LANES), jnp.bfloat16),
        grid=(N,),
        in_specs=[
            pl.BlockSpec((1, HIN * WIN, LANES), lambda n: (n, 0, 0)),   # activations
            pl.BlockSpec((WO + 2, WIN), lambda n: (0, 0)),              # upsample 0/1 matrix
            pl.BlockSpec((9 * LANES, LANES), lambda n: (0, 0)),         # conv weights
            pl.BlockSpec((1, 1, LANES), lambda n: (n, 0, 0)),           # bias (+temb)
        ],
        out_specs=pl.BlockSpec((1, HO * WO, LANES), lambda n: (n, 0, 0)),
        scratch_shapes=[
            pltpu.VMEM((HO + 2, WO + 2, LANES), jnp.bfloat16),  # padded upsampled tile
            pltpu.VMEM((HO * WO, LANES), jnp.float32),          # f32 accumulator
        ],
        compiler_params=pltpu.CompilerParams(
            dimension_semantics=("parallel",),
            vmem_limit_bytes=32 * 1024 * 1024),
    )(h, umat, w_p, bias_p)


def _make_upsample_matrix(WIN):
    """(2*WIN+2, WIN) 0/1 bf16 matrix: nearest 2x W-repeat with a zero border."""
    WO = 2 * WIN
    s_idx = jnp.arange(WO + 2)[:, None]
    w_idx = jnp.arange(WIN)[None, :]
    sel = (s_idx == 2 * w_idx + 1) | (s_idx == 2 * w_idx + 2)
    return sel.astype(jnp.bfloat16)


# ----------------------------------------------------------------------------
# Plain-JAX helpers (reference path + tiny M=1 embedding math)
# ----------------------------------------------------------------------------

def im2col_3x3(x_nhwc):
    """(B,H,W,C) -> (B*H*W, 9*C) with SAME zero padding (reference only)."""
    B, H, W, C = x_nhwc.shape
    xp = jnp.pad(x_nhwc, ((0, 0), (1, 1), (1, 1), (0, 0)))
    cols = []
    for dh in range(3):
        for dw in range(3):
            cols.append(xp[:, dh:dh + H, dw:dw + W, :])
    return jnp.concatenate(cols, axis=-1).reshape(B * H * W, 9 * C)


def upsample2x(x_nhwc):
    x = jnp.repeat(x_nhwc, 2, axis=1)
    return jnp.repeat(x, 2, axis=2)


def timestep_embedding(t, dim):
    """Sinusoidal embedding; t: (S,) float32 -> (S, dim)."""
    half = dim // 2
    freqs = jnp.exp(-jnp.log(10000.0) * jnp.arange(half, dtype=jnp.float32) / half)
    args = t.astype(jnp.float32)[:, None] * freqs[None, :]
    return jnp.concatenate([jnp.cos(args), jnp.sin(args)], axis=-1)


# ----------------------------------------------------------------------------
# FeatureExtractorDDPM (synthetic, Pallas-backed)
# ----------------------------------------------------------------------------

class FeatureExtractorDDPMPallas:
    """Pallas re-implementation of FeatureExtractorDDPM.forward.

    steps : list of diffusion timesteps t.
    blocks: indices of decoder ("ups") blocks whose OUTPUT activations are saved
            (the input_activations=False path of the PyTorch class).
    """

    def __init__(self, steps, blocks, in_ch=3, base_ch=32, num_up_blocks=2,
                 num_timesteps=1000, seed=0):
        # TODO(synk): the real module loads a pretrained guided_diffusion UNet from a
        # checkpoint (pt_processing + load_state_dict); here weights are deterministic
        # random stand-ins with matching block structure, and forward hooks are
        # replaced by explicit collection of the up-block outputs.
        self.steps = list(steps)
        self.blocks = list(blocks)
        self.in_ch = in_ch
        self.C = base_ch
        self.temb_dim = 4 * base_ch
        self.num_timesteps = num_timesteps
        self.cin_p = ((in_ch + 7) // 8) * 8   # pad raw input channels to a multiple of 8

        # Linear beta schedule, q(x_t | x_0) coefficients (as in GaussianDiffusion).
        betas = jnp.linspace(1e-4, 2e-2, num_timesteps, dtype=jnp.float32)
        alphas_cumprod = jnp.cumprod(1.0 - betas)
        self.sqrt_alphas_cumprod = jnp.sqrt(alphas_cumprod)
        self.sqrt_one_minus_alphas_cumprod = jnp.sqrt(1.0 - alphas_cumprod)

        key = jax.random.PRNGKey(seed)

        def init(k, shape, scale=0.05):
            return scale * jax.random.normal(k, shape, jnp.float32)

        keys = iter(jax.random.split(key, 6 + 4 * num_up_blocks))
        C, T = self.C, self.temb_dim

        # input 3x3 conv: in_ch -> C   (padded: K rows per tap -> cin_p, N -> 128)
        self.w_in = init(next(keys), (9 * in_ch, C))
        self.b_in = jnp.zeros((C,), jnp.float32)
        w_in_p = jnp.zeros((9 * self.cin_p, LANES), jnp.float32)
        for t in range(9):
            w_in_p = w_in_p.at[t * self.cin_p:t * self.cin_p + in_ch, :C].set(
                self.w_in[t * in_ch:(t + 1) * in_ch, :])
        self.w_in_p = w_in_p.astype(jnp.bfloat16)
        self.b_in_p = jnp.zeros((1, LANES), jnp.float32).at[0, :C].set(self.b_in)

        # time-embedding MLP: C -> 4C -> 4C  (kept in plain JAX, M = len(steps))
        self.w_t1 = init(next(keys), (C, T))
        self.b_t1 = jnp.zeros((T,), jnp.float32)
        self.w_t2 = init(next(keys), (T, T))
        self.b_t2 = jnp.zeros((T,), jnp.float32)

        # decoder up-blocks: channel schedule C -> C -> C//2 -> ...
        ch_sched = [C] + [max(C // (2 ** i), 16) for i in range(num_up_blocks)]
        self.up_params = []
        for j in range(num_up_blocks):
            cin, cout = ch_sched[j], ch_sched[j + 1]
            w_conv = init(next(keys), (9 * cin, cout))
            w_temb = init(next(keys), (T, cout))
            b_conv = jnp.zeros((cout,), jnp.float32)
            b_temb = jnp.zeros((cout,), jnp.float32)
            # lane-dense padded weights: each of the 9 taps occupies a 128-row block,
            # padded rows/cols are zero so padded lanes stay exactly zero end-to-end.
            w_conv_p = jnp.zeros((9 * LANES, LANES), jnp.float32)
            for t in range(9):
                w_conv_p = w_conv_p.at[t * LANES:t * LANES + cin, :cout].set(
                    w_conv[t * cin:(t + 1) * cin, :])
            self.up_params.append(dict(
                cin=cin, cout=cout,
                w_conv=w_conv, b_conv=b_conv, w_temb=w_temb, b_temb=b_temb,
                w_conv_p=w_conv_p.astype(jnp.bfloat16)))

    # -- tiny plain-JAX pieces -------------------------------------------------
    def _temb(self, t_scaled):
        emb0 = timestep_embedding(t_scaled, self.C)      # (S, C)
        h1 = emb0 @ self.w_t1 + self.b_t1
        h1 = h1 * jax.nn.sigmoid(h1)
        return h1 @ self.w_t2 + self.b_t2                # (S, 4C)

    # -- FeatureExtractorDDPM.forward -------------------------------------------
    def forward(self, x_nchw, noise_nchw=None):
        """x: (B, C, H, W). Returns list of NCHW float32 activations, one per
        (step, hooked block), in step-major order (matching the hooks)."""
        x_nhwc = jnp.transpose(x_nchw, (0, 2, 3, 1)).astype(jnp.float32)
        if noise_nchw is None:
            # Same noise reused for every step (implementation choice of this stand-in).
            noise_nchw = jax.random.normal(jax.random.PRNGKey(123), x_nchw.shape,
                                           jnp.float32)
        noise_nhwc = jnp.transpose(noise_nchw, (0, 2, 3, 1)).astype(jnp.float32)

        B, H, W, Cin = x_nhwc.shape
        assert Cin == self.in_ch
        assert W % 16 == 0, "width must be a multiple of 16 for the in-kernel reshapes"

        S = len(self.steps)
        steps = jnp.asarray(self.steps, jnp.int32)
        c0s = self.sqrt_alphas_cumprod[steps].reshape(S, 1, 1)
        c1s = self.sqrt_one_minus_alphas_cumprod[steps].reshape(S, 1, 1)

        def pad_img(a):  # spatial zero pad (SAME conv halo) + channel pad to cin_p
            return jnp.pad(a, ((0, 0), (1, 1), (1, 1), (0, self.cin_p - Cin)))

        # fused q_sample + input conv, batched over all diffusion steps
        h = _conv_in_call(c0s, c1s, pad_img(x_nhwc), pad_img(noise_nhwc),
                          self.w_in_p, self.b_in_p, H, W, self.cin_p)
        # h: (S*B, H*W, 128) bf16, real channels in lanes [0:C]

        # timestep embedding + per-block projection in plain JAX (M=1-ish matmuls),
        # folded into the conv bias so no (M, N) "add" tensor is ever materialized.
        temb = self._temb(steps.astype(jnp.float32))     # rescale_timesteps=False

        cur_H, cur_W = H, W
        block_feats = []
        for p in self.up_params:
            cout = p['cout']
            temb_proj = temb @ p['w_temb'] + p['b_temb']            # (S, cout)
            bias = p['b_conv'][None, :] + temb_proj                 # (S, cout)
            bias_p = jnp.zeros((S, LANES), jnp.float32).at[:, :cout].set(bias)
            bias_p = jnp.repeat(bias_p, B, axis=0).reshape(S * B, 1, LANES)
            umat = _make_upsample_matrix(cur_W)                     # VMEM-resident constant
            h = _up_block_call(h, umat, p['w_conv_p'], bias_p, cur_H, cur_W)
            cur_H, cur_W = 2 * cur_H, 2 * cur_W
            block_feats.append((h, cout, cur_H, cur_W))

        activations = []
        for s in range(S):
            for idx in self.blocks:
                hb, cout, Hh, Wh = block_feats[idx]
                a = hb.reshape(S, B, Hh, Wh, LANES)[s, :, :, :, :cout]
                activations.append(
                    jnp.transpose(a, (0, 3, 1, 2)).astype(jnp.float32))
        return activations

    # -- pure-JAX float32 reference (same synthetic weights, no Pallas) ----------
    def reference_forward(self, x_nchw, noise_nchw):
        x = jnp.transpose(x_nchw, (0, 2, 3, 1)).astype(jnp.float32)
        noise = jnp.transpose(noise_nchw, (0, 2, 3, 1)).astype(jnp.float32)
        B, H, W, _ = x.shape
        acts = []
        for t in self.steps:
            c0 = self.sqrt_alphas_cumprod[t]
            c1 = self.sqrt_one_minus_alphas_cumprod[t]
            noisy = c0 * x + c1 * noise
            temb = self._temb(jnp.asarray([t], jnp.float32))          # (1, 4C)
            z = im2col_3x3(noisy) @ self.w_in + self.b_in
            z = z * jax.nn.sigmoid(z)
            h = z.reshape(B, H, W, self.C)
            outs = []
            for p in self.up_params:
                h = upsample2x(h)
                Bh, Hh, Wh, _ = h.shape
                tproj = temb @ p['w_temb'] + p['b_temb']              # (1, cout)
                z = im2col_3x3(h) @ p['w_conv'] + p['b_conv'] + tproj
                z = z * jax.nn.sigmoid(z)
                h = z.reshape(Bh, Hh, Wh, p['cout'])
                outs.append(h)
            for idx in self.blocks:
                acts.append(jnp.transpose(outs[idx], (0, 3, 1, 2)).astype(jnp.float32))
        return acts


# ----------------------------------------------------------------------------
if __name__ == "__main__":
    key = jax.random.PRNGKey(0)
    kx, kn = jax.random.split(key)

    B, Cin, H, W = 2, 3, 16, 16
    x = jax.random.normal(kx, (B, Cin, H, W), jnp.float32)
    noise = jax.random.normal(kn, (B, Cin, H, W), jnp.float32)

    extractor = FeatureExtractorDDPMPallas(
        steps=[50, 150], blocks=[0, 1],
        in_ch=Cin, base_ch=32, num_up_blocks=2, seed=0)

    acts = extractor.forward(x, noise)
    for a in acts:
        jax.block_until_ready(a)

    # sanity: 2 steps x 2 hooked blocks = 4 activation tensors, NCHW, float32
    assert len(acts) == 4
    assert acts[0].shape == (B, 32, 2 * H, 2 * W)
    assert acts[1].shape == (B, 16, 4 * H, 4 * W)
    assert all(a.dtype == jnp.float32 for a in acts)

    # numerical check against the pure-JAX float32 reference (bf16 matmul inputs,
    # f32 accumulation -> small tolerance)
    refs = extractor.reference_forward(x, noise)
    for a, r in zip(acts, refs):
        err = float(jnp.max(jnp.abs(a - r)))
        assert err < 3e-2, f"max abs diff too large: {err}"

    print("KERNEL_OK")
</pallas_src>

<mosaic_0001>
module attributes {stable_mosaic.version = 11 : i64} {
  func.func @_in_conv_kernel(%arg0: i32, %arg1: i32, %arg2: memref<1x1x1xf32, #tpu.memory_space<vmem>>, %arg3: memref<1x1x1xf32, #tpu.memory_space<vmem>>, %arg4: memref<1x18x18x8xf32, #tpu.memory_space<vmem>>, %arg5: memref<1x18x18x8xf32, #tpu.memory_space<vmem>>, %arg6: memref<72x128xbf16, #tpu.memory_space<vmem>>, %arg7: memref<1x128xf32, #tpu.memory_space<vmem>>, %arg8: memref<1x1x256x128xbf16, #tpu.memory_space<vmem>>, %arg9: memref<18x18x8xbf16, #tpu.memory_space<vmem>>, %arg10: memref<256x128xf32, #tpu.memory_space<vmem>>) attributes {dimension_semantics = [#tpu.dimension_semantics<parallel>, #tpu.dimension_semantics<parallel>], iteration_bounds = array<i64: 2, 2>, scalar_prefetch = 0 : i64, scratch_operands = 2 : i64, tpu.core_type = #tpu.core_type<tc>, window_params = [{transform_indices = @transform_0, window_bounds = array<i64: 1, 1, 1>}, {transform_indices = @transform_1, window_bounds = array<i64: 1, 1, 1>}, {transform_indices = @transform_2, window_bounds = array<i64: 1, 18, 18, 8>}, {transform_indices = @transform_3, window_bounds = array<i64: 1, 18, 18, 8>}, {pipeline_mode = #tpu.pipeline_mode<synchronous>, transform_indices = @transform_4, window_bounds = array<i64: 72, 128>}, {pipeline_mode = #tpu.pipeline_mode<synchronous>, transform_indices = @transform_5, window_bounds = array<i64: 1, 128>}, {transform_indices = @transform_6, window_bounds = array<i64: 1, 1, 256, 128>}]} {
    %c0 = arith.constant 0 : index
    %c0_0 = arith.constant 0 : index
    %c0_1 = arith.constant 0 : index
    %0 = vector.load %arg2[%c0, %c0_0, %c0_1] : memref<1x1x1xf32, #tpu.memory_space<vmem>>, vector<1x1x1xf32>
    %c0_2 = arith.constant 0 : index
    %c0_3 = arith.constant 0 : index
    %c0_4 = arith.constant 0 : index
    %c0_5 = arith.constant 0 : index
    %1 = vector.load %arg4[%c0_2, %c0_3, %c0_4, %c0_5] : memref<1x18x18x8xf32, #tpu.memory_space<vmem>>, vector<1x18x18x8xf32>
    %2 = vector.shape_cast %1 : vector<1x18x18x8xf32> to vector<18x18x8xf32>
    %3 = vector.broadcast %0 : vector<1x1x1xf32> to vector<18x18x8xf32>
    %4 = arith.mulf %3, %2 : vector<18x18x8xf32>
    %c0_6 = arith.constant 0 : index
    %c0_7 = arith.constant 0 : index
    %c0_8 = arith.constant 0 : index
    %5 = vector.load %arg3[%c0_6, %c0_7, %c0_8] : memref<1x1x1xf32, #tpu.memory_space<vmem>>, vector<1x1x1xf32>
    %c0_9 = arith.constant 0 : index
    %c0_10 = arith.constant 0 : index
    %c0_11 = arith.constant 0 : index
    %c0_12 = arith.constant 0 : index
    %6 = vector.load %arg5[%c0_9, %c0_10, %c0_11, %c0_12] : memref<1x18x18x8xf32, #tpu.memory_space<vmem>>, vector<1x18x18x8xf32>
    %7 = vector.shape_cast %6 : vector<1x18x18x8xf32> to vector<18x18x8xf32>
    %8 = vector.broadcast %5 : vector<1x1x1xf32> to vector<18x18x8xf32>
    %9 = arith.mulf %8, %7 : vector<18x18x8xf32>
    %10 = arith.addf %4, %9 : vector<18x18x8xf32>
    %11 = arith.truncf %10 : vector<18x18x8xf32> to vector<18x18x8xbf16>
    %c0_13 = arith.constant 0 : index
    %c0_14 = arith.constant 0 : index
    %c0_15 = arith.constant 0 : index
    %12 = vector.load %arg9[%c0_13, %c0_14, %c0_15] : memref<18x18x8xbf16, #tpu.memory_space<vmem>>, vector<18x18x8xbf16>
    tpu.vector_store %arg9[%c0_13, %c0_14, %c0_15], %11 {strides = array<i32>} : memref<18x18x8xbf16, #tpu.memory_space<vmem>>, vector<18x18x8xbf16>,
    %cst = arith.constant 0.000000e+00 : f32
    %13 = vector.broadcast %cst : f32 to vector<256x128xf32>
    %c0_16 = arith.constant 0 : index
    %c0_17 = arith.constant 0 : index
    %14 = vector.load %arg10[%c0_16, %c0_17] : memref<256x128xf32, #tpu.memory_space<vmem>>, vector<256x128xf32>
    tpu.vector_store %arg10[%c0_16, %c0_17], %13 {strides = array<i32>} : memref<256x128xf32, #tpu.memory_space<vmem>>, vector<256x128xf32>,
    %c0_18 = arith.constant 0 : index
    %c0_19 = arith.constant 0 : index
    %c0_20 = arith.constant 0 : index
    %15 = vector.load %arg9[%c0_18, %c0_19, %c0_20] : memref<18x18x8xbf16, #tpu.memory_space<vmem>>, vector<16x16x8xbf16>
    %16 = vector.shape_cast %15 : vector<16x16x8xbf16> to vector<256x8xbf16>
    %c0_21 = arith.constant 0 : index
    %c0_22 = arith.constant 0 : index
    %17 = vector.load %arg10[%c0_21, %c0_22] : memref<256x128xf32, #tpu.memory_space<vmem>>, vector<256x128xf32>
    %c0_23 = arith.constant 0 : index
    %c0_24 = arith.constant 0 : index
    %18 = vector.load %arg6[%c0_23, %c0_24] : memref<72x128xbf16, #tpu.memory_space<vmem>>, vector<8x128xbf16>
    %cst_25 = arith.constant dense<0.000000e+00> : vector<256x128xf32>
    %19 = tpu.matmul %16, %18, %cst_25 {dimension_numbers = #tpu.dot_dimension_numbers<[1], [0], [0], [1], [0, 0, 1, 1], [], []>} : vector<256x8xbf16>, vector<8x128xbf16>, vector<256x128xf32> -> vector<256x128xf32>
    %20 = arith.addf %17, %19 : vector<256x128xf32>
    %c0_26 = arith.constant 0 : index
    %c0_27 = arith.constant 0 : index
    %21 = vector.load %arg10[%c0_26, %c0_27] : memref<256x128xf32, #tpu.memory_space<vmem>>, vector<256x128xf32>
    tpu.vector_store %arg10[%c0_26, %c0_27], %20 {strides = array<i32>} : memref<256x128xf32, #tpu.memory_space<vmem>>, vector<256x128xf32>,
    %c0_28 = arith.constant 0 : index
    %c1 = arith.constant 1 : index
    %c0_29 = arith.constant 0 : index
    %22 = vector.load %arg9[%c0_28, %c1, %c0_29] : memref<18x18x8xbf16, #tpu.memory_space<vmem>>, vector<16x16x8xbf16>
    %23 = vector.shape_cast %22 : vector<16x16x8xbf16> to vector<256x8xbf16>
    %c0_30 = arith.constant 0 : index
    %c0_31 = arith.constant 0 : index
    %24 = vector.load %arg10[%c0_30, %c0_31] : memref<256x128xf32, #tpu.memory_space<vmem>>, vector<256x128xf32>
    %c8 = arith.constant 8 : index
    %c0_32 = arith.constant 0 : index
    %25 = vector.load %arg6[%c8, %c0_32] : memref<72x128xbf16, #tpu.memory_space<vmem>>, vector<8x128xbf16>
    %cst_33 = arith.constant dense<0.000000e+00> : vector<256x128xf32>
    %26 = tpu.matmul %23, %25, %cst_33 {dimension_numbers = #tpu.dot_dimension_numbers<[1], [0], [0], [1], [0, 0, 1, 1], [], []>} : vector<256x8xbf16>, vector<8x128xbf16>, vector<256x128xf32> -> vector<256x128xf32>
    %27 = arith.addf %24, %26 : vector<256x128xf32>
    %c0_34 = arith.constant 0 : index
    %c0_35 = arith.constant 0 : index
    %28 = vector.load %arg10[%c0_34, %c0_35] : memref<256x128xf32, #tpu.memory_space<vmem>>, vector<256x128xf32>
    tpu.vector_store %arg10[%c0_34, %c0_35], %27 {strides = array<i32>} : memref<256x128xf32, #tpu.memory_space<vmem>>, vector<256x128xf32>,
    %c0_36 = arith.constant 0 : index
    %c2 = arith.constant 2 : index
    %c0_37 = arith.constant 0 : index
    %29 = vector.load %arg9[%c0_36, %c2, %c0_37] : memref<18x18x8xbf16, #tpu.memory_space<vmem>>, vector<16x16x8xbf16>
    %30 = vector.shape_cast %29 : vector<16x16x8xbf16> to vector<256x8xbf16>
    %c0_38 = arith.constant 0 : index
    %c0_39 = arith.constant 0 : index
    %31 = vector.load %arg10[%c0_38, %c0_39] : memref<256x128xf32, #tpu.memory_space<vmem>>, vector<256x128xf32>
    %c16 = arith.constant 16 : index
    %c0_40 = arith.constant 0 : index
    %32 = vector.load %arg6[%c16, %c0_40] : memref<72x128xbf16, #tpu.memory_space<vmem>>, vector<8x128xbf16>
    %cst_41 = arith.constant dense<0.000000e+00> : vector<256x128xf32>
    %33 = tpu.matmul %30, %32, %cst_41 {dimension_numbers = #tpu.dot_dimension_numbers<[1], [0], [0], [1], [0, 0, 1, 1], [], []>} : vector<256x8xbf16>, vector<8x128xbf16>, vector<256x128xf32> -> vector<256x128xf32>
    %34 = arith.addf %31, %33 : vector<256x128xf32>
    %c0_42 = arith.constant 0 : index
    %c0_43 = arith.constant 0 : index
    %35 = vector.load %arg10[%c0_42, %c0_43] : memref<256x128xf32, #tpu.memory_space<vmem>>, vector<256x128xf32>
    tpu.vector_store %arg10[%c0_42, %c0_43], %34 {strides = array<i32>} : memref<256x128xf32, #tpu.memory_space<vmem>>, vector<256x128xf32>,
    %c1_44 = arith.constant 1 : index
    %c0_45 = arith.constant 0 : index
    %c0_46 = arith.constant 0 : index
    %36 = vector.load %arg9[%c1_44, %c0_45, %c0_46] : memref<18x18x8xbf16, #tpu.memory_space<vmem>>, vector<16x16x8xbf16>
    %37 = vector.shape_cast %36 : vector<16x16x8xbf16> to vector<256x8xbf16>
    %c0_47 = arith.constant 0 : index
    %c0_48 = arith.constant 0 : index
    %38 = vector.load %arg10[%c0_47, %c0_48] : memref<256x128xf32, #tpu.memory_space<vmem>>, vector<256x128xf32>
    %c24 = arith.constant 24 : index
    %c0_49 = arith.constant 0 : index
    %39 = vector.load %arg6[%c24, %c0_49] : memref<72x128xbf16, #tpu.memory_space<vmem>>, vector<8x128xbf16>
    %cst_50 = arith.constant dense<0.000000e+00> : vector<256x128xf32>
    %40 = tpu.matmul %37, %39, %cst_50 {dimension_numbers = #tpu.dot_dimension_numbers<[1], [0], [0], [1], [0, 0, 1, 1], [], []>} : vector<256x8xbf16>, vector<8x128xbf16>, vector<256x128xf32> -> vector<256x128xf32>
    %41 = arith.addf %38, %40 : vector<256x128xf32>
    %c0_51 = arith.constant 0 : index
    %c0_52 = arith.constant 0 : index
    %42 = vector.load %arg10[%c0_51, %c0_52] : memref<256x128xf32, #tpu.memory_space<vmem>>, vector<256x128xf32>
    tpu.vector_store %arg10[%c0_51, %c0_52], %41 {strides = array<i32>} : memref<256x128xf32, #tpu.memory_space<vmem>>, vector<256x128xf32>,
    %c1_53 = arith.constant 1 : index
    %c1_54 = arith.constant 1 : index
    %c0_55 = arith.constant 0 : index
    %43 = vector.load %arg9[%c1_53, %c1_54, %c0_55] : memref<18x18x8xbf16, #tpu.memory_space<vmem>>, vector<16x16x8xbf16>
    %44 = vector.shape_cast %43 : vector<16x16x8xbf16> to vector<256x8xbf16>
    %c0_56 = arith.constant 0 : index
    %c0_57 = arith.constant 0 : index
    %45 = vector.load %arg10[%c0_56, %c0_57] : memref<256x128xf32, #tpu.memory_space<vmem>>, vector<256x128xf32>
    %c32 = arith.constant 32 : index
    %c0_58 = arith.constant 0 : index
    %46 = vector.load %arg6[%c32, %c0_58] : memref<72x128xbf16, #tpu.memory_space<vmem>>, vector<8x128xbf16>
    %cst_59 = arith.constant dense<0.000000e+00> : vector<256x128xf32>
    %47 = tpu.matmul %44, %46, %cst_59 {dimension_numbers = #tpu.dot_dimension_numbers<[1], [0], [0], [1], [0, 0, 1, 1], [], []>} : vector<256x8xbf16>, vector<8x128xbf16>, vector<256x128xf32> -> vector<256x128xf32>
    %48 = arith.addf %45, %47 : vector<256x128xf32>
    %c0_60 = arith.constant 0 : index
    %c0_61 = arith.constant 0 : index
    %49 = vector.load %arg10[%c0_60, %c0_61] : memref<256x128xf32, #tpu.memory_space<vmem>>, vector<256x128xf32>
    tpu.vector_store %arg10[%c0_60, %c0_61], %48 {strides = array<i32>} : memref<256x128xf32, #tpu.memory_space<vmem>>, vector<256x128xf32>,
    %c1_62 = arith.constant 1 : index
    %c2_63 = arith.constant 2 : index
    %c0_64 = arith.constant 0 : index
    %50 = vector.load %arg9[%c1_62, %c2_63, %c0_64] : memref<18x18x8xbf16, #tpu.memory_space<vmem>>, vector<16x16x8xbf16>
    %51 = vector.shape_cast %50 : vector<16x16x8xbf16> to vector<256x8xbf16>
    %c0_65 = arith.constant 0 : index
    %c0_66 = arith.constant 0 : index
    %52 = vector.load %arg10[%c0_65, %c0_66] : memref<256x128xf32, #tpu.memory_space<vmem>>, vector<256x128xf32>
    %c40 = arith.constant 40 : index
    %c0_67 = arith.constant 0 : index
    %53 = vector.load %arg6[%c40, %c0_67] : memref<72x128xbf16, #tpu.memory_space<vmem>>, vector<8x128xbf16>
    %cst_68 = arith.constant dense<0.000000e+00> : vector<256x128xf32>
    %54 = tpu.matmul %51, %53, %cst_68 {dimension_numbers = #tpu.dot_dimension_numbers<[1], [0], [0], [1], [0, 0, 1, 1], [], []>} : vector<256x8xbf16>, vector<8x128xbf16>, vector<256x128xf32> -> vector<256x128xf32>
    %55 = arith.addf %52, %54 : vector<256x128xf32>
    %c0_69 = arith.constant 0 : index
    %c0_70 = arith.constant 0 : index
    %56 = vector.load %arg10[%c0_69, %c0_70] : memref<256x128xf32, #tpu.memory_space<vmem>>, vector<256x128xf32>
    tpu.vector_store %arg10[%c0_69, %c0_70], %55 {strides = array<i32>} : memref<256x128xf32, #tpu.memory_space<vmem>>, vector<256x128xf32>,
    %c2_71 = arith.constant 2 : index
    %c0_72 = arith.constant 0 : index
    %c0_73 = arith.constant 0 : index
    %57 = vector.load %arg9[%c2_71, %c0_72, %c0_73] : memref<18x18x8xbf16, #tpu.memory_space<vmem>>, vector<16x16x8xbf16>
    %58 = vector.shape_cast %57 : vector<16x16x8xbf16> to vector<256x8xbf16>
    %c0_74 = arith.constant 0 : index
    %c0_75 = arith.constant 0 : index
    %59 = vector.load %arg10[%c0_74, %c0_75] : memref<256x128xf32, #tpu.memory_space<vmem>>, vector<256x128xf32>
    %c48 = arith.constant 48 : index
    %c0_76 = arith.constant 0 : index
    %60 = vector.load %arg6[%c48, %c0_76] : memref<72x128xbf16, #tpu.memory_space<vmem>>, vector<8x128xbf16>
    %cst_77 = arith.constant dense<0.000000e+00> : vector<256x128xf32>
    %61 = tpu.matmul %58, %60, %cst_77 {dimension_numbers = #tpu.dot_dimension_numbers<[1], [0], [0], [1], [0, 0, 1, 1], [], []>} : vector<256x8xbf16>, vector<8x128xbf16>, vector<256x128xf32> -> vector<256x128xf32>
    %62 = arith.addf %59, %61 : vector<256x128xf32>
    %c0_78 = arith.constant 0 : index
    %c0_79 = arith.constant 0 : index
    %63 = vector.load %arg10[%c0_78, %c0_79] : memref<256x128xf32, #tpu.memory_space<vmem>>, vector<256x128xf32>
    tpu.vector_store %arg10[%c0_78, %c0_79], %62 {strides = array<i32>} : memref<256x128xf32, #tpu.memory_space<vmem>>, vector<256x128xf32>,
    %c2_80 = arith.constant 2 : index
    %c1_81 = arith.constant 1 : index
    %c0_82 = arith.constant 0 : index
    %64 = vector.load %arg9[%c2_80, %c1_81, %c0_82] : memref<18x18x8xbf16, #tpu.memory_space<vmem>>, vector<16x16x8xbf16>
    %65 = vector.shape_cast %64 : vector<16x16x8xbf16> to vector<256x8xbf16>
    %c0_83 = arith.constant 0 : index
    %c0_84 = arith.constant 0 : index
    %66 = vector.load %arg10[%c0_83, %c0_84] : memref<256x128xf32, #tpu.memory_space<vmem>>, vector<256x128xf32>
    %c56 = arith.constant 56 : index
    %c0_85 = arith.constant 0 : index
    %67 = vector.load %arg6[%c56, %c0_85] : memref<72x128xbf16, #tpu.memory_space<vmem>>, vector<8x128xbf16>
    %cst_86 = arith.constant dense<0.000000e+00> : vector<256x128xf32>
    %68 = tpu.matmul %65, %67, %cst_86 {dimension_numbers = #tpu.dot_dimension_numbers<[1], [0], [0], [1], [0, 0, 1, 1], [], []>} : vector<256x8xbf16>, vector<8x128xbf16>, vector<256x128xf32> -> vector<256x128xf32>
    %69 = arith.addf %66, %68 : vector<256x128xf32>
    %c0_87 = arith.constant 0 : index
    %c0_88 = arith.constant 0 : index
    %70 = vector.load %arg10[%c0_87, %c0_88] : memref<256x128xf32, #tpu.memory_space<vmem>>, vector<256x128xf32>
    tpu.vector_store %arg10[%c0_87, %c0_88], %69 {strides = array<i32>} : memref<256x128xf32, #tpu.memory_space<vmem>>, vector<256x128xf32>,
    %c2_89 = arith.constant 2 : index
    %c2_90 = arith.constant 2 : index
    %c0_91 = arith.constant 0 : index
    %71 = vector.load %arg9[%c2_89, %c2_90, %c0_91] : memref<18x18x8xbf16, #tpu.memory_space<vmem>>, vector<16x16x8xbf16>
    %72 = vector.shape_cast %71 : vector<16x16x8xbf16> to vector<256x8xbf16>
    %c0_92 = arith.constant 0 : index
    %c0_93 = arith.constant 0 : index
    %73 = vector.load %arg10[%c0_92, %c0_93] : memref<256x128xf32, #tpu.memory_space<vmem>>, vector<256x128xf32>
    %c64 = arith.constant 64 : index
    %c0_94 = arith.constant 0 : index
    %74 = vector.load %arg6[%c64, %c0_94] : memref<72x128xbf16, #tpu.memory_space<vmem>>, vector<8x128xbf16>
    %cst_95 = arith.constant dense<0.000000e+00> : vector<256x128xf32>
    %75 = tpu.matmul %72, %74, %cst_95 {dimension_numbers = #tpu.dot_dimension_numbers<[1], [0], [0], [1], [0, 0, 1, 1], [], []>} : vector<256x8xbf16>, vector<8x128xbf16>, vector<256x128xf32> -> vector<256x128xf32>
    %76 = arith.addf %73, %75 : vector<256x128xf32>
    %c0_96 = arith.constant 0 : index
    %c0_97 = arith.constant 0 : index
    %77 = vector.load %arg10[%c0_96, %c0_97] : memref<256x128xf32, #tpu.memory_space<vmem>>, vector<256x128xf32>
    tpu.vector_store %arg10[%c0_96, %c0_97], %76 {strides = array<i32>} : memref<256x128xf32, #tpu.memory_space<vmem>>, vector<256x128xf32>,
    %c0_98 = arith.constant 0 : index
    %c0_99 = arith.constant 0 : index
    %78 = vector.load %arg10[%c0_98, %c0_99] : memref<256x128xf32, #tpu.memory_space<vmem>>, vector<256x128xf32>
    %c0_100 = arith.constant 0 : index
    %c0_101 = arith.constant 0 : index
    %79 = vector.load %arg7[%c0_100, %c0_101] : memref<1x128xf32, #tpu.memory_space<vmem>>, vector<1x128xf32>
    %80 = vector.broadcast %79 : vector<1x128xf32> to vector<256x128xf32>
    %81 = arith.addf %78, %80 : vector<256x128xf32>
    %82 = arith.negf %81 : vector<256x128xf32>
    %83 = math.exp %82 : vector<256x128xf32>
    %cst_102 = arith.constant 1.000000e+00 : f32
    %84 = vector.broadcast %cst_102 : f32 to vector<256x128xf32>
    %85 = arith.addf %84, %83 : vector<256x128xf32>
    %86 = arith.divf %84, %85 : vector<256x128xf32>
    %87 = arith.mulf %81, %86 : vector<256x128xf32>
    %88 = vector.shape_cast %87 : vector<256x128xf32> to vector<1x1x256x128xf32>
    %89 = arith.truncf %88 : vector<1x1x256x128xf32> to vector<1x1x256x128xbf16>
    %c0_103 = arith.constant 0 : index
    %c0_104 = arith.constant 0 : index
    %c0_105 = arith.constant 0 : index
    %c0_106 = arith.constant 0 : index
    %90 = vector.load %arg8[%c0_103, %c0_104, %c0_105, %c0_106] : memref<1x1x256x128xbf16, #tpu.memory_space<vmem>>, vector<1x1x256x128xbf16>
    tpu.vector_store %arg8[%c0_103, %c0_104, %c0_105, %c0_106], %89 {strides = array<i32>} : memref<1x1x256x128xbf16, #tpu.memory_space<vmem>>, vector<1x1x256x128xbf16>,
    return
  }
  func.func @transform_0(%arg0: i32, %arg1: i32) -> (i32, i32, i32) {
    %c0_i32 = arith.constant 0 : i32
    %c0_i32_0 = arith.constant 0 : i32
    %c0_i32_1 = arith.constant 0 : i32
    return %arg1, %c0_i32, %c0_i32_0 : i32, i32, i32
  }
  func.func @transform_1(%arg0: i32, %arg1: i32) -> (i32, i32, i32) {
    %c0_i32 = arith.constant 0 : i32
    %c0_i32_0 = arith.constant 0 : i32
    %c0_i32_1 = arith.constant 0 : i32
    return %arg1, %c0_i32, %c0_i32_0 : i32, i32, i32
  }
  func.func @transform_2(%arg0: i32, %arg1: i32) -> (i32, i32, i32, i32) {
    %c0_i32 = arith.constant 0 : i32
    %c0_i32_0 = arith.constant 0 : i32
    %c0_i32_1 = arith.constant 0 : i32
    %c0_i32_2 = arith.constant 0 : i32
    return %arg0, %c0_i32, %c0_i32_0, %c0_i32_1 : i32, i32, i32, i32
  }
  func.func @transform_3(%arg0: i32, %arg1: i32) -> (i32, i32, i32, i32) {
    %c0_i32 = arith.constant 0 : i32
    %c0_i32_0 = arith.constant 0 : i32
    %c0_i32_1 = arith.constant 0 : i32
    %c0_i32_2 = arith.constant 0 : i32
    return %arg0, %c0_i32, %c0_i32_0, %c0_i32_1 : i32, i32, i32, i32
  }
  func.func @transform_4(%arg0: i32, %arg1: i32) -> (i32, i32) {
    %c0_i32 = arith.constant 0 : i32
    %c0_i32_0 = arith.constant 0 : i32
    %c0_i32_1 = arith.constant 0 : i32
    return %c0_i32, %c0_i32_0 : i32, i32
  }
  func.func @transform_5(%arg0: i32, %arg1: i32) -> (i32, i32) {
    %c0_i32 = arith.constant 0 : i32
    %c0_i32_0 = arith.constant 0 : i32
    %c0_i32_1 = arith.constant 0 : i32
    return %c0_i32, %c0_i32_0 : i32, i32
  }
  func.func @transform_6(%arg0: i32, %arg1: i32) -> (i32, i32, i32, i32) {
    %c0_i32 = arith.constant 0 : i32
    %c0_i32_0 = arith.constant 0 : i32
    %c0_i32_1 = arith.constant 0 : i32
    return %arg1, %arg0, %c0_i32, %c0_i32_0 : i32, i32, i32, i32
  }
}

</mosaic_0001>

<bundles_post_ra>
// kernel: tpu_custom_call.1
= control target key start
LH: loop header
LB: loop body
LE: loop exit
PB: predicated region body
PF: predicated region fallthrough
CT: control target
= control target key end

     0   :  { %11 = vsyncpa [#allocation5], 0  ;;  %s10382_s0 = inlined_call_operand.vmem [shape: f32[2,1,1], index: 0, kind: input, shape index: {}]   ;;  %s10383_s1 = inlined_call_operand.vmem [shape: f32[2,1,1], index: 1, kind: input, shape index: {}]   ;;  %s10384_s2 = inlined_call_operand.vmem [shape: f32[2,18,18,8], index: 2, kind: input, shape index: {}]   ;;  %s10385_s3 = inlined_call_operand.vmem [shape: f32[2,18,18,8], index: 3, kind: input, shape index: {}]   ;;  %s10386_s4 = inlined_call_operand.vmem [shape: bf16[72,128], index: 4, kind: input, shape index: {}]   ;;  %s10387_s5 = inlined_call_operand.vmem [shape: f32[1,128], index: 5, kind: input, shape index: {}]   ;;  %s10388_s6 = inlined_call_operand.hbm [shape: bf16[2,2,256,128], index: 6, kind: output, shape index: {}]  }
   0x1   :  { %13 = vsyncpa [#allocation5 + $0x1], 0  ;;  %s8605_s21 = smov 0   ;;  %s8607_s22 = smov 0  }
   0x2   :  { %s8609_s23 = smov 0   ;;  %s8611_s24 = smov 0  }
   0x3   :  { %s8613_s25 = smov 0   ;;  %s8615_s26 = smov 0  }
   0x4   :  { %s8617_s27 = smov 0   ;;  %s8619_s28 = smov 0  }
   0x5 LB: > { %s6837_s29 = sadd.s32 4294967295, %s8564_s28   ;;  %s6838_s30 = sadd.s32 4294967294, %s8564_s28   ;;  %s8564_s28 = sphi %s8619_s28, %s19_s28   ;;  %s8560_s27 = sphi %s8617_s27, %s10401_s27   ;;  %s8556_s26 = sphi %s8615_s26, %s10400_s26   ;;  %s8552_s25 = sphi %s8613_s25, %s10399_s25   ;;  %s8548_s24 = sphi %s8611_s24, %s10398_s24   ;;  %s8544_s23 = sphi %s8609_s23, %s10397_s23   ;;  %s8540_s22 = sphi %s8607_s22, %s10396_s22   ;;  %s8536_s21 = sphi %s8605_s21, %s10395_s21  }
   0x6   : > { %s28_s7 = sadd.s32 1, %s8556_s26  ;;  %s31_s8 = sadd.s32 1, %s8560_s27 }
   0x7   : > { %p29_p0 = scmp.ge.s32.totalorder %s28_s7, 2  ;;  %p196_p1 = scmp.ne.s32.totalorder %s8544_s23, %s8540_s22 }
   0x8   : > { %p197_p2 = scmp.eq.s32.totalorder %s6837_s29, 3  ;;  %p202_p5 = scmp.ne.s32.totalorder %s8540_s22, %s8536_s21 }
   0x9   : > { %s10403_s7 = smov (%p29_p0, %s28_s7), 0  ;;  %s10405_s8 = smov (!%p29_p0, %s31_s8), %s8560_s27 }
   0xa   : > { %s181_s9 = ssub.s32 %s8556_s26, %s10403_s7  ;;  %p8656_p3 = por %p197_p2, %p196_p1 }
   0xb   : > { %p33_p4 = scmp.ge.s32.totalorder %s10405_s8, 2  ;;  %p203_p6 = scmp.eq.s32.totalorder %s6838_s30, 3 }
   0xc   : > { %p6841_p7 = scmp.ge.s32.totalorder %s8564_s28, 1  ;;  %p255_p9 = scmp.lt.s32.totalorder %s8564_s28, 5 }
   0xd   : > { %s10407_s8 = smov (%p33_p4, %s10405_s8), 0  ;;  %p8665_p8 = por %p203_p6, %p202_p5 }
   0xe   : > { %s182_s12 = ssub.s32 %s8560_s27, %s10407_s8  ;;  %s186_s13 = sadd.s32 1, %s8544_s23 }
   0xf   : > { %s183_s14 = sor.u32 %s182_s12, %s181_s9  ;;  %p256_p10 = pnand %p6841_p7, %p255_p9 }
  0x10   : > { %p184_p11 = scmp.eq.s32.totalorder %s183_s14, 0  ;;  %p296_p12 = scmp.lt.s32.totalorder (!%p256_p10), %s8548_s24, 1  ;;  %v8566_v0 = vmov (!%p256_p10), 0   ;;  %v989_v3 = vld [vmem:[%s10386_s4] sm:$0xf] (!%p256_p10)  ;;  %vm1119_vm0 = vcmask (!%p256_p10), 1043456  }
  0x11   : > { %259 = sbr.rel (%p256_p10) target bundleno = 792 (0x318), region = 44  ;;  %8291 = vset.pattern.permute.xlu0 (!%p256_p10), %v8566_v0  ;;  %8206 = vmatprep.subr.msk.bf16.mxu1 (!%p256_p10), %vm1119_vm0, %v989_v3  ;;  %v1121_v4 = vsel (!%p256_p10), %vm1119_vm0, %v989_v3, 0  ;;  %v3594_v5 = vld [vmem:[%s10386_s4 + $0x10] sm:$0xf] (!%p256_p10)  ;;  %v1815_v7 = vld [vmem:[%s10386_s4 + $0x4] sm:$0xf] (!%p256_p10) }
  0x12   : > { %s8674_s15 = scalar_select %p184_p11, %s8544_s23, %s186_s13  }
  0x13   : > { %7643 = vmatpush3.bf16.msra.mxu1 (!%p256_p10), %v1121_v4  ;;  %8210 = vmatprep.subr.msk.bf16.mxu0 (!%p256_p10), %vm1119_vm0, %v3594_v5  ;;  %v8694_v6 = vsel (!%p256_p10), %vm1119_vm0, %v3594_v5, 0  ;;  %v4159_v8 = vld [vmem:[%s10386_s4 + $0x14] sm:$0xf] (!%p256_p10)  ;;  %p302_p13 = scmp.lt.s32.totalorder (!%p256_p10), %s8552_s25, 1  ;;  %v8726_v15 = vld [vmem:[%s10386_s4 + $0x18] sm:$0xf] (!%p256_p10) }
  0x14   : > { %7779 = vmatpush3.bf16.msra.mxu0 (!%p256_p10), %v8694_v6  ;;  %8207 = vmatprep.subr.msk.bf16.mxu1 (!%p256_p10), %vm1119_vm0, %v1815_v7  ;;  %v8731_v16 = vld [vmem:[%s10386_s4 + $0x8] sm:$0xf] (!%p256_p10)  ;;  %vm837_vm1 = vcmask (!%p256_p10), 60416   ;;  %v8744_v26 = vsel (!%p256_p10), %vm1119_vm0, %v1815_v7, 0  ;;  %v8747_v27 = vsel (!%p256_p10), %vm1119_vm0, %v4159_v8, 0  ;;  %v8752_v29 = vsel (!%p256_p10), %vm1119_vm0, %v8726_v15, 0 }
  0x15   : > { %8212 = vmatprep.subr.msk.bf16.mxu0 (!%p256_p10), %vm1119_vm0, %v4159_v8  ;;  %v8756_v30 = vsel (!%p256_p10), %vm1119_vm0, %v8731_v16, 0  ;;  %vm840_vm2 = vcmask (!%p256_p10), 57344   ;;  %vm1070_vm3 = vcmask (!%p256_p10), 64512   ;;  %vm1396_vm4 = vsmask.f32 (!%p256_p10), 3328  ;;  %s7303_s14 = sshll.u32 (!%p256_p10), %s8552_s25, 5 }
  0x16   : > { %vm1397_vm5 = vsmask.f32 (!%p256_p10), 7440  ;;  %vm2236_vm7 = vcmask (!%p256_p10), 1042432   ;;  %vm2237_vm8 = vcmask (!%p256_p10), 1046532   ;;  %s7304_s17 = sshll.u32 (!%p256_p10), %s8548_s24, 6 }
  0x17   : > { %vm8877_vm6 = vmor (!%p256_p10), %vm1396_vm4, %vm1397_vm5  ;;  %s6728_s18 = sadd.s32 (!%p256_p10), %s7304_s17, %s7303_s14 }
  0x18   : > { %s297_s16 = scalar_select %p296_p12, %s8548_s24, 1  ;;  %vm8976_vm9 = vmor %vm2236_vm7, %vm2237_vm8 }
  0x19   : > { %s303_s20 = scalar_select %p302_p13, %s8552_s25, 1 }
  0x1a   : > { %s298_s19 = scalar_lea.vmem %s10382_s0, %s297_s16  ;;  %s301_s30 = scalar_lea.vmem %s10383_s1, %s297_s16 }
  0x1b   : > { %v6845_v1 = vld [vmem:[%s298_s19] ss:$0 sm:$0xff]  ;;  %s8216_s29 = smul.u32 432, %s303_s20  ;;  %s7305_s19 = sshll.u32 %s6728_s18, 6 }
  0x1c   : > { %374 = vperm.xlu0 %8291, %v6845_v1   ;;  %v6846_v2 = vld [vmem:[%s301_s30] ss:$0 sm:$0xff]  ;;  %s293_s30 = sand.u32 1, %s8540_s22  }
  0x1d   : > { %s8710_s12 = scalar_lea.vmem %s10384_s2, %s8216_s29  ;;  %s8719_s16 = scalar_lea.vmem %s10385_s3, %s8216_s29 }
  0x1e   : > { %v314_v9 = vld [vmem:[%s8710_s12] sm:$0xff]  ;;  %v315_v10 = vld [vmem:[%s8710_s12 + $0x8] sm:$0xff]  ;;  %v317_v11 = vld [vmem:[%s8710_s12 + $0x18] sm:$0xff]  ;;  %s10171_s9 = sshll.u32 %s293_s30, 7  ;;  %s10322_s29 = scalar_lea.hbm %s10388_s6, %s7305_s19 }
  0x1f   : > { %v318_v12 = vld [vmem:[%s8710_s12 + $0x20] sm:$0xff]  ;;  %v320_v13 = vld [vmem:[%s8710_s12 + $0x30] sm:$0xff]  ;;  %v321_v14 = vld [vmem:[%s8710_s12 + $0x38] sm:$0xff]  ;;  %s10193_s13 = scalar_lea.vmem [#allocation4], %s10171_s9  ;;  %s8567_s9 = smov [#allocation4]  }
  0x20   : > { %492 = vperm.xlu0 %8291, %v6846_v2   ;;  %v323_v17 = vld [vmem:[%s8710_s12 + $0x48] sm:$0xff]  ;;  %v324_v18 = vld [vmem:[%s8710_s12 + $0x50] sm:$0xff]  ;;  %v326_v20 = vld [vmem:[%s8710_s12 + $0x60] sm:$0xff]  ;;  %s6731_s20 = sshll.u32 %s10193_s13, 4  ;;  %s8474_s14 = sshll.u32 %s8567_s9, 4  ;;  %s10324_s20 = int_to_ptr.vmem [resolvable:$true] %s6731_s20  ;;  %s8475_s14 = int_to_ptr.vmem [resolvable:$false] %s8474_s14 }
  0x21   : > { %v319_v19 = vld [vmem:[%s8710_s12 + $0x28] sm:$0x3]  ;;  %v322_v22 = vld [vmem:[%s8710_s12 + $0x40] sm:$0x3]  ;;  %v325_v28 = vld [vmem:[%s8710_s12 + $0x58] sm:$0x3]  ;;  %p8477_p4 = scmp.lt.s32.totalorder %s10324_s20, %s8475_s14 }
  0x22   : > { %v327_v21 = vld [vmem:[%s8710_s12 + $0x68] sm:$0xff]  ;;  %v432_v24 = vld [vmem:[%s8719_s16] sm:$0xff]  ;;  %v329_v35 = vld [vmem:[%s8710_s12 + $0x78] sm:$0xff]  ;;  %s8476_s17 = scalar_lea.vmem %s8475_s14, 4096 }
  0x23   : > { %v433_v25 = vld [vmem:[%s8719_s16 + $0x8] sm:$0xff]  ;;  %v330_v36 = vld [vmem:[%s8710_s12 + $0x80] sm:$0xff]  ;;  %v332_v37 = vld [vmem:[%s8710_s12 + $0x90] sm:$0xff] }
  0x24   : > { %v435_v38 = vld [vmem:[%s8719_s16 + $0x18] sm:$0xff]  ;;  %v436_v39 = vld [vmem:[%s8719_s16 + $0x20] sm:$0xff]  ;;  %v438_v42 = vld [vmem:[%s8719_s16 + $0x30] sm:$0xff] }
  0x25   : > { %v439_v45 = vld [vmem:[%s8719_s16 + $0x38] sm:$0xff]  ;;  %v441_v46 = vld [vmem:[%s8719_s16 + $0x48] sm:$0xff]  ;;  %v442_v47 = vld [vmem:[%s8719_s16 + $0x50] sm:$0xff] }
  0x26   : > { %v437_v5 = vld [vmem:[%s8719_s16 + $0x28] sm:$0x3]  ;;  %v444_v7 = vld [vmem:[%s8719_s16 + $0x60] sm:$0xff] }
  0x9b   : > { %v8739_v23 = vpop.permute.xlu0 %374 }
  0x9c   : > { %v377_v31 = vmul.f32 %v8739_v23, %v314_v9  ;;  %v378_v32 = vmul.f32 %v8739_v23, %v315_v10  ;;  %v380_v33 = vmul.f32 %v8739_v23, %v317_v11  ;;  %v381_v34 = vmul.f32 %v8739_v23, %v318_v12  ;;  %v445_v12 = vld [vmem:[%s8719_s16 + $0x68] sm:$0xff] }
  0x9d   : > { %v383_v40 = vmul.f32 %v8739_v23, %v320_v13  ;;  %v384_v41 = vmul.f32 %v8739_v23, %v321_v14  ;;  %v386_v43 = vmul.f32 %v8739_v23, %v323_v17  ;;  %v387_v44 = vmul.f32 %v8739_v23, %v324_v18  ;;  %v440_v13 = vld [vmem:[%s8719_s16 + $0x40] sm:$0x3]  ;;  %v443_v14 = vld [vmem:[%s8719_s16 + $0x58] sm:$0x3] }
  0x9e   : > { %v382_v48 = vmul.f32 %v8739_v23, %v319_v19  ;;  %v389_v49 = vmul.f32 %v8739_v23, %v326_v20  ;;  %v390_v50 = vmul.f32 %v8739_v23, %v327_v21  ;;  %v385_v51 = vmul.f32 %v8739_v23, %v322_v22  ;;  %v447_v21 = vld [vmem:[%s8719_s16 + $0x78] sm:$0xff]  ;;  %v448_v22 = vld [vmem:[%s8719_s16 + $0x80] sm:$0xff] }
  0x9f   : > { %v8779_v52 = vpop.permute.xlu0 %492  ;;  %v388_v53 = vmul.f32 %v8739_v23, %v325_v28  ;;  %v392_v54 = vmul.f32 %v8739_v23, %v329_v35  ;;  %v393_v55 = vmul.f32 %v8739_v23, %v330_v36  ;;  %v8785_v56 = vmul.f32 %v8739_v23, %v332_v37  ;;  %v450_v37 = vld [vmem:[%s8719_s16 + $0x90] sm:$0xff] }
  0xa0   : > { %v495_v57 = vmul.f32 %v8779_v52, %v432_v24  ;;  %v496_v58 = vmul.f32 %v8779_v52, %v433_v25  ;;  %v498_v59 = vmul.f32 %v8779_v52, %v435_v38  ;;  %v499_v60 = vmul.f32 %v8779_v52, %v436_v39  ;;  %v333_v24 = vld [vmem:[%s8710_s12 + $0x98] sm:$0xff] }
  0xa1   : > { %v501_v61 = vmul.f32 %v8779_v52, %v438_v42  ;;  %v502_v62 = vmul.f32 %v8779_v52, %v439_v45  ;;  %v504_v63 = vmul.f32 %v8779_v52, %v441_v46  ;;  %v505_v0 = vmul.f32 %v8779_v52, %v442_v47  ;;  %v451_v46 = vld [vmem:[%s8719_s16 + $0x98] sm:$0xff]  ;;  %v328_v47 = vld [vmem:[%s8710_s12 + $0x70] sm:$0x3] }
  0xa2   : > { %v549_v1 = vadd.f32 %v495_v57, %v377_v31  ;;  %v550_v2 = vadd.f32 %v496_v58, %v378_v32  ;;  %v552_v3 = vadd.f32 %v498_v59, %v380_v33  ;;  %v553_v4 = vadd.f32 %v499_v60, %v381_v34 }
  0xa3   : > { %v555_v8 = vadd.f32 %v501_v61, %v383_v40  ;;  %v556_v9 = vadd.f32 %v502_v62, %v384_v41  ;;  %v558_v10 = vadd.f32 %v504_v63, %v386_v43  ;;  %v559_v11 = vadd.f32 %v505_v0, %v387_v44  ;;  %v446_v61 = vld [vmem:[%s8719_s16 + $0x70] sm:$0x3]  ;;  %v331_v62 = vld [vmem:[%s8710_s12 + $0x88] sm:$0x3] }
  0xa4   : > { %v7308_v17 = vpack.c.bf16 %v549_v1, %v549_v1  ;;  %v7309_v18 = vpack.c.bf16 %v550_v2, %v550_v2  ;;  %v7311_v19 = vpack.c.bf16 %v552_v3, %v552_v3  ;;  %v7312_v20 = vpack.c.bf16 %v553_v4, %v553_v4  ;;  %v449_v63 = vld [vmem:[%s8719_s16 + $0x88] sm:$0x3]  ;;  %v338_v2 = vld [vmem:[%s8710_s12 + $0xc0] sm:$0xff] }
  0xa5   : > { %v7314_v25 = vpack.c.bf16 %v555_v8, %v555_v8  ;;  %v7315_v28 = vpack.c.bf16 %v556_v9, %v556_v9  ;;  %v7317_v31 = vpack.c.bf16 %v558_v10, %v558_v10  ;;  %v7318_v32 = vpack.c.bf16 %v559_v11, %v559_v11  ;;  %v335_v1 = vld [vmem:[%s8710_s12 + $0xa8] sm:$0xff] }
  0xa6   : > { %838 = vst.msk [vmem:[#allocation2] sm:$0xf] %vm837_vm1, %v7308_v17  ;;  %839 = vst.msk [vmem:[#allocation2 + $0x4] sm:$0xf] %vm837_vm1, %v7309_v18  ;;  %v500_v33 = vmul.f32 %v8779_v52, %v437_v5  ;;  %v507_v34 = vmul.f32 %v8779_v52, %v444_v7  ;;  %v508_v35 = vmul.f32 %v8779_v52, %v445_v12  ;;  %v454_v5 = vld [vmem:[%s8719_s16 + $0xb0] sm:$0xff]  ;;  %v339_v7 = vld [vmem:[%s8710_s12 + $0xc8] sm:$0xff] }
  0xa7   : > { %842 = vst.msk [vmem:[#allocation2 + $0xc] sm:$0xf] %vm837_vm1, %v7311_v19  ;;  %843 = vst.msk [vmem:[#allocation2 + $0x10] sm:$0xf] %vm837_vm1, %v7312_v20  ;;  %v503_v36 = vmul.f32 %v8779_v52, %v440_v13  ;;  %v506_v38 = vmul.f32 %v8779_v52, %v443_v14  ;;  %v510_v39 = vmul.f32 %v8779_v52, %v447_v21  ;;  %v456_v12 = vld [vmem:[%s8719_s16 + $0xc0] sm:$0xff]  ;;  %v457_v13 = vld [vmem:[%s8719_s16 + $0xc8] sm:$0xff] }
  0xa8   : > { %845 = vst.msk [vmem:[#allocation2 + $0x18] sm:$0xf] %vm837_vm1, %v7314_v25  ;;  %846 = vst.msk [vmem:[#allocation2 + $0x1c] sm:$0xf] %vm837_vm1, %v7315_v28  ;;  %v511_v40 = vmul.f32 %v8779_v52, %v448_v22  ;;  %v396_v41 = vmul.f32 %v8739_v23, %v333_v24  ;;  %v554_v42 = vadd.f32 %v500_v33, %v382_v48  ;;  %v334_v14 = vld [vmem:[%s8710_s12 + $0xa0] sm:$0x3] }
  0xa9   : > { %848 = vst.msk [vmem:[#allocation2 + $0x24] sm:$0xf] %vm837_vm1, %v7317_v31  ;;  %849 = vst.msk [vmem:[#allocation2 + $0x28] sm:$0xf] %vm837_vm1, %v7318_v32  ;;  %v561_v43 = vadd.f32 %v507_v34, %v389_v49  ;;  %v562_v44 = vadd.f32 %v508_v35, %v390_v50  ;;  %v557_v45 = vadd.f32 %v503_v36, %v385_v51  ;;  %v336_v51 = vld [vmem:[%s8710_s12 + $0xb0] sm:$0xff] }
  0xaa   : > { %v560_v57 = vadd.f32 %v506_v38, %v388_v53  ;;  %v564_v58 = vadd.f32 %v510_v39, %v392_v54  ;;  %v565_v59 = vadd.f32 %v511_v40, %v393_v55  ;;  %v513_v60 = vmul.f32 %v8779_v52, %v450_v37  ;;  %v453_v55 = vld [vmem:[%s8719_s16 + $0xa8] sm:$0xff] }
  0xab   : > { %v7313_v48 = vpack.c.bf16 %v554_v42, %v554_v42  ;;  %v7320_v49 = vpack.c.bf16 %v561_v43, %v561_v43  ;;  %v7321_v0 = vpack.c.bf16 %v562_v44, %v562_v44  ;;  %v7316_v50 = vpack.c.bf16 %v557_v45, %v557_v45 }
  0xac   : > { %v7319_v3 = vpack.c.bf16 %v560_v57, %v560_v57  ;;  %v7323_v4 = vpack.c.bf16 %v564_v58, %v564_v58  ;;  %v7324_v53 = vpack.c.bf16 %v565_v59, %v565_v59  ;;  %v514_v54 = vmul.f32 %v8779_v52, %v451_v46 }
  0xad   : > { %844 = vst.msk [vmem:[#allocation2 + $0x14] sm:$0x1] %vm840_vm2, %v7313_v48  ;;  %847 = vst.msk [vmem:[#allocation2 + $0x20] sm:$0x1] %vm840_vm2, %v7316_v50  ;;  %v567_v8 = vadd.f32 %v513_v60, %v8785_v56  ;;  %v391_v9 = vmul.f32 %v8739_v23, %v328_v47  ;;  %v509_v10 = vmul.f32 %v8779_v52, %v446_v61  ;;  %v8292_v17 = vld [vmem:[#allocation2] sm:$0xff]  }
  0xae   : > { %851 = vst.msk [vmem:[#allocation2 + $0x30] sm:$0xf] %vm837_vm1, %v7320_v49  ;;  %852 = vst.msk [vmem:[#allocation2 + $0x34] sm:$0xf] %vm837_vm1, %v7321_v0  ;;  %v394_v11 = vmul.f32 %v8739_v23, %v331_v62  ;;  %v568_v18 = vadd.f32 %v514_v54, %v396_v41  ;;  %v512_v19 = vmul.f32 %v8779_v52, %v449_v63  ;;  %v8293_v21 = vld [vmem:[#allocation2 + $0xc] sm:$0xff]   ;;  %7644 = vmatprep.mubr.msk.bf16.mxu1 %vm1070_vm3, %v8292_v17 }
  0xaf   : > { %850 = vst.msk [vmem:[#allocation2 + $0x2c] sm:$0x1] %vm840_vm2, %v7319_v3  ;;  %v398_v56 = vmul.f32 %v8739_v23, %v335_v1  ;;  %v399_v20 = vmul.f32 %v8739_v23, %v336_v51  ;;  %v7326_v22 = vpack.c.bf16 %v567_v8, %v567_v8  ;;  %v563_v24 = vadd.f32 %v509_v10, %v391_v9  ;;  %v8294_v31 = vld [vmem:[#allocation2 + $0x18] sm:$0xff]   ;;  %v3130_v40 = vld [vmem:[#allocation2 + $0xc] sm:$0xf] }
  0xb0   : > { %854 = vst.msk [vmem:[#allocation2 + $0x3c] sm:$0xf] %vm837_vm1, %v7323_v4  ;;  %855 = vst.msk [vmem:[#allocation2 + $0x40] sm:$0xf] %vm837_vm1, %v7324_v53  ;;  %v516_v25 = vmul.f32 %v8779_v52, %v453_v55  ;;  %v517_v28 = vmul.f32 %v8779_v52, %v454_v5  ;;  %v7327_v32 = vpack.c.bf16 %v568_v18, %v568_v18  ;;  %7645 = vmatmul.mubr.msk.bf16.vlgmr.msra.gmra.mrb[0].mxu1 %vm1070_vm3, %v8293_v21  ;;  %v3131_v41 = vld [vmem:[#allocation2 + $0x10] sm:$0xf] }
  0xb1   : > { %v566_v33 = vadd.f32 %v512_v19, %v394_v11  ;;  %v401_v34 = vmul.f32 %v8739_v23, %v338_v2  ;;  %v402_v35 = vmul.f32 %v8739_v23, %v339_v7  ;;  %857 = vst.msk [vmem:[#allocation2 + $0x48] sm:$0xf] %vm837_vm1, %v7326_v22  ;;  %v7322_v36 = vpack.c.bf16 %v563_v24, %v563_v24  ;;  %v3133_v42 = vld [vmem:[#allocation2 + $0x18] sm:$0xf]  ;;  %v3134_v59 = vld [vmem:[#allocation2 + $0x1c] sm:$0xf] }
  0xb2   : > { %v570_v37 = vadd.f32 %v516_v25, %v398_v56  ;;  %v571_v38 = vadd.f32 %v517_v28, %v399_v20  ;;  %v519_v39 = vmul.f32 %v8779_v52, %v456_v12  ;;  %7648 = vmatprep.mubr.msk.bf16.mxu1 %vm1070_vm3, %v8294_v31  ;;  %7677 = vmatpush3.bf16.msra.mxu1 %v8744_v26  ;;  %v3179_v46 = vshrl.u32 %v3130_v40, 16  ;;  %v8295_v48 = vld [vmem:[#allocation2 + $0x24] sm:$0xff]  }
  0xb3   : > { %858 = vst.msk [vmem:[#allocation2 + $0x4c] sm:$0xf] %vm837_vm1, %v7327_v32  ;;  %v7325_v43 = vpack.c.bf16 %v566_v33, %v566_v33  ;;  %v520_v44 = vmul.f32 %v8779_v52, %v457_v13  ;;  %v8863_v45 = vmul.f32 %v8739_v23, %v334_v14  ;;  %v3182_v47 = vshll.u32 %v3130_v40, 16  ;;  %8208 = vmatprep.subr.msk.bf16.mxu1 %vm1119_vm0, %v8731_v16  ;;  %v3136_v8 = vld [vmem:[#allocation2 + $0x24] sm:$0xf] }
  0xb4   : > { %v3188_v57 = vshll.u32 %v3131_v41, 16  ;;  %v3192_v58 = vshrl.u32 %v3131_v41, 16  ;;  %853 = vst.msk [vmem:[#allocation2 + $0x38] sm:$0x1] %vm840_vm2, %v7322_v36  ;;  %v3132_v26 = vld [vmem:[#allocation2 + $0x14] sm:$0x1]  ;;  %v7329_v60 = vpack.c.bf16 %v570_v37, %v570_v37  ;;  %v7330_v61 = vpack.c.bf16 %v571_v38, %v571_v38 }
  0xb5   : > { %856 = vst.msk [vmem:[#allocation2 + $0x44] sm:$0x1] %vm840_vm2, %v7325_v43  ;;  %v8869_v62 = vadd.f32 %v519_v39, %v401_v34  ;;  %v8871_v63 = vadd.f32 %v520_v44, %v402_v35  ;;  %v3181_v49 = vrot.slane %v3179_v46, 4  ;;  %v3184_v0 = vrot.slane %v3182_v47, 5  ;;  %v8296_v2 = vld [vmem:[#allocation2 + $0x30] sm:$0xff]  }
  0xb6   : > { %v3190_v50 = vrot.slane %v3188_v57, 5  ;;  %v3194_v1 = vrot.slane %v3192_v58, 4  ;;  %v3198_v51 = vshll.u32 %v3132_v26, 16  ;;  %v3135_v3 = vld [vmem:[#allocation2 + $0x20] sm:$0x1]  ;;  %v3203_v4 = vshrl.u32 %v3133_v42, 16 }
  0xb7   : > { %v3206_v53 = vshll.u32 %v3133_v42, 16  ;;  %v3212_v16 = vshll.u32 %v3134_v59, 16  ;;  %860 = vst.msk [vmem:[#allocation2 + $0x54] sm:$0xf] %vm837_vm1, %v7329_v60  ;;  %861 = vst.msk [vmem:[#allocation2 + $0x58] sm:$0xf] %vm837_vm1, %v7330_v61  ;;  %v3185_v54 = vor.u32 %v3184_v0, %v3181_v49 }
  0xb8   : > { %v3195_v55 = vor.u32 %v3194_v1, %v3190_v50  ;;  %v3216_v5 = vshrl.u32 %v3134_v59, 16  ;;  %v3222_v7 = vshll.u32 %v3135_v3, 16  ;;  %v3137_v9 = vld [vmem:[#allocation2 + $0x28] sm:$0xf]  ;;  %v3200_v11 = vrot.slane %v3198_v51, 5  ;;  %7649 = vmatmul.mubr.msk.bf16.gmra.mrb[4].mxu1 %vm1070_vm3, %v8295_v48  ;;  %v8297_v47 = vld [vmem:[#allocation2 + $0x3c] sm:$0xff]  }
  0xb9   : > { %v3205_v12 = vrot.slane %v3203_v4, 4  ;;  %v3208_v13 = vrot.slane %v3206_v53, 5  ;;  %v3214_v14 = vrot.slane %v3212_v16, 5  ;;  %v3138_v17 = vld [vmem:[#allocation2 + $0x2c] sm:$0x1]  ;;  %v3186_v18 = vrot.slane %v3185_v54, 4  ;;  %7652 = vmatprep.mubr.msk.bf16.mxu1 %vm1070_vm3, %v8296_v2 }
  0xba   : > { %v3196_v19 = vrot.slane %v3195_v55, 4  ;;  %v3218_v56 = vrot.slane %v3216_v5, 4  ;;  %v3224_v20 = vrot.slane %v3222_v7, 5  ;;  %v3227_v22 = vshrl.u32 %v3136_v8, 16  ;;  %v3139_v38 = vld [vmem:[#allocation2 + $0x30] sm:$0xf] }
  0xbb   : > { %v3209_v21 = vor.u32 %v3208_v13, %v3205_v12  ;;  %v3230_v24 = vshll.u32 %v3136_v8, 16  ;;  %v3236_v25 = vshll.u32 %v3137_v9, 16  ;;  %v3191_v28 = vsel %vm8877_vm6, %v3186_v18, %v3190_v50  ;;  %v3140_v43 = vld [vmem:[#allocation2 + $0x34] sm:$0xf]  ;;  %v3141_v57 = vld [vmem:[#allocation2 + $0x38] sm:$0x1] }
  0xbc   : > { %v3201_v31 = vsel %vm8877_vm6, %v3196_v19, %v3200_v11  ;;  %v3219_v32 = vor.u32 %v3218_v56, %v3214_v14  ;;  %v3240_v33 = vshrl.u32 %v3137_v9, 16  ;;  %v3229_v36 = vrot.slane %v3227_v22, 4  ;;  %v3142_v49 = vld [vmem:[#allocation2 + $0x3c] sm:$0xf]  ;;  %v3143_v0 = vld [vmem:[#allocation2 + $0x40] sm:$0xf] }
  0xbd   : > { %v7045_v34 = vcombine.low %v3191_v28, %v3201_v31  ;;  %v3210_v35 = vrot.slane %v3209_v21, 4  ;;  %v3232_v37 = vrot.slane %v3230_v24, 5  ;;  %v3238_v40 = vrot.slane %v3236_v25, 5  ;;  %v8298_v51 = vld [vmem:[#allocation2 + $0x48] sm:$0xff]   ;;  %v3144_v7 = vld [vmem:[#allocation2 + $0x44] sm:$0x1] }
  0xbe   : > { %v3220_v39 = vrot.slane %v3219_v32, 4  ;;  %v3242_v41 = vrot.slane %v3240_v33, 4  ;;  %v3246_v42 = vshll.u32 %v3138_v17, 16  ;;  %v3251_v58 = vshrl.u32 %v3139_v38, 16  ;;  %v452_v17 = vld [vmem:[%s8719_s16 + $0xa0] sm:$0x3] }
  0xbf   : > { %7780 = vmatprep.mubr.msk.bf16.mxu0 %vm1070_vm3, %v7045_v34  ;;  %v3215_v44 = vsel %vm8877_vm6, %v3210_v35, %v3214_v14  ;;  %v3233_v46 = vor.u32 %v3232_v37, %v3229_v36  ;;  %v3254_v59 = vshll.u32 %v3139_v38, 16  ;;  %v3260_v48 = vshll.u32 %v3140_v43, 16  ;;  %v3145_v21 = vld [vmem:[#allocation2 + $0x48] sm:$0xf]  ;;  %v8299_v37 = vld [vmem:[#allocation2 + $0x54] sm:$0xff]  }
  0xc0   : > { %v3225_v26 = vsel %vm8877_vm6, %v3220_v39, %v3224_v20  ;;  %v3243_v60 = vor.u32 %v3242_v41, %v3238_v40  ;;  %v3248_v61 = vrot.slane %v3246_v42, 5  ;;  %v3253_v2 = vrot.slane %v3251_v58, 4  ;;  %7653 = vmatmul.mubr.msk.bf16.gmra.mrb[8].mxu1 %vm1070_vm3, %v8297_v47  ;;  %v455_v47 = vld [vmem:[%s8719_s16 + $0xb8] sm:$0x3] }
  0xc1   : > { %v7046_v50 = vcombine.low %v3215_v44, %v3225_v26  ;;  %v3234_v1 = vrot.slane %v3233_v46, 4  ;;  %v3256_v3 = vrot.slane %v3254_v59, 5  ;;  %v3262_v53 = vrot.slane %v3260_v48, 5  ;;  %7656 = vmatprep.mubr.msk.bf16.mxu1 %vm1070_vm3, %v8298_v51 }
  0xc2   : > { %v3244_v4 = vrot.slane %v3243_v60, 4  ;;  %v3264_v16 = vshrl.u32 %v3140_v43, 16  ;;  %v3270_v54 = vshll.u32 %v3141_v57, 16  ;;  %v3275_v8 = vshrl.u32 %v3142_v49, 16  ;;  %v337_v43 = vld [vmem:[%s8710_s12 + $0xb8] sm:$0x3] }
  0xc3   : > { %7781 = vmatmul.mubr.msk.bf16.vlgmr.msra.gmra.mrb[0].mxu0 %vm1070_vm3, %v7046_v50  ;;  %v3239_v55 = vsel %vm8877_vm6, %v3234_v1, %v3238_v40  ;;  %v3257_v5 = vor.u32 %v3256_v3, %v3253_v2  ;;  %v3278_v9 = vshll.u32 %v3142_v49, 16  ;;  %v3284_v14 = vshll.u32 %v3143_v0, 16  ;;  %v3148_v57 = vld [vmem:[#allocation2 + $0x54] sm:$0xf]  ;;  %v341_v3 = vld [vmem:[%s8710_s12 + $0xd8] sm:$0xff] }
  0xc4   : > { %7813 = vmatpush3.bf16.msra.mxu0 %v8747_v27  ;;  %v3249_v11 = vsel %vm8877_vm6, %v3244_v4, %v3248_v61  ;;  %v3266_v12 = vrot.slane %v3264_v16, 4  ;;  %v3272_v13 = vrot.slane %v3270_v54, 5  ;;  %v3277_v56 = vrot.slane %v3275_v8, 4  ;;  %v3146_v27 = vld [vmem:[#allocation2 + $0x4c] sm:$0xf]  ;;  %v342_v4 = vld [vmem:[%s8710_s12 + $0xe0] sm:$0xff] }
  0xc5   : > { %v7047_v18 = vcombine.low %v3239_v55, %v3249_v11  ;;  %v3258_v19 = vrot.slane %v3257_v5, 4  ;;  %v3280_v20 = vrot.slane %v3278_v9, 5  ;;  %8213 = vmatprep.subr.msk.bf16.mxu0 %vm1119_vm0, %v8726_v15  ;;  %v3286_v24 = vrot.slane %v3284_v14, 5  ;;  %v3149_v61 = vld [vmem:[#allocation2 + $0x58] sm:$0xf]  ;;  %v345_v8 = vld [vmem:[%s8710_s12 + $0xf8] sm:$0xff] }
  0xc6   : > { %v3267_v22 = vor.u32 %v3266_v12, %v3262_v53  ;;  %v3288_v25 = vshrl.u32 %v3143_v0, 16  ;;  %v3294_v28 = vshll.u32 %v3144_v7, 16  ;;  %v7332_v33 = vpack.c.bf16 %v8869_v62, %v8869_v62  ;;  %v344_v7 = vld [vmem:[%s8710_s12 + $0xf0] sm:$0xff]  ;;  %v460_v14 = vld [vmem:[%s8719_s16 + $0xe0] sm:$0xff] }
  0xc7   : > { %7784 = vmatprep.mubr.msk.bf16.mxu0 %vm1070_vm3, %v7047_v18  ;;  %v3263_v31 = vsel %vm8877_vm6, %v3258_v19, %v3262_v53  ;;  %v3281_v32 = vor.u32 %v3280_v20, %v3277_v56  ;;  %v7333_v34 = vpack.c.bf16 %v8871_v63, %v8871_v63  ;;  %v515_v38 = vmul.f32 %v8779_v52, %v452_v17  ;;  %v459_v53 = vld [vmem:[%s8719_s16 + $0xd8] sm:$0xff]  ;;  %v462_v17 = vld [vmem:[%s8719_s16 + $0xf0] sm:$0xff] }
  0xc8   : > { %v3268_v35 = vrot.slane %v3267_v22, 4  ;;  %v3290_v15 = vrot.slane %v3288_v25, 4  ;;  %v3296_v36 = vrot.slane %v3294_v28, 5  ;;  %863 = vst.msk [vmem:[#allocation2 + $0x60] sm:$0xf] %vm837_vm1, %v7332_v33  ;;  %v3299_v40 = vshrl.u32 %v3145_v21, 16  ;;  %7657 = vmatmul.mubr.msk.bf16.gmra.mrb[12].mxu1 %vm1070_vm3, %v8299_v37 }
  0xc9   : > { %v3282_v39 = vrot.slane %v3281_v32, 4  ;;  %864 = vst.msk [vmem:[#allocation2 + $0x64] sm:$0xf] %vm837_vm1, %v7333_v34  ;;  %v3302_v41 = vshll.u32 %v3145_v21, 16  ;;  %v3308_v42 = vshll.u32 %v3146_v27, 16  ;;  %v569_v44 = vadd.f32 %v515_v38, %v8863_v45  ;;  %v463_v18 = vld [vmem:[%s8719_s16 + $0xf8] sm:$0xff] }
  0xca   : > { %v3273_v62 = vsel %vm8877_vm6, %v3268_v35, %v3272_v13  ;;  %v3291_v63 = vor.u32 %v3290_v15, %v3286_v24  ;;  %v3312_v46 = vshrl.u32 %v3146_v27, 16  ;;  %v3301_v26 = vrot.slane %v3299_v40, 4  ;;  %v458_v15 = vld [vmem:[%s8719_s16 + $0xd0] sm:$0x3] }
  0xcb   : > { %v7048_v58 = vcombine.low %v3263_v31, %v3273_v62  ;;  %v3287_v59 = vsel %vm8877_vm6, %v3282_v39, %v3286_v24  ;;  %v3304_v60 = vrot.slane %v3302_v41, 5  ;;  %v7328_v49 = vpack.c.bf16 %v569_v44, %v569_v44  ;;  %v340_v31 = vld [vmem:[%s8710_s12 + $0xd0] sm:$0x3] }
  0xcc   : > { %v3292_v48 = vrot.slane %v3291_v63, 4  ;;  %v8921_v0 = vrot.slane %v3308_v42, 5  ;;  %v3314_v45 = vrot.slane %v3312_v46, 4  ;;  %v400_v1 = vmul.f32 %v8739_v23, %v337_v43 }
  0xcd   : > { %7785 = vmatmul.mubr.msk.bf16.gmra.mrb[4].mxu0 %vm1070_vm3, %v7048_v58  ;;  %v3305_v50 = vor.u32 %v3304_v60, %v3301_v26  ;;  %v518_v51 = vmul.f32 %v8779_v52, %v455_v47  ;;  %v3323_v2 = vshrl.u32 %v3148_v57, 16  ;;  %859 = vst.msk [vmem:[#allocation2 + $0x50] sm:$0x1] %vm840_vm2, %v7328_v49  ;;  %v3326_v55 = vshll.u32 %v3148_v57, 16 }
  0xce   : > { %v3297_v16 = vsel %vm8877_vm6, %v3292_v48, %v3296_v36  ;;  %v3315_v54 = vor.u32 %v3314_v45, %v8921_v0  ;;  %v3332_v5 = vshll.u32 %v3149_v61, 16  ;;  %v404_v20 = vmul.f32 %v8739_v23, %v341_v3  ;;  %v3919_v48 = vld [vmem:[#allocation2 + $0xc] sm:$0xe] }
  0xcf   : > { %v7049_v9 = vcombine.low %v3287_v59, %v3297_v16  ;;  %v8935_v11 = vrot.slane %v3305_v50, 4  ;;  %v572_v12 = vadd.f32 %v518_v51, %v400_v1  ;;  %v3325_v13 = vrot.slane %v3323_v2, 4  ;;  %v3151_v40 = vld [vmem:[#allocation2 + $0x60] sm:$0xf]  ;;  %v3920_v1 = vld [vmem:[#allocation2 + $0x10] sm:$0xf] }
  0xd0   : > { %v8300_v19 = vld [vmem:[#allocation2 + $0x60] sm:$0xff]   ;;  %v8940_v56 = vrot.slane %v3315_v54, 4  ;;  %v405_v21 = vmul.f32 %v8739_v23, %v342_v4  ;;  %v522_v22 = vmul.f32 %v8779_v52, %v459_v53  ;;  %v3328_v28 = vrot.slane %v3326_v55, 5  ;;  %v3921_v51 = vld [vmem:[#allocation2 + $0x14] sm:$0x1] }
  0xd1   : > { %7788 = vmatprep.mubr.msk.bf16.mxu0 %vm1070_vm3, %v7049_v9  ;;  %v3311_v24 = vsel %vm8877_vm6, %v8935_v11, %v8921_v0  ;;  %v7331_v25 = vpack.c.bf16 %v572_v12, %v572_v12  ;;  %v8950_v27 = vrot.slane %v3332_v5, 5  ;;  %7660 = vmatprep.mubr.msk.bf16.mxu1 %vm1070_vm3, %v8300_v19  ;;  %v3336_v32 = vshrl.u32 %v3149_v61, 16  ;;  %v3152_v60 = vld [vmem:[#allocation2 + $0x64] sm:$0xf] }
  0xd2   : > { %v523_v33 = vmul.f32 %v8779_v52, %v460_v14  ;;  %v576_v34 = vadd.f32 %v522_v22, %v404_v20  ;;  %v407_v35 = vmul.f32 %v8739_v23, %v344_v7  ;;  %v3329_v36 = vor.u32 %v3328_v28, %v3325_v13  ;;  %v348_v9 = vld [vmem:[%s8710_s12 + $0x110] sm:$0xff]  ;;  %v350_v28 = vld [vmem:[%s8710_s12 + $0x120] sm:$0xff] }
  0xd3   : > { %862 = vst.msk [vmem:[#allocation2 + $0x5c] sm:$0x1] %vm840_vm2, %v7331_v25  ;;  %v408_v37 = vmul.f32 %v8739_v23, %v345_v8  ;;  %v525_v38 = vmul.f32 %v8779_v52, %v462_v17  ;;  %v526_v39 = vmul.f32 %v8779_v52, %v463_v18  ;;  %v3338_v41 = vrot.slane %v3336_v32, 4  ;;  %v347_v8 = vld [vmem:[%s8710_s12 + $0x108] sm:$0xff]  ;;  %v466_v25 = vld [vmem:[%s8719_s16 + $0x110] sm:$0xff] }
  0xd4   : > { %v577_v42 = vadd.f32 %v523_v33, %v405_v21  ;;  %v7335_v43 = vpack.c.bf16 %v576_v34, %v576_v34  ;;  %v403_v62 = vmul.f32 %v8739_v23, %v340_v31  ;;  %v3147_v63 = vld [vmem:[#allocation2 + $0x50] sm:$0x1]  ;;  %v8962_v44 = vrot.slane %v3329_v36, 4  ;;  %v465_v18 = vld [vmem:[%s8719_s16 + $0x108] sm:$0xff] }
  0xd5   : > { %v579_v46 = vadd.f32 %v525_v38, %v407_v35  ;;  %v580_v47 = vadd.f32 %v526_v39, %v408_v37  ;;  %v521_v57 = vmul.f32 %v8779_v52, %v458_v15  ;;  %v3318_v58 = vshll.u32 %v3147_v63, 16  ;;  %v351_v33 = vld [vmem:[%s8710_s12 + $0x128] sm:$0xff]  ;;  %v468_v37 = vld [vmem:[%s8719_s16 + $0x120] sm:$0xff]  ;;  %v3925_v63 = vld [vmem:[#allocation2 + $0x24] sm:$0xe] }
  0xd6   : > { %v3339_v59 = vor.u32 %v3338_v41, %v8950_v27  ;;  %v7336_v26 = vpack.c.bf16 %v577_v42, %v577_v42  ;;  %866 = vst.msk [vmem:[#allocation2 + $0x6c] sm:$0xf] %vm837_vm1, %v7335_v43  ;;  %v3347_v61 = vshrl.u32 %v3151_v40, 16  ;;  %v3335_v49 = vsel %vm8877_vm6, %v8962_v44, %v8950_v27  ;;  %v3923_v38 = vld [vmem:[#allocation2 + $0x1c] sm:$0xf] }
  0xd7   : > { %v7338_v0 = vpack.c.bf16 %v579_v46, %v579_v46  ;;  %v7339_v45 = vpack.c.bf16 %v580_v47, %v580_v47  ;;  %v575_v50 = vadd.f32 %v521_v57, %v403_v62  ;;  %v3320_v2 = vrot.slane %v3318_v58, 5  ;;  %v469_v43 = vld [vmem:[%s8719_s16 + $0x128] sm:$0xff]  ;;  %v3924_v62 = vld [vmem:[#allocation2 + $0x20] sm:$0x1] }
  0xd8   : > { %v3340_v3 = vrot.slane %v3339_v59, 4  ;;  %867 = vst.msk [vmem:[#allocation2 + $0x70] sm:$0xf] %vm837_vm1, %v7336_v26  ;;  %v3349_v4 = vrot.slane %v3347_v61, 4  ;;  %v3350_v53 = vshll.u32 %v3151_v40, 16  ;;  %v3356_v54 = vshll.u32 %v3152_v60, 16 }
  0xd9   : > { %869 = vst.msk [vmem:[#allocation2 + $0x78] sm:$0xf] %vm837_vm1, %v7338_v0  ;;  %870 = vst.msk [vmem:[#allocation2 + $0x7c] sm:$0xf] %vm837_vm1, %v7339_v45  ;;  %v7334_v16 = vpack.c.bf16 %v575_v50, %v575_v50  ;;  %v3360_v55 = vshrl.u32 %v3152_v60, 16  ;;  %v7077_v7 = vrot.slane %v3919_v48, 9  ;;  %v3321_v11 = vsel %vm8877_vm6, %v8940_v56, %v3320_v2 }
  0xda   : > { %v3150_v12 = vld [vmem:[#allocation2 + $0x5c] sm:$0x1]  ;;  %v3352_v13 = vrot.slane %v3350_v53, 5  ;;  %v4017_v14 = vrot.slane %v3920_v1, 5  ;;  %v4020_v17 = vrot.slane %v3921_v51, 5  ;;  %v7050_v19 = vcombine.low %v3311_v24, %v3321_v11  ;;  %v353_v2 = vld [vmem:[%s8710_s12 + $0x138] sm:$0xff] }
  0xdb   : > { %v3342_v20 = vshll.u32 %v3150_v12, 16  ;;  %865 = vst.msk [vmem:[#allocation2 + $0x68] sm:$0x1] %vm840_vm2, %v7334_v16  ;;  %v8987_v21 = vrot.slane %v3356_v54, 5  ;;  %v3362_v22 = vrot.slane %v3360_v55, 4  ;;  %v410_v32 = vmul.f32 %v8739_v23, %v347_v8  ;;  %v354_v11 = vld [vmem:[%s8710_s12 + $0x140] sm:$0xff] }
  0xdc   : > { %v3353_v27 = vor.u32 %v3352_v13, %v3349_v4  ;;  %v8993_v56 = vsel %vm8976_vm9, %v7077_v7, %v4017_v14  ;;  %v4019_v31 = vrot.slane %v4017_v14, 4  ;;  %v3922_v24 = vld [vmem:[#allocation2 + $0x18] sm:$0xe]  ;;  %7789 = vmatmul.mubr.msk.bf16.gmra.mrb[8].mxu0 %vm1070_vm3, %v7050_v19  ;;  %v411_v15 = vmul.f32 %v8739_v23, %v348_v9  ;;  %v3926_v59 = vld [vmem:[#allocation2 + $0x28] sm:$0xf]  ;;  %v472_v19 = vld [vmem:[%s8719_s16 + $0x140] sm:$0xff] }
  0xdd   : > { %v3344_v34 = vrot.slane %v3342_v20, 5  ;;  %v3363_v35 = vor.u32 %v3362_v22, %v8987_v21  ;;  %v528_v36 = vmul.f32 %v8779_v52, %v465_v18  ;;  %v529_v41 = vmul.f32 %v8779_v52, %v466_v25  ;;  %v471_v12 = vld [vmem:[%s8719_s16 + $0x138] sm:$0xff]  ;;  %v356_v20 = vld [vmem:[%s8710_s12 + $0x150] sm:$0xff] }
  0xde   : > { %v9002_v39 = vrot.slane %v3353_v27, 4  ;;  %v9006_v40 = vsel %vm8976_vm9, %v4019_v31, %v4020_v17  ;;  %v413_v42 = vmul.f32 %v8739_v23, %v350_v28  ;;  %v414_v0 = vmul.f32 %v8739_v23, %v351_v33  ;;  %v357_v27 = vld [vmem:[%s8710_s12 + $0x158] sm:$0xff] }
  0xdf   : > { %v3345_v44 = vsel %vm8877_vm6, %v3340_v3, %v3344_v34  ;;  %v8301_v46 = vld [vmem:[#allocation2 + $0x6c] sm:$0xff]   ;;  %v3364_v47 = vrot.slane %v3363_v35, 4  ;;  %v7093_v57 = vcombine.low %v8993_v56, %v9006_v40  ;;  %v582_v58 = vadd.f32 %v528_v36, %v410_v32  ;;  %v474_v34 = vld [vmem:[%s8719_s16 + $0x150] sm:$0xff] }
  0xe0   : > { %v7051_v26 = vcombine.low %v3335_v49, %v3345_v44  ;;  %v8302_v60 = vld [vmem:[#allocation2 + $0x78] sm:$0xff]   ;;  %v3359_v61 = vsel %vm8877_vm6, %v9002_v39, %v8987_v21  ;;  %v583_v48 = vadd.f32 %v529_v41, %v411_v15  ;;  %7661 = vmatmul.mubr.msk.bf16.gmra.mrb[16].mxu1 %vm1070_vm3, %v8301_v46  ;;  %v531_v50 = vmul.f32 %v8779_v52, %v468_v37  ;;  %v3927_v49 = vld [vmem:[#allocation2 + $0x2c] sm:$0x1]  ;;  %v3928_v39 = vld [vmem:[#allocation2 + $0x30] sm:$0xe] }
  0xe1   : > { %v7341_v45 = vpack.c.bf16 %v582_v58, %v582_v58  ;;  %v532_v1 = vmul.f32 %v8779_v52, %v469_v43  ;;  %v7078_v51 = vrot.slane %v3922_v24, 9  ;;  %7664 = vmatprep.mubr.msk.bf16.mxu1 %vm1070_vm3, %v8302_v60  ;;  %v4024_v53 = vrot.slane %v3923_v38, 5  ;;  %v475_v35 = vld [vmem:[%s8719_s16 + $0x158] sm:$0xff]  ;;  %v3929_v41 = vld [vmem:[#allocation2 + $0x34] sm:$0xf] }
  0xe2   : > { %7792 = vmatprep.mubr.msk.bf16.mxu0 %vm1070_vm3, %v7051_v26  ;;  %v3153_v3 = vld [vmem:[#allocation2 + $0x68] sm:$0x1]  ;;  %v7342_v4 = vpack.c.bf16 %v583_v48, %v583_v48  ;;  %v4027_v16 = vrot.slane %v3924_v62, 5  ;;  %v7079_v54 = vrot.slane %v3925_v63, 9  ;;  %v585_v7 = vadd.f32 %v531_v50, %v413_v42  ;;  %v3930_v42 = vld [vmem:[#allocation2 + $0x38] sm:$0x1] }
  0xe3   : > { %v3366_v55 = vshll.u32 %v3153_v3, 16  ;;  %872 = vst.msk [vmem:[#allocation2 + $0x84] sm:$0xf] %vm837_vm1, %v7341_v45  ;;  %v586_v8 = vadd.f32 %v532_v1, %v414_v0  ;;  %v4031_v9 = vrot.slane %v3926_v59, 5  ;;  %v9032_v13 = vsel %vm8976_vm9, %v7078_v51, %v4024_v53  ;;  %v3931_v46 = vld [vmem:[#allocation2 + $0x3c] sm:$0xe] }
  0xe4   : > { %873 = vst.msk [vmem:[#allocation2 + $0x88] sm:$0xf] %vm837_vm1, %v7342_v4  ;;  %v4026_v14 = vrot.slane %v4024_v53, 4  ;;  %v4034_v17 = vrot.slane %v3927_v49, 5  ;;  %v416_v18 = vmul.f32 %v8739_v23, %v353_v2  ;;  %v7344_v22 = vpack.c.bf16 %v585_v7, %v585_v7  ;;  %v3933_v48 = vld [vmem:[#allocation2 + $0x44] sm:$0x1] }
  0xe5   : > { %v3368_v21 = vrot.slane %v3366_v55, 5  ;;  %v7345_v25 = vpack.c.bf16 %v586_v8, %v586_v8  ;;  %v9039_v28 = vsel %vm8976_vm9, %v7079_v54, %v4031_v9  ;;  %v4033_v32 = vrot.slane %v4031_v9, 4  ;;  %v360_v0 = vld [vmem:[%s8710_s12 + $0x170] sm:$0xff]  ;;  %v477_v49 = vld [vmem:[%s8719_s16 + $0x168] sm:$0xff] }
  0xe6   : > { %v9044_v31 = vsel %vm8976_vm9, %v4026_v14, %v4027_v16  ;;  %v417_v33 = vmul.f32 %v8739_v23, %v354_v11  ;;  %v534_v24 = vmul.f32 %v8779_v52, %v471_v12  ;;  %875 = vst.msk [vmem:[#allocation2 + $0x90] sm:$0xf] %vm837_vm1, %v7344_v22  ;;  %v535_v37 = vmul.f32 %v8779_v52, %v472_v19  ;;  %v316_v2 = vld [vmem:[%s8710_s12 + $0x10] sm:$0x3] }
  0xe7   : > { %v3369_v15 = vsel %vm8877_vm6, %v3364_v47, %v3368_v21  ;;  %876 = vst.msk [vmem:[#allocation2 + $0x94] sm:$0xf] %vm837_vm1, %v7345_v25  ;;  %v7094_v36 = vcombine.low %v9032_v13, %v9044_v31  ;;  %v419_v38 = vmul.f32 %v8739_v23, %v356_v20  ;;  %v9060_v62 = vsel %vm8976_vm9, %v4033_v32, %v4034_v17  ;;  %v359_v47 = vld [vmem:[%s8710_s12 + $0x168] sm:$0xff]  ;;  %v434_v55 = vld [vmem:[%s8719_s16 + $0x10] sm:$0x3] }
  0xe8   : > { %v7052_v43 = vcombine.low %v3359_v61, %v3369_v15  ;;  %v588_v63 = vadd.f32 %v534_v24, %v416_v18  ;;  %v420_v44 = vmul.f32 %v8739_v23, %v357_v27  ;;  %v7095_v58 = vcombine.low %v9039_v28, %v9060_v62  ;;  %v3932_v61 = vld [vmem:[#allocation2 + $0x40] sm:$0xf]  ;;  %v1349_v18 = vld [vmem:[#allocation2 + $0x4] sm:$0xf] }
  0xe9   : > { %v589_v59 = vadd.f32 %v535_v37, %v417_v33  ;;  %v537_v26 = vmul.f32 %v8779_v52, %v474_v34  ;;  %v538_v60 = vmul.f32 %v8779_v52, %v475_v35  ;;  %v7080_v50 = vrot.slane %v3928_v39, 9  ;;  %v478_v12 = vld [vmem:[%s8719_s16 + $0x170] sm:$0xff]  ;;  %v3934_v34 = vld [vmem:[#allocation2 + $0x48] sm:$0xe]  ;;  %v3935_v35 = vld [vmem:[#allocation2 + $0x4c] sm:$0xf] }
  0xea   : > { %7793 = vmatmul.mubr.msk.bf16.gmra.mrb[12].mxu0 %vm1070_vm3, %v7052_v43  ;;  %v7347_v45 = vpack.c.bf16 %v588_v63, %v588_v63  ;;  %v4038_v1 = vrot.slane %v3929_v41, 5  ;;  %v4041_v51 = vrot.slane %v3930_v42, 5  ;;  %v7081_v54 = vrot.slane %v3931_v46, 9  ;;  %v1348_v14 = vld [vmem:[#allocation2] sm:$0xf] }
  0xeb   : > { %7814 = vmatprep.mubr.msk.bf16.mxu0 %vm1070_vm3, %v7093_v57  ;;  %v8303_v3 = vld [vmem:[#allocation2 + $0x84] sm:$0xff]   ;;  %v7348_v4 = vpack.c.bf16 %v589_v59, %v589_v59  ;;  %v591_v53 = vadd.f32 %v537_v26, %v419_v38  ;;  %v592_v16 = vadd.f32 %v538_v60, %v420_v44  ;;  %v4045_v9 = vrot.slane %v3932_v61, 5  ;;  %v3936_v41 = vld [vmem:[#allocation2 + $0x50] sm:$0x1]  ;;  %v3937_v42 = vld [vmem:[#allocation2 + $0x54] sm:$0xe] }
  0xec   : > { %878 = vst.msk [vmem:[#allocation2 + $0x9c] sm:$0xf] %vm837_vm1, %v7347_v45  ;;  %v9080_v7 = vsel %vm8976_vm9, %v7080_v50, %v4038_v1  ;;  %v4040_v8 = vrot.slane %v4038_v1, 4  ;;  %v4048_v11 = vrot.slane %v3933_v48, 5  ;;  %7665 = vmatmul.mubr.msk.bf16.gmra.mrb[20].mxu1 %vm1070_vm3, %v8303_v3  ;;  %v422_v57 = vmul.f32 %v8739_v23, %v359_v47  ;;  %v3938_v43 = vld [vmem:[#allocation2 + $0x58] sm:$0xf] }
  0xed   : > { %879 = vst.msk [vmem:[#allocation2 + $0xa0] sm:$0xf] %vm837_vm1, %v7348_v4  ;;  %v7350_v56 = vpack.c.bf16 %v591_v53, %v591_v53  ;;  %v7351_v40 = vpack.c.bf16 %v592_v16, %v592_v16  ;;  %v423_v17 = vmul.f32 %v8739_v23, %v360_v0  ;;  %v9093_v21 = vsel %vm8976_vm9, %v7081_v54, %v4045_v9  ;;  %v1351_v63 = vld [vmem:[#allocation2 + $0xc] sm:$0xf]  ;;  %v3939_v26 = vld [vmem:[#allocation2 + $0x5c] sm:$0x1] }
  0xee   : > { %v8304_v19 = vld [vmem:[#allocation2 + $0x90] sm:$0xff]   ;;  %v9089_v20 = vsel %vm8976_vm9, %v4040_v8, %v4041_v51  ;;  %v4047_v22 = vrot.slane %v4045_v9, 4  ;;  %v540_v25 = vmul.f32 %v8779_v52, %v477_v49  ;;  %v541_v32 = vmul.f32 %v8779_v52, %v478_v12  ;;  %v343_v60 = vld [vmem:[%s8710_s12 + $0xe8] sm:$0x3]  ;;  %v5370_v61 = vld [vmem:[%s10386_s4 + $0x1c] sm:$0xf] }
  0xef   : > { %881 = vst.msk [vmem:[#allocation2 + $0xa8] sm:$0xf] %vm837_vm1, %v7350_v56  ;;  %882 = vst.msk [vmem:[#allocation2 + $0xac] sm:$0xf] %vm837_vm1, %v7351_v40  ;;  %v7096_v27 = vcombine.low %v9080_v7, %v9089_v20  ;;  %v379_v33 = vmul.f32 %v8739_v23, %v316_v2  ;;  %v497_v24 = vmul.f32 %v8779_v52, %v434_v55  ;;  %7668 = vmatprep.mubr.msk.bf16.mxu1 %vm1070_vm3, %v8304_v19  ;;  %v1352_v3 = vld [vmem:[#allocation2 + $0x10] sm:$0xf] }
  0xf0   : > { %v9106_v15 = vsel %vm8976_vm9, %v4047_v22, %v4048_v11  ;;  %v594_v37 = vadd.f32 %v540_v25, %v422_v57  ;;  %v1400_v38 = vshrl.u32 %v1348_v14, 16  ;;  %v1403_v39 = vshll.u32 %v1348_v14, 16  ;;  %v1354_v57 = vld [vmem:[#allocation2 + $0x18] sm:$0xf] }
  0xf1   : > { %v7097_v44 = vcombine.low %v9093_v21, %v9106_v15  ;;  %v595_v46 = vadd.f32 %v541_v32, %v423_v17  ;;  %v551_v47 = vadd.f32 %v497_v24, %v379_v33  ;;  %v1409_v59 = vshll.u32 %v1349_v18, 16  ;;  %v461_v17 = vld [vmem:[%s8719_s16 + $0xe8] sm:$0x3]  ;;  %v1355_v33 = vld [vmem:[#allocation2 + $0x1c] sm:$0xf] }
  0xf2   : > { %7815 = vmatmul.mubr.msk.bf16.vlgmr.msra.gmra.mrb[0].mxu0 %vm1070_vm3, %v7094_v36  ;;  %v7353_v48 = vpack.c.bf16 %v594_v37, %v594_v37  ;;  %v1402_v0 = vrot.slane %v1400_v38, 4  ;;  %v1405_v45 = vrot.slane %v1403_v39, 5  ;;  %v1413_v50 = vshrl.u32 %v1349_v18, 16  ;;  %v346_v18 = vld [vmem:[%s8710_s12 + $0x100] sm:$0x3] }
  0xf3   : > { %7847 = vmatpush3.bf16.msra.mxu0 %v8752_v29  ;;  %7818 = vmatprep.mubr.msk.bf16.mxu0 %vm1070_vm3, %v7095_v58  ;;  %v7354_v1 = vpack.c.bf16 %v595_v46, %v595_v46  ;;  %v7310_v51 = vpack.c.bf16 %v551_v47, %v551_v47  ;;  %v9123_v49 = vrot.slane %v1409_v59, 5  ;;  %v7082_v2 = vrot.slane %v3934_v34, 9  ;;  %v1353_v58 = vld [vmem:[#allocation2 + $0x14] sm:$0x1]  ;;  %v1356_v38 = vld [vmem:[#allocation2 + $0x20] sm:$0x1] }
  0xf4   : > { %v8305_v13 = vld [vmem:[#allocation2 + $0x9c] sm:$0xff]   ;;  %884 = vst.msk [vmem:[#allocation2 + $0xb4] sm:$0xf] %vm837_vm1, %v7353_v48  ;;  %v1406_v31 = vor.u32 %v1405_v45, %v1402_v0  ;;  %v1415_v36 = vrot.slane %v1413_v50, 4  ;;  %v4052_v4 = vrot.slane %v3935_v35, 5  ;;  %v4055_v53 = vrot.slane %v3936_v41, 5  ;;  %8214 = vmatprep.subr.msk.bf16.mxu0 %vm1119_vm0, %v5370_v61 }
  0xf5   : > { %885 = vst.msk [vmem:[#allocation2 + $0xb8] sm:$0xf] %vm837_vm1, %v7354_v1  ;;  %v7083_v29 = vrot.slane %v3937_v42, 9  ;;  %v4059_v28 = vrot.slane %v3938_v43, 5  ;;  %v4062_v62 = vrot.slane %v3939_v26, 5  ;;  %v1424_v16 = vshrl.u32 %v1351_v63, 16  ;;  %7669 = vmatmul.mubr.msk.bf16.gmra.mrb[24].mxu1 %vm1070_vm3, %v8305_v13 }
  0xf6   : > { %841 = vst.msk [vmem:[#allocation2 + $0x8] sm:$0x1] %vm840_vm2, %v7310_v51  ;;  %v8306_v54 = vld [vmem:[#allocation2 + $0xa8] sm:$0xff]   ;;  %v9130_v55 = vrot.slane %v1406_v31, 4  ;;  %v1416_v8 = vor.u32 %v1415_v36, %v9123_v49  ;;  %v9135_v9 = vsel %vm8976_vm9, %v7082_v2, %v4052_v4  ;;  %v9138_v11 = vmul.f32 %v8739_v23, %v343_v60  ;;  %v3941_v21 = vld [vmem:[#allocation2 + $0x64] sm:$0xf] }
  0xf7   : > { %v4054_v12 = vrot.slane %v4052_v4, 4  ;;  %v9142_v14 = vsel %vm8976_vm9, %v7083_v29, %v4059_v28  ;;  %v4061_v56 = vrot.slane %v4059_v28, 4  ;;  %v1426_v40 = vrot.slane %v1424_v16, 4  ;;  %7672 = vmatprep.mubr.msk.bf16.mxu1 %vm1070_vm3, %v8306_v54  ;;  %v3942_v2 = vld [vmem:[#allocation2 + $0x68] sm:$0x1] }
  0xf8   : > { %v1412_v19 = vsel %vm8877_vm6, %v9130_v55, %v9123_v49  ;;  %v1417_v22 = vrot.slane %v1416_v8, 4  ;;  %v1427_v25 = vshll.u32 %v1351_v63, 16  ;;  %v1433_v32 = vshll.u32 %v1352_v3, 16  ;;  %v3940_v63 = vld [vmem:[#allocation2 + $0x60] sm:$0xe] }
  0xf9   : > { %v4056_v24 = vsel %vm8976_vm9, %v4054_v12, %v4055_v53  ;;  %v4063_v34 = vsel %vm8976_vm9, %v4061_v56, %v4062_v62  ;;  %v1437_v35 = vshrl.u32 %v1352_v3, 16  ;;  %v1443_v37 = vshll.u32 %v1353_v58, 16  ;;  %v1357_v4 = vld [vmem:[#allocation2 + $0x24] sm:$0xf]  ;;  %v3943_v58 = vld [vmem:[#allocation2 + $0x6c] sm:$0xe] }
  0xfa   : > { %7819 = vmatmul.mubr.msk.bf16.gmra.mrb[4].mxu0 %vm1070_vm3, %v7096_v27  ;;  %v7098_v39 = vcombine.low %v9135_v9, %v4056_v24  ;;  %v7099_v41 = vcombine.low %v9142_v14, %v4063_v34  ;;  %v1429_v42 = vrot.slane %v1427_v25, 5  ;;  %v1435_v43 = vrot.slane %v1433_v32, 5  ;;  %v1358_v16 = vld [vmem:[#allocation2 + $0x28] sm:$0xf]  ;;  %v3944_v12 = vld [vmem:[#allocation2 + $0x70] sm:$0xf] }
  0xfb   : > { %7822 = vmatprep.mubr.msk.bf16.mxu0 %vm1070_vm3, %v7097_v44  ;;  %v1439_v46 = vrot.slane %v1437_v35, 4  ;;  %v1445_v47 = vrot.slane %v1443_v37, 5  ;;  %v1448_v59 = vshrl.u32 %v1354_v57, 16  ;;  %v1451_v26 = vshll.u32 %v1354_v57, 16  ;;  %v1359_v32 = vld [vmem:[#allocation2 + $0x2c] sm:$0x1] }
  0xfc   : > { %v8307_v60 = vld [vmem:[#allocation2 + $0xb4] sm:$0xff]   ;;  %v1430_v20 = vor.u32 %v1429_v42, %v1426_v40  ;;  %v1457_v27 = vshll.u32 %v1355_v33, 16  ;;  %v524_v61 = vmul.f32 %v8779_v52, %v461_v17  ;;  %v9167_v48 = vmul.f32 %v8739_v23, %v346_v18  ;;  %v1360_v35 = vld [vmem:[#allocation2 + $0x30] sm:$0xf] }
  0xfd   : > { %v1350_v7 = vld [vmem:[#allocation2 + $0x8] sm:$0x1]  ;;  %v1440_v45 = vor.u32 %v1439_v46, %v1435_v43  ;;  %v1450_v50 = vrot.slane %v1448_v59, 4  ;;  %v1453_v1 = vrot.slane %v1451_v26, 5  ;;  %7673 = vmatmul.mubr.msk.bf16.gmra.mrb[28].mxu1 %vm1070_vm3, %v8307_v60  ;;  %v1461_v51 = vshrl.u32 %v1355_v33, 16 }
  0xfe   : > { %v1419_v0 = vshll.u32 %v1350_v7, 16  ;;  %v1431_v15 = vrot.slane %v1430_v20, 4  ;;  %v1459_v44 = vrot.slane %v1457_v27, 5  ;;  %v1467_v49 = vshll.u32 %v1356_v38, 16  ;;  %v1361_v42 = vld [vmem:[#allocation2 + $0x34] sm:$0xf] }
  0xff   : > { %v1441_v13 = vrot.slane %v1440_v45, 4  ;;  %v1454_v31 = vor.u32 %v1453_v1, %v1450_v50  ;;  %v7084_v36 = vrot.slane %v3940_v63, 9  ;;  %v1463_v29 = vrot.slane %v1461_v51, 4  ;;  %v464_v20 = vld [vmem:[%s8719_s16 + $0x100] sm:$0x3] }
 0x100   : > { %v1421_v3 = vrot.slane %v1419_v0, 5  ;;  %v1436_v53 = vsel %vm8877_vm6, %v1431_v15, %v1435_v43  ;;  %v1469_v28 = vrot.slane %v1467_v49, 5  ;;  %v4066_v62 = vrot.slane %v3941_v21, 5  ;;  %v1362_v43 = vld [vmem:[#allocation2 + $0x38] sm:$0x1] }
 0x101   : > { %v1446_v55 = vsel %vm8877_vm6, %v1441_v13, %v1445_v47  ;;  %v1455_v8 = vrot.slane %v1454_v31, 4  ;;  %v4069_v9 = vrot.slane %v3942_v2, 5  ;;  %v1464_v40 = vor.u32 %v1463_v29, %v1459_v44  ;;  %v349_v50 = vld [vmem:[%s8710_s12 + $0x118] sm:$0x3]  ;;  %v3946_v51 = vld [vmem:[#allocation2 + $0x78] sm:$0xe] }
 0x102   : > { %v1422_v54 = vsel %vm8877_vm6, %v1417_v22, %v1421_v3  ;;  %7823 = vmatmul.mubr.msk.bf16.gmra.mrb[8].mxu0 %vm1070_vm3, %v7098_v39  ;;  %v6934_v56 = vcombine.low %v1436_v53, %v1446_v55  ;;  %v4067_v57 = vsel %vm8976_vm9, %v7084_v36, %v4066_v62  ;;  %v4068_v18 = vrot.slane %v4066_v62, 4  ;;  %v3947_v13 = vld [vmem:[#allocation2 + $0x7c] sm:$0xf]  ;;  %v467_v29 = vld [vmem:[%s8719_s16 + $0x118] sm:$0x3] }
 0x103   : > { %v6933_v14 = vcombine.low %v1412_v19, %v1422_v54  ;;  %7826 = vmatprep.mubr.msk.bf16.mxu0 %vm1070_vm3, %v7099_v41  ;;  %v1460_v17 = vsel %vm8877_vm6, %v1455_v8, %v1459_v44  ;;  %v578_v22 = vadd.f32 %v524_v61, %v9138_v11  ;;  %v7085_v25 = vrot.slane %v3943_v58, 9 }
 0x104   : > { %v1465_v19 = vrot.slane %v1464_v40, 4  ;;  %v4073_v33 = vrot.slane %v3944_v12, 5  ;;  %v1472_v24 = vshrl.u32 %v1357_v4, 16  ;;  %v1475_v34 = vshll.u32 %v1357_v4, 16  ;;  %v3949_v12 = vld [vmem:[#allocation2 + $0x84] sm:$0xe] }
 0x105   : > { %7678 = vmatprep.mubr.msk.bf16.mxu1 %vm1070_vm3, %v6933_v14  ;;  %v4070_v37 = vsel %vm8976_vm9, %v4068_v18, %v4069_v9  ;;  %v7337_v38 = vpack.c.bf16 %v578_v22, %v578_v22  ;;  %v1481_v39 = vshll.u32 %v1358_v16, 16  ;;  %v1485_v41 = vshrl.u32 %v1358_v16, 16  ;;  %v1363_v14 = vld [vmem:[#allocation2 + $0x3c] sm:$0xf]  ;;  %v3950_v22 = vld [vmem:[#allocation2 + $0x88] sm:$0xf] }
 0x106   : > { %7679 = vmatmul.mubr.msk.bf16.vlgmr.msra.gmra.mrb[0].mxu1 %vm1070_vm3, %v6934_v56  ;;  %v1470_v11 = vsel %vm8877_vm6, %v1465_v19, %v1469_v28  ;;  %v7100_v63 = vcombine.low %v4067_v57, %v4070_v37  ;;  %v9191_v46 = vsel %vm8976_vm9, %v7085_v25, %v4073_v33  ;;  %v4075_v47 = vrot.slane %v4073_v33, 4 }
 0x107   : > { %v6935_v59 = vcombine.low %v1460_v17, %v1470_v11  ;;  %868 = vst.msk [vmem:[#allocation2 + $0x74] sm:$0x1] %vm840_vm2, %v7337_v38  ;;  %v1474_v26 = vrot.slane %v1472_v24, 4  ;;  %v1477_v60 = vrot.slane %v1475_v34, 5  ;;  %v1483_v7 = vrot.slane %v1481_v39, 5  ;;  %7711 = vmatpush3.bf16.msra.mxu1 %v8756_v30 }
 0x108   : > { %v1487_v27 = vrot.slane %v1485_v41, 4  ;;  %v1491_v61 = vshll.u32 %v1359_v32, 16  ;;  %v1496_v0 = vshrl.u32 %v1360_v35, 16  ;;  %v1499_v45 = vshll.u32 %v1360_v35, 16  ;;  %v1364_v38 = vld [vmem:[#allocation2 + $0x40] sm:$0xf] }
 0x109   : > { %7682 = vmatprep.mubr.msk.bf16.mxu1 %vm1070_vm3, %v6935_v59  ;;  %v1478_v1 = vor.u32 %v1477_v60, %v1474_v26  ;;  %v1505_v21 = vshll.u32 %v1361_v42, 16  ;;  %v1509_v15 = vshrl.u32 %v1361_v42, 16  ;;  %v1515_v44 = vshll.u32 %v1362_v43, 16  ;;  %v1365_v43 = vld [vmem:[#allocation2 + $0x44] sm:$0x1] }
 0x10a   : > { %7827 = vmatmul.mubr.msk.bf16.gmra.mrb[12].mxu0 %vm1070_vm3, %v7100_v63  ;;  %v1488_v49 = vor.u32 %v1487_v27, %v1483_v7  ;;  %v1493_v2 = vrot.slane %v1491_v61, 5  ;;  %v1498_v3 = vrot.slane %v1496_v0, 4  ;;  %v1501_v30 = vrot.slane %v1499_v45, 5  ;;  %v1366_v11 = vld [vmem:[#allocation2 + $0x48] sm:$0xf] }
 0x10b   : > { %v1479_v31 = vrot.slane %v1478_v1, 4  ;;  %v1507_v36 = vrot.slane %v1505_v21, 5  ;;  %v1511_v4 = vrot.slane %v1509_v15, 4  ;;  %v1517_v53 = vrot.slane %v1515_v44, 5  ;;  %v352_v45 = vld [vmem:[%s8710_s12 + $0x130] sm:$0x3] }
 0x10c   : > { %v1489_v28 = vrot.slane %v1488_v49, 4  ;;  %v1502_v62 = vor.u32 %v1501_v30, %v1498_v3  ;;  %v527_v58 = vmul.f32 %v8779_v52, %v464_v20  ;;  %v7086_v16 = vrot.slane %v3946_v51, 9  ;;  %v3952_v51 = vld [vmem:[#allocation2 + $0x90] sm:$0xe] }
 0x10d   : > { %v1484_v54 = vsel %vm8877_vm6, %v1479_v31, %v1483_v7  ;;  %v1512_v55 = vor.u32 %v1511_v4, %v1507_v36  ;;  %v4080_v8 = vrot.slane %v3947_v13, 5  ;;  %v412_v9 = vmul.f32 %v8739_v23, %v349_v50  ;;  %v1367_v7 = vld [vmem:[#allocation2 + $0x4c] sm:$0xf]  ;;  %v470_v50 = vld [vmem:[%s8719_s16 + $0x130] sm:$0x3] }
 0x10e   : > { %v3945_v56 = vld [vmem:[#allocation2 + $0x74] sm:$0x1]  ;;  %v1494_v40 = vsel %vm8877_vm6, %v1489_v28, %v1493_v2  ;;  %v1503_v57 = vrot.slane %v1502_v62, 4  ;;  %v581_v17 = vadd.f32 %v527_v58, %v9167_v48  ;;  %v530_v18 = vmul.f32 %v8779_v52, %v467_v29 }
 0x10f   : > { %v4076_v25 = vrot.slane %v3945_v56, 5  ;;  %v6936_v32 = vcombine.low %v1484_v54, %v1494_v40  ;;  %v1513_v19 = vrot.slane %v1512_v55, 4  ;;  %v9210_v33 = vsel %vm8976_vm9, %v7086_v16, %v4080_v8 }
 0x110   : > { %v1508_v24 = vsel %vm8877_vm6, %v1503_v57, %v1507_v36  ;;  %v7340_v34 = vpack.c.bf16 %v581_v17, %v581_v17  ;;  %v9214_v35 = vrot.slane %v4080_v8, 4  ;;  %v584_v37 = vadd.f32 %v530_v18, %v412_v9  ;;  %v3953_v9 = vld [vmem:[#allocation2 + $0x94] sm:$0xf] }
 0x111   : > { %v4077_v48 = vsel %vm8976_vm9, %v4075_v47, %v4076_v25  ;;  %7683 = vmatmul.mubr.msk.bf16.gmra.mrb[4].mxu1 %vm1070_vm3, %v6936_v32  ;;  %v1518_v39 = vsel %vm8877_vm6, %v1513_v19, %v1517_v53  ;;  %v7087_v41 = vrot.slane %v3949_v12, 9  ;;  %v4087_v42 = vrot.slane %v3950_v22, 5  ;;  %v9226_v47 = vld [vmem:[%s10386_s4 + $0xc] sm:$0xf]  ;;  %v355_v53 = vld [vmem:[%s8710_s12 + $0x148] sm:$0x3] }
 0x112   : > { %v7101_v63 = vcombine.low %v9191_v46, %v4077_v48  ;;  %v6937_v59 = vcombine.low %v1508_v24, %v1518_v39  ;;  %871 = vst.msk [vmem:[#allocation2 + $0x80] sm:$0x1] %vm840_vm2, %v7340_v34  ;;  %v7343_v26 = vpack.c.bf16 %v584_v37, %v584_v37  ;;  %v1520_v60 = vshrl.u32 %v1363_v14, 16  ;;  %v1368_v46 = vld [vmem:[#allocation2 + $0x50] sm:$0x1]  ;;  %8209 = vmatprep.subr.msk.bf16.mxu1 %vm1119_vm0, %v9226_v47 }
 0x113   : > { %v9230_v20 = vsel %vm8976_vm9, %v7087_v41, %v4087_v42  ;;  %v9232_v27 = vrot.slane %v4087_v42, 4  ;;  %v1523_v61 = vshll.u32 %v1363_v14, 16  ;;  %v1529_v0 = vshll.u32 %v1364_v38, 16  ;;  %v473_v32 = vld [vmem:[%s8719_s16 + $0x148] sm:$0x3] }
 0x114   : > { %7830 = vmatprep.mubr.msk.bf16.mxu0 %vm1070_vm3, %v7101_v63  ;;  %7686 = vmatprep.mubr.msk.bf16.mxu1 %vm1070_vm3, %v6937_v59  ;;  %874 = vst.msk [vmem:[#allocation2 + $0x8c] sm:$0x1] %vm840_vm2, %v7343_v26  ;;  %v1522_v1 = vrot.slane %v1520_v60, 4  ;;  %v1533_v21 = vshrl.u32 %v1364_v38, 16  ;;  %v1539_v15 = vshll.u32 %v1365_v43, 16  ;;  %v1544_v44 = vshrl.u32 %v1366_v11, 16 }
 0x115   : > { %v1525_v49 = vrot.slane %v1523_v61, 5  ;;  %v1531_v2 = vrot.slane %v1529_v0, 5  ;;  %v1547_v3 = vshll.u32 %v1366_v11, 16  ;;  %v1553_v30 = vshll.u32 %v1367_v7, 16  ;;  %v1369_v48 = vld [vmem:[#allocation2 + $0x54] sm:$0xf] }
 0x116   : > { %v1535_v13 = vrot.slane %v1533_v21, 4  ;;  %v1541_v31 = vrot.slane %v1539_v15, 5  ;;  %v1546_v36 = vrot.slane %v1544_v44, 4  ;;  %v1557_v4 = vshrl.u32 %v1367_v7, 16  ;;  %v1370_v39 = vld [vmem:[#allocation2 + $0x58] sm:$0xf] }
 0x117   : > { %v1526_v29 = vor.u32 %v1525_v49, %v1522_v1  ;;  %v1549_v28 = vrot.slane %v1547_v3, 5  ;;  %v1555_v62 = vrot.slane %v1553_v30, 5  ;;  %v1563_v58 = vshll.u32 %v1368_v46, 16  ;;  %v3955_v63 = vld [vmem:[#allocation2 + $0x9c] sm:$0xe] }
 0x118   : > { %v1536_v16 = vor.u32 %v1535_v13, %v1531_v2  ;;  %v1559_v54 = vrot.slane %v1557_v4, 4  ;;  %v415_v55 = vmul.f32 %v8739_v23, %v352_v45  ;;  %v533_v8 = vmul.f32 %v8779_v52, %v470_v50  ;;  %v1371_v59 = vld [vmem:[#allocation2 + $0x5c] sm:$0x1]  ;;  %v3956_v0 = vld [vmem:[#allocation2 + $0xa0] sm:$0xf] }
 0x119   : > { %v3948_v12 = vld [vmem:[#allocation2 + $0x80] sm:$0x1]  ;;  %v1527_v14 = vrot.slane %v1526_v29, 4  ;;  %v1550_v56 = vor.u32 %v1549_v28, %v1546_v36  ;;  %v1565_v40 = vrot.slane %v1563_v58, 5  ;;  %v7088_v57 = vrot.slane %v3952_v51, 9 }
 0x11a   : > { %v4083_v17 = vrot.slane %v3948_v12, 5  ;;  %v1537_v18 = vrot.slane %v1536_v16, 4  ;;  %v1560_v22 = vor.u32 %v1559_v54, %v1555_v62  ;;  %v587_v25 = vadd.f32 %v533_v8, %v415_v55  ;;  %v1372_v46 = vld [vmem:[#allocation2 + $0x60] sm:$0xf]  ;;  %v358_v3 = vld [vmem:[%s8710_s12 + $0x160] sm:$0x3] }
 0x11b   : > { %v3951_v19 = vld [vmem:[#allocation2 + $0x8c] sm:$0x1]  ;;  %v1532_v24 = vsel %vm8877_vm6, %v1527_v14, %v1531_v2  ;;  %v1551_v34 = vrot.slane %v1550_v56, 4  ;;  %v4094_v37 = vrot.slane %v3953_v9, 5  ;;  %v418_v38 = vmul.f32 %v8739_v23, %v355_v53  ;;  %v476_v4 = vld [vmem:[%s8719_s16 + $0x160] sm:$0x3] }
 0x11c   : > { %v4084_v41 = vsel %vm8976_vm9, %v9214_v35, %v4083_v17  ;;  %v4090_v42 = vrot.slane %v3951_v19, 5  ;;  %v1542_v43 = vsel %vm8877_vm6, %v1537_v18, %v1541_v31  ;;  %v1561_v11 = vrot.slane %v1560_v22, 4  ;;  %v1373_v31 = vld [vmem:[#allocation2 + $0x64] sm:$0xf]  ;;  %v1374_v58 = vld [vmem:[#allocation2 + $0x68] sm:$0x1] }
 0x11d   : > { %v7102_v26 = vcombine.low %v9210_v33, %v4084_v41  ;;  %v6938_v60 = vcombine.low %v1532_v24, %v1542_v43  ;;  %v1556_v7 = vsel %vm8877_vm6, %v1551_v34, %v1555_v62  ;;  %v7346_v61 = vpack.c.bf16 %v587_v25, %v587_v25  ;;  %v3958_v9 = vld [vmem:[#allocation2 + $0xa8] sm:$0xe] }
 0x11e   : > { %v4091_v35 = vsel %vm8976_vm9, %v9232_v27, %v4090_v42  ;;  %v1566_v45 = vsel %vm8877_vm6, %v1561_v11, %v1565_v40  ;;  %v9263_v50 = vsel %vm8976_vm9, %v7088_v57, %v4094_v37  ;;  %v4096_v33 = vrot.slane %v4094_v37, 4  ;;  %v3959_v57 = vld [vmem:[#allocation2 + $0xac] sm:$0xf] }
 0x11f   : > { %7831 = vmatmul.mubr.msk.bf16.gmra.mrb[16].mxu0 %vm1070_vm3, %v7102_v26  ;;  %v7103_v1 = vcombine.low %v9230_v20, %v4091_v35  ;;  %7687 = vmatmul.mubr.msk.bf16.gmra.mrb[8].mxu1 %vm1070_vm3, %v6938_v60  ;;  %v6939_v21 = vcombine.low %v1556_v7, %v1566_v45  ;;  %877 = vst.msk [vmem:[#allocation2 + $0x98] sm:$0x1] %vm840_vm2, %v7346_v61  ;;  %v7089_v15 = vrot.slane %v3955_v63, 9  ;;  %v4101_v44 = vrot.slane %v3956_v0, 5  ;;  %v479_v26 = vld [vmem:[%s8719_s16 + $0x178] sm:$0x3] }
 0x120   : > { %v536_v27 = vmul.f32 %v8779_v52, %v473_v32  ;;  %v1568_v51 = vshrl.u32 %v1369_v48, 16  ;;  %v1571_v49 = vshll.u32 %v1369_v48, 16  ;;  %v1577_v2 = vshll.u32 %v1370_v39, 16  ;;  %v3962_v35 = vld [vmem:[#allocation2 + $0xb8] sm:$0xf] }
 0x121   : > { %7834 = vmatprep.mubr.msk.bf16.mxu0 %vm1070_vm3, %v7103_v1  ;;  %7690 = vmatprep.mubr.msk.bf16.mxu1 %vm1070_vm3, %v6939_v21  ;;  %v1581_v20 = vshrl.u32 %v1370_v39, 16  ;;  %v1587_v13 = vshll.u32 %v1371_v59, 16  ;;  %v1592_v36 = vshrl.u32 %v1372_v46, 16  ;;  %v9276_v53 = vsel %vm8976_vm9, %v7089_v15, %v4101_v44  ;;  %v361_v59 = vld [vmem:[%s8710_s12 + $0x178] sm:$0x3] }
 0x122   : > { %v590_v30 = vadd.f32 %v536_v27, %v418_v38  ;;  %v9278_v29 = vrot.slane %v4101_v44, 4  ;;  %v1570_v28 = vrot.slane %v1568_v51, 4  ;;  %v1573_v62 = vrot.slane %v1571_v49, 5  ;;  %v1375_v15 = vld [vmem:[#allocation2 + $0x6c] sm:$0xf] }
 0x123   : > { %v1579_v54 = vrot.slane %v1577_v2, 5  ;;  %v1583_v55 = vrot.slane %v1581_v20, 4  ;;  %v1589_v8 = vrot.slane %v1587_v13, 5  ;;  %v1594_v14 = vrot.slane %v1592_v36, 4  ;;  %v1376_v13 = vld [vmem:[#allocation2 + $0x70] sm:$0xf] }
 0x124   : > { %v7349_v16 = vpack.c.bf16 %v590_v30, %v590_v30  ;;  %v1574_v12 = vor.u32 %v1573_v62, %v1570_v28  ;;  %v1595_v56 = vshll.u32 %v1372_v46, 16  ;;  %v1601_v40 = vshll.u32 %v1373_v31, 16  ;;  %v3961_v46 = vld [vmem:[#allocation2 + $0xb4] sm:$0xe] }
 0x125   : > { %v1584_v17 = vor.u32 %v1583_v55, %v1579_v54  ;;  %v1605_v18 = vshrl.u32 %v1373_v31, 16  ;;  %v1611_v22 = vshll.u32 %v1374_v58, 16  ;;  %v421_v25 = vmul.f32 %v8739_v23, %v358_v3 }
 0x126   : > { %880 = vst.msk [vmem:[#allocation2 + $0xa4] sm:$0x1] %vm840_vm2, %v7349_v16  ;;  %v3954_v32 = vld [vmem:[#allocation2 + $0x98] sm:$0x1]  ;;  %v1575_v19 = vrot.slane %v1574_v12, 4  ;;  %v1597_v24 = vrot.slane %v1595_v56, 5  ;;  %v539_v37 = vmul.f32 %v8779_v52, %v476_v4  ;;  %v542_v3 = vmul.f32 %v8779_v52, %v479_v26 }
 0x127   : > { %v1603_v34 = vrot.slane %v1601_v40, 5  ;;  %v4097_v38 = vrot.slane %v3954_v32, 5  ;;  %v1585_v48 = vrot.slane %v1584_v17, 4  ;;  %v1607_v39 = vrot.slane %v1605_v18, 4  ;;  %v1377_v4 = vld [vmem:[#allocation2 + $0x74] sm:$0x1] }
 0x128   : > { %v1613_v41 = vrot.slane %v1611_v22, 5  ;;  %v1580_v42 = vsel %vm8877_vm6, %v1575_v19, %v1579_v54  ;;  %v1598_v43 = vor.u32 %v1597_v24, %v1594_v14  ;;  %v593_v11 = vadd.f32 %v539_v37, %v421_v25  ;;  %v1379_v40 = vld [vmem:[#allocation2 + $0x7c] sm:$0xf]  ;;  %v1380_v25 = vld [vmem:[#allocation2 + $0x80] sm:$0x1] }
 0x129   : > { %v7090_v63 = vrot.slane %v3958_v9, 9  ;;  %v4098_v60 = vsel %vm8976_vm9, %v4096_v33, %v4097_v38  ;;  %v1590_v7 = vsel %vm8877_vm6, %v1585_v48, %v1589_v8  ;;  %v1608_v61 = vor.u32 %v1607_v39, %v1603_v34  ;;  %v1378_v8 = vld [vmem:[#allocation2 + $0x78] sm:$0xf]  ;;  %v362_v48 = vld [vmem:[%s8710_s12 + $0x180] sm:$0xff] }
 0x12a   : > { %v4108_v0 = vrot.slane %v3959_v57, 5  ;;  %v7104_v45 = vcombine.low %v9263_v50, %v4098_v60  ;;  %v6940_v1 = vcombine.low %v1580_v42, %v1590_v7  ;;  %v1599_v21 = vrot.slane %v1598_v43, 4  ;;  %v363_v39 = vld [vmem:[%s8710_s12 + $0x188] sm:$0xff] }
 0x12b   : > { %v7352_v27 = vpack.c.bf16 %v593_v11, %v593_v11  ;;  %v1609_v44 = vrot.slane %v1608_v61, 4  ;;  %v424_v33 = vmul.f32 %v8739_v23, %v361_v59  ;;  %v7091_v30 = vrot.slane %v3961_v46, 9  ;;  %v364_v61 = vld [vmem:[%s8710_s12 + $0x190] sm:$0x3] }
 0x12c   : > { %v9294_v51 = vsel %vm8976_vm9, %v7090_v63, %v4108_v0  ;;  %v4110_v49 = vrot.slane %v4108_v0, 4  ;;  %7835 = vmatmul.mubr.msk.bf16.gmra.mrb[20].mxu0 %vm1070_vm3, %v7104_v45  ;;  %7691 = vmatmul.mubr.msk.bf16.gmra.mrb[12].mxu1 %vm1070_vm3, %v6940_v1  ;;  %v1604_v50 = vsel %vm8877_vm6, %v1599_v21, %v1603_v34  ;;  %v4115_v20 = vrot.slane %v3962_v35, 5  ;;  %v480_v0 = vld [vmem:[%s8719_s16 + $0x180] sm:$0xff]  ;;  %v481_v21 = vld [vmem:[%s8719_s16 + $0x188] sm:$0xff] }
 0x12d   : > { %v3957_v2 = vld [vmem:[#allocation2 + $0xa4] sm:$0x1]  ;;  %883 = vst.msk [vmem:[#allocation2 + $0xb0] sm:$0x1] %vm840_vm2, %v7352_v27  ;;  %v1614_v36 = vsel %vm8877_vm6, %v1609_v44, %v1613_v41  ;;  %v1616_v28 = vshrl.u32 %v1375_v15, 16  ;;  %v1619_v62 = vshll.u32 %v1375_v15, 16  ;;  %v596_v16 = vadd.f32 %v542_v3, %v424_v33 }
 0x12e   : > { %v4104_v31 = vrot.slane %v3957_v2, 5  ;;  %v6941_v58 = vcombine.low %v1604_v50, %v1614_v36  ;;  %v9307_v54 = vsel %vm8976_vm9, %v7091_v30, %v4115_v20  ;;  %v9309_v55 = vrot.slane %v4115_v20, 4  ;;  %v482_v27 = vld [vmem:[%s8719_s16 + $0x190] sm:$0x3]  ;;  %v1381_v50 = vld [vmem:[#allocation2 + $0x84] sm:$0xf] }
 0x12f   : > { %v1618_v12 = vrot.slane %v1616_v28, 4  ;;  %v1621_v14 = vrot.slane %v1619_v62, 5  ;;  %v1625_v56 = vshll.u32 %v1376_v13, 16  ;;  %v7355_v17 = vpack.c.bf16 %v596_v16, %v596_v16  ;;  %v1382_v16 = vld [vmem:[#allocation2 + $0x88] sm:$0xf] }
 0x130   : > { %v4105_v9 = vsel %vm8976_vm9, %v9278_v29, %v4104_v31  ;;  %7694 = vmatprep.mubr.msk.bf16.mxu1 %vm1070_vm3, %v6941_v58  ;;  %v1629_v18 = vshrl.u32 %v1376_v13, 16  ;;  %v1635_v22 = vshll.u32 %v1377_v4, 16  ;;  %v1640_v24 = vshrl.u32 %v1378_v8, 16 }
 0x131   : > { %v7105_v57 = vcombine.low %v9276_v53, %v4105_v9  ;;  %v1622_v32 = vor.u32 %v1621_v14, %v1618_v12  ;;  %v1627_v19 = vrot.slane %v1625_v56, 5  ;;  %v1643_v34 = vshll.u32 %v1378_v8, 16  ;;  %886 = vst.msk [vmem:[#allocation2 + $0xbc] sm:$0x1] %vm840_vm2, %v7355_v17 }
 0x132   : > { %v1631_v29 = vrot.slane %v1629_v18, 4  ;;  %v1637_v53 = vrot.slane %v1635_v22, 5  ;;  %v1649_v37 = vshll.u32 %v1379_v40, 16  ;;  %v1653_v38 = vshrl.u32 %v1379_v40, 16  ;;  %v1383_v40 = vld [vmem:[#allocation2 + $0x8c] sm:$0x1] }
 0x133   : > { %7838 = vmatprep.mubr.msk.bf16.mxu0 %vm1070_vm3, %v7105_v57  ;;  %v1623_v42 = vrot.slane %v1622_v32, 4  ;;  %v1642_v43 = vrot.slane %v1640_v24, 4  ;;  %v1645_v11 = vrot.slane %v1643_v34, 5  ;;  %v1659_v63 = vshll.u32 %v1380_v25, 16  ;;  %v1384_v25 = vld [vmem:[#allocation2 + $0x90] sm:$0xf] }
 0x134   : > { %v3960_v41 = vld [vmem:[#allocation2 + $0xb0] sm:$0x1]  ;;  %v1632_v26 = vor.u32 %v1631_v29, %v1627_v19  ;;  %v1651_v60 = vrot.slane %v1649_v37, 5  ;;  %v1655_v7 = vrot.slane %v1653_v38, 4  ;;  %v425_v1 = vmul.f32 %v8739_v23, %v362_v48  ;;  %v1385_v32 = vld [vmem:[#allocation2 + $0x94] sm:$0xf] }
 0x135   : > { %v4111_v59 = vrot.slane %v3960_v41, 5  ;;  %v1628_v46 = vsel %vm8877_vm6, %v1623_v42, %v1627_v19  ;;  %v1646_v35 = vor.u32 %v1645_v11, %v1642_v43  ;;  %v1661_v45 = vrot.slane %v1659_v63, 5 }
 0x136   : > { %v1633_v44 = vrot.slane %v1632_v26, 4  ;;  %v1656_v33 = vor.u32 %v1655_v7, %v1651_v60  ;;  %v426_v2 = vmul.f32 %v8739_v23, %v363_v39  ;;  %v427_v20 = vmul.f32 %v8739_v23, %v364_v61  ;;  %v1386_v39 = vld [vmem:[#allocation2 + $0x98] sm:$0x1] }
 0x137   : > { %v4112_v15 = vsel %vm8976_vm9, %v4110_v49, %v4111_v59  ;;  %v1647_v30 = vrot.slane %v1646_v35, 4  ;;  %v543_v13 = vmul.f32 %v8779_v52, %v480_v0  ;;  %v544_v4 = vmul.f32 %v8779_v52, %v481_v21  ;;  %v1387_v59 = vld [vmem:[#allocation2 + $0x9c] sm:$0xf]  ;;  %v1388_v0 = vld [vmem:[#allocation2 + $0xa0] sm:$0xf] }
 0x138   : > { %v7106_v3 = vcombine.low %v9294_v51, %v4112_v15  ;;  %v1638_v31 = vsel %vm8877_vm6, %v1633_v44, %v1637_v53  ;;  %v1657_v36 = vrot.slane %v1656_v33, 4  ;;  %v545_v49 = vmul.f32 %v8779_v52, %v482_v27  ;;  %v3963_v28 = vld [vmem:[#allocation2 + $0xbc] sm:$0x1] }
 0x139   : > { %v6942_v62 = vcombine.low %v1628_v46, %v1638_v31  ;;  %v1652_v51 = vsel %vm8877_vm6, %v1647_v30, %v1651_v60  ;;  %v597_v58 = vadd.f32 %v543_v13, %v425_v1  ;;  %v1664_v8 = vshrl.u32 %v1381_v50, 16 }
 0x13a   : > { %7839 = vmatmul.mubr.msk.bf16.gmra.mrb[24].mxu0 %vm1070_vm3, %v7106_v3  ;;  %v4118_v9 = vrot.slane %v3963_v28, 5  ;;  %v1662_v12 = vsel %vm8877_vm6, %v1657_v36, %v1661_v45  ;;  %v598_v14 = vadd.f32 %v544_v4, %v426_v2  ;;  %v599_v56 = vadd.f32 %v545_v49, %v427_v20  ;;  %v1389_v3 = vld [vmem:[#allocation2 + $0xa4] sm:$0x1]  ;;  %v1390_v49 = vld [vmem:[#allocation2 + $0xa8] sm:$0xf] }
 0x13b   : > { %7695 = vmatmul.mubr.msk.bf16.gmra.mrb[16].mxu1 %vm1070_vm3, %v6942_v62  ;;  %v6943_v57 = vcombine.low %v1652_v51, %v1662_v12  ;;  %v7356_v17 = vpack.c.bf16 %v597_v58, %v597_v58  ;;  %v1666_v18 = vrot.slane %v1664_v8, 4  ;;  %v1667_v22 = vshll.u32 %v1381_v50, 16 }
 0x13c   : > { %v4119_v19 = vsel %vm8976_vm9, %v9309_v55, %v4118_v9  ;;  %v7357_v24 = vpack.c.bf16 %v598_v14, %v598_v14  ;;  %v7358_v34 = vpack.c.bf16 %v599_v56, %v599_v56  ;;  %v1673_v29 = vshll.u32 %v1382_v16, 16 }
 0x13d   : > { %v7107_v53 = vcombine.low %v9307_v54, %v4119_v19  ;;  %7698 = vmatprep.mubr.msk.bf16.mxu1 %vm1070_vm3, %v6943_v57  ;;  %887 = vst.msk [vmem:[#allocation2 + $0xc0] sm:$0xf] %vm837_vm1, %v7356_v17  ;;  %v1669_v37 = vrot.slane %v1667_v22, 5  ;;  %v1677_v38 = vshrl.u32 %v1382_v16, 16  ;;  %v1683_v48 = vshll.u32 %v1383_v40, 16 }
 0x13e   : > { %888 = vst.msk [vmem:[#allocation2 + $0xc4] sm:$0xf] %vm837_vm1, %v7357_v24  ;;  %v1675_v41 = vrot.slane %v1673_v29, 5  ;;  %v1688_v42 = vshrl.u32 %v1384_v25, 16  ;;  %v1691_v55 = vshll.u32 %v1384_v25, 16  ;;  %v1697_v43 = vshll.u32 %v1385_v32, 16 }
 0x13f   : > { %889 = vst.msk [vmem:[#allocation2 + $0xc8] sm:$0x1] %vm840_vm2, %v7358_v34  ;;  %7842 = vmatprep.mubr.msk.bf16.mxu0 %vm1070_vm3, %v7107_v53  ;;  %v1670_v11 = vor.u32 %v1669_v37, %v1666_v18  ;;  %v1679_v54 = vrot.slane %v1677_v38, 4  ;;  %v1701_v63 = vshrl.u32 %v1385_v32, 16  ;;  %v1707_v61 = vshll.u32 %v1386_v39, 16 }
 0x140   : > { %v1690_v26 = vrot.slane %v1688_v42, 4  ;;  %v1693_v60 = vrot.slane %v1691_v55, 5  ;;  %v1699_v7 = vrot.slane %v1697_v43, 5  ;;  %v1685_v45 = vrot.slane %v1683_v48, 5  ;;  %v1391_v18 = vld [vmem:[#allocation2 + $0xac] sm:$0xf] }
 0x141   : > { %v1671_v46 = vrot.slane %v1670_v11, 4  ;;  %v1680_v35 = vor.u32 %v1679_v54, %v1675_v41  ;;  %v1703_v1 = vrot.slane %v1701_v63, 4  ;;  %v1709_v27 = vrot.slane %v1707_v61, 5  ;;  %v1393_v24 = vld [vmem:[#allocation2 + $0xb4] sm:$0xf]  ;;  %v8308_v11 = vld [vmem:[#allocation2 + $0x18] sm:$0xff]  }
 0x142   : > { %v1694_v21 = vor.u32 %v1693_v60, %v1690_v26  ;;  %v1712_v15 = vshrl.u32 %v1387_v59, 16  ;;  %v1715_v44 = vshll.u32 %v1387_v59, 16  ;;  %v1721_v30 = vshll.u32 %v1388_v0, 16  ;;  %v1392_v53 = vld [vmem:[#allocation2 + $0xb0] sm:$0x1] }
 0x143   : > { %v1676_v33 = vsel %vm8877_vm6, %v1671_v46, %v1675_v41  ;;  %v1681_v2 = vrot.slane %v1680_v35, 4  ;;  %v1704_v50 = vor.u32 %v1703_v1, %v1699_v7  ;;  %v1725_v4 = vshrl.u32 %v1388_v0, 16  ;;  %v1394_v55 = vld [vmem:[#allocation2 + $0xb8] sm:$0xf]  ;;  %v2141_v0 = vld [vmem:[#allocation2 + $0x4] sm:$0xf] }
 0x144   : > { %v3964_v20 = vld [vmem:[#allocation2 + $0xc0] sm:$0xe]  ;;  %v1695_v13 = vrot.slane %v1694_v21, 4  ;;  %v1714_v31 = vrot.slane %v1712_v15, 4  ;;  %v1717_v36 = vrot.slane %v1715_v44, 5  ;;  %v1723_v57 = vrot.slane %v1721_v30, 5 }
 0x145   : > { %v3965_v28 = vld [vmem:[#allocation2 + $0xc4] sm:$0xf]  ;;  %v7092_v51 = vrot.slane %v3964_v20, 9  ;;  %v1686_v58 = vsel %vm8877_vm6, %v1681_v2, %v1685_v45  ;;  %v1705_v16 = vrot.slane %v1704_v50, 4  ;;  %v1727_v17 = vrot.slane %v1725_v4, 4 }
 0x146   : > { %v3966_v62 = vld [vmem:[#allocation2 + $0xc8] sm:$0x1]  ;;  %v4122_v8 = vrot.slane %v3965_v28, 5  ;;  %v6944_v12 = vcombine.low %v1676_v33, %v1686_v58  ;;  %v1700_v14 = vsel %vm8877_vm6, %v1695_v13, %v1699_v7  ;;  %v1718_v40 = vor.u32 %v1717_v36, %v1714_v31  ;;  %v1395_v44 = vld [vmem:[#allocation2 + $0xbc] sm:$0x1] }
 0x147   : > { %v4125_v9 = vrot.slane %v3966_v62, 5  ;;  %v1710_v56 = vsel %vm8877_vm6, %v1705_v16, %v1709_v27  ;;  %v1731_v19 = vshll.u32 %v1389_v3, 16  ;;  %v1728_v29 = vor.u32 %v1727_v17, %v1723_v57  ;;  %v2140_v30 = vld [vmem:[#allocation2] sm:$0xe]  ;;  %v2142_v36 = vld [vmem:[#allocation2 + $0x8] sm:$0x1] }
 0x148   : > { %v4123_v22 = vsel %vm8976_vm9, %v7092_v51, %v4122_v8  ;;  %v4124_v25 = vrot.slane %v4122_v8, 4  ;;  %7699 = vmatmul.mubr.msk.bf16.gmra.mrb[20].mxu1 %vm1070_vm3, %v6944_v12  ;;  %v6945_v32 = vcombine.low %v1700_v14, %v1710_v56  ;;  %v1719_v34 = vrot.slane %v1718_v40, 4  ;;  %v2144_v51 = vld [vmem:[#allocation2 + $0x10] sm:$0xf]  ;;  %v8309_v58 = vld [vmem:[#allocation2 + $0x24] sm:$0xff]  }
 0x149   : > { %v1736_v37 = vshrl.u32 %v1390_v49, 16  ;;  %v1739_v38 = vshll.u32 %v1390_v49, 16  ;;  %v1733_v39 = vrot.slane %v1731_v19, 5  ;;  %v1745_v41 = vshll.u32 %v1391_v18, 16  ;;  %v8310_v16 = vld [vmem:[#allocation2 + $0x30] sm:$0xff]  }
 0x14a   : > { %v4126_v48 = vsel %vm8976_vm9, %v4124_v25, %v4125_v9  ;;  %7702 = vmatprep.mubr.msk.bf16.mxu1 %vm1070_vm3, %v6945_v32  ;;  %v1749_v42 = vshrl.u32 %v1391_v18, 16  ;;  %v1724_v54 = vsel %vm8877_vm6, %v1719_v34, %v1723_v57  ;;  %v1729_v63 = vrot.slane %v1728_v29, 4  ;;  %v2147_v12 = vld [vmem:[#allocation2 + $0x1c] sm:$0xf]  ;;  %v8468_v14 = vld [vmem:[%s10386_s4 + $0x1c] sm:$0xf] }
 0x14b   : > { %v7108_v43 = vcombine.low %v4123_v22, %v4126_v48  ;;  %v1738_v59 = vrot.slane %v1736_v37, 4  ;;  %v1741_v26 = vrot.slane %v1739_v38, 5  ;;  %v1747_v60 = vrot.slane %v1745_v41, 5  ;;  %v9384_v18 = vld [vmem:[%s10386_s4 + $0x20] sm:$0xf] }
 0x14c   : > { %v1751_v7 = vrot.slane %v1749_v42, 4  ;;  %v1755_v61 = vshll.u32 %v1392_v53, 16  ;;  %v1734_v46 = vsel %vm8877_vm6, %v1729_v63, %v1733_v39  ;;  %v1760_v35 = vshrl.u32 %v1393_v24, 16  ;;  %v9393_v38 = vld [vmem:[#allocation2 + $0x28] sm:$0xf] }
 0x14d   : > { %7843 = vmatmul.mubr.msk.bf16.gmra.mrb[28].mxu0 %vm1070_vm3, %v7108_v43  ;;  %v1763_v45 = vshll.u32 %v1393_v24, 16  ;;  %v1769_v1 = vshll.u32 %v1394_v55, 16  ;;  %v6946_v21 = vcombine.low %v1724_v54, %v1734_v46  ;;  %v1742_v27 = vor.u32 %v1741_v26, %v1738_v59  ;;  %v9395_v48 = vld [vmem:[#allocation2 + $0x34] sm:$0xf]  ;;  %v2143_v41 = vld [vmem:[#allocation2 + $0xc] sm:$0xe] }
 0x14e   : > { %7848 = vmatprep.mubr.msk.bf16.mxu0 %vm1070_vm3, %v8308_v11  ;;  %v1752_v15 = vor.u32 %v1751_v7, %v1747_v60  ;;  %v1762_v33 = vrot.slane %v1760_v35, 4  ;;  %v1773_v3 = vshrl.u32 %v1394_v55, 16  ;;  %v1757_v31 = vrot.slane %v1755_v61, 5  ;;  %v2145_v42 = vld [vmem:[#allocation2 + $0x14] sm:$0x1]  ;;  %v8312_v35 = vld [vmem:[#allocation2 + $0x48] sm:$0xff]  }
 0x14f   : > { %v1765_v2 = vrot.slane %v1763_v45, 5  ;;  %v1771_v50 = vrot.slane %v1769_v1, 5  ;;  %v1743_v20 = vrot.slane %v1742_v27, 4  ;;  %v1779_v28 = vshll.u32 %v1395_v44, 16  ;;  %v2146_v54 = vld [vmem:[#allocation2 + $0x18] sm:$0xe] }
 0x150   : > { %7703 = vmatmul.mubr.msk.bf16.gmra.mrb[24].mxu1 %vm1070_vm3, %v6946_v21  ;;  %v1753_v13 = vrot.slane %v1752_v15, 4  ;;  %v1775_v49 = vrot.slane %v1773_v3, 4  ;;  %v2241_v62 = vrot.slane %v2141_v0, 5  ;;  %v5468_v56 = vsel %vm1119_vm0, %v8468_v14, 0  ;;  %v2148_v63 = vld [vmem:[#allocation2 + $0x20] sm:$0x1] }
 0x151   : > { %v1766_v4 = vor.u32 %v1765_v2, %v1762_v33  ;;  %v1748_v8 = vsel %vm8877_vm6, %v1743_v20, %v1747_v60  ;;  %v6965_v22 = vrot.slane %v2140_v30, 9  ;;  %v2244_v32 = vrot.slane %v2142_v36, 5  ;;  %v2149_v60 = vld [vmem:[#allocation2 + $0x24] sm:$0xe]  ;;  %v8311_v0 = vld [vmem:[#allocation2 + $0x3c] sm:$0xff]  }
 0x152   : > { %v1758_v9 = vsel %vm8877_vm6, %v1753_v13, %v1757_v31  ;;  %v1776_v17 = vor.u32 %v1775_v49, %v1771_v50  ;;  %v2243_v25 = vrot.slane %v2241_v62, 4  ;;  %v2248_v19 = vrot.slane %v2144_v51, 5  ;;  %v2151_v27 = vld [vmem:[#allocation2 + $0x2c] sm:$0x1]  ;;  %v2152_v15 = vld [vmem:[#allocation2 + $0x30] sm:$0xe] }
 0x153   : > { %v6947_v40 = vcombine.low %v1748_v8, %v1758_v9  ;;  %v1767_v57 = vrot.slane %v1766_v4, 4  ;;  %v1781_v29 = vrot.slane %v1779_v28, 5  ;;  %v2255_v53 = vrot.slane %v2147_v12, 5  ;;  %v2154_v44 = vld [vmem:[#allocation2 + $0x38] sm:$0x1]  ;;  %v365_v8 = vld [vmem:[%s8710_s12 + $0x198] sm:$0xff] }
 0x154   : > { %v1777_v34 = vrot.slane %v1776_v17, 4  ;;  %v2245_v37 = vsel %vm8976_vm9, %v2243_v25, %v2244_v32  ;;  %v2242_v43 = vsel %vm8976_vm9, %v6965_v22, %v2241_v62  ;;  %v2250_v11 = vrot.slane %v2248_v19, 4  ;;  %v2155_v30 = vld [vmem:[#allocation2 + $0x3c] sm:$0xe]  ;;  %v2156_v20 = vld [vmem:[#allocation2 + $0x40] sm:$0xf] }
 0x155   : > { %7849 = vmatmul.mubr.msk.bf16.vlgmr.msra.gmra.mrb[0].mxu0 %vm1070_vm3, %v8309_v58  ;;  %7706 = vmatprep.mubr.msk.bf16.mxu1 %vm1070_vm3, %v6947_v40  ;;  %v1772_v24 = vsel %vm8877_vm6, %v1767_v57, %v1771_v50  ;;  %v6981_v59 = vcombine.low %v2242_v43, %v2245_v37  ;;  %v2257_v26 = vrot.slane %v2255_v53, 4  ;;  %v2262_v7 = vrot.slane %v9393_v38, 5  ;;  %v2158_v36 = vld [vmem:[#allocation2 + $0x48] sm:$0xe]  ;;  %v2159_v4 = vld [vmem:[#allocation2 + $0x4c] sm:$0xf] }
 0x156   : > { %7881 = vmatpush3.bf16.msra.mxu0 %v5468_v56  ;;  %7852 = vmatprep.mubr.msk.bf16.mxu0 %vm1070_vm3, %v8310_v16  ;;  %v1782_v39 = vsel %vm8877_vm6, %v1777_v34, %v1781_v29  ;;  %v2269_v61 = vrot.slane %v9395_v48, 5  ;;  %v6966_v46 = vrot.slane %v2143_v41, 9  ;;  %v2251_v45 = vrot.slane %v2145_v42, 5  ;;  %v2157_v58 = vld [vmem:[#allocation2 + $0x44] sm:$0x1]  ;;  %v8313_v57 = vld [vmem:[#allocation2 + $0x54] sm:$0xff]  }
 0x157   : > { %8215 = vmatprep.subr.msk.bf16.mxu0 %vm1119_vm0, %v9384_v18  ;;  %v6948_v55 = vcombine.low %v1772_v24, %v1782_v39  ;;  %v6967_v1 = vrot.slane %v2146_v54, 9  ;;  %v2258_v21 = vrot.slane %v2148_v63, 5  ;;  %v2264_v50 = vrot.slane %v2262_v7, 4  ;;  %v2160_v16 = vld [vmem:[#allocation2 + $0x50] sm:$0x1]  ;;  %v483_v39 = vld [vmem:[%s8719_s16 + $0x198] sm:$0xff] }
 0x158   : > { %v2252_v33 = vsel %vm8976_vm9, %v2250_v11, %v2251_v45  ;;  %v2271_v3 = vrot.slane %v2269_v61, 4  ;;  %v2249_v13 = vsel %vm8976_vm9, %v6966_v46, %v2248_v19  ;;  %v6968_v31 = vrot.slane %v2149_v60, 9  ;;  %v9420_v40 = vld [vmem:[#allocation2 + $0x58] sm:$0xf]  ;;  %v8314_v19 = vld [vmem:[#allocation2 + $0x60] sm:$0xff]   ;;  %v484_v41 = vld [vmem:[%s8719_s16 + $0x1a0] sm:$0xff] }
 0x159   : > { %7707 = vmatmul.mubr.msk.bf16.gmra.mrb[28].mxu1 %vm1070_vm3, %v6948_v55  ;;  %v2259_v2 = vsel %vm8976_vm9, %v2257_v26, %v2258_v21  ;;  %v2256_v49 = vsel %vm8976_vm9, %v6967_v1, %v2255_v53  ;;  %v2265_v28 = vrot.slane %v2151_v27, 5  ;;  %v6969_v62 = vrot.slane %v2152_v15, 9  ;;  %v9429_v24 = vld [vmem:[#allocation2 + $0x54] sm:$0xe]  ;;  %v9439_v48 = vld [vmem:[#allocation2 + $0x64] sm:$0xf] }
 0x15a   : > { %7712 = vmatprep.mubr.msk.bf16.mxu1 %vm1070_vm3, %v6981_v59  ;;  %v2272_v51 = vrot.slane %v2154_v44, 5  ;;  %v6982_v9 = vcombine.low %v2249_v13, %v2252_v33  ;;  %v6983_v12 = vcombine.low %v2256_v49, %v2259_v2  ;;  %v2903_v14 = vsel %vm1119_vm0, %v9226_v47, 0  ;;  %v366_v47 = vld [vmem:[%s8710_s12 + $0x1a0] sm:$0xff]  ;;  %v2163_v54 = vld [vmem:[#allocation2 + $0x5c] sm:$0x1] }
 0x15b   : > { %v6970_v56 = vrot.slane %v2155_v30, 9  ;;  %v2266_v17 = vsel %vm8976_vm9, %v2264_v50, %v2265_v28  ;;  %v2276_v25 = vrot.slane %v2156_v20, 5  ;;  %v2283_v32 = vrot.slane %v2159_v4, 5  ;;  %v9444_v63 = vld [vmem:[#allocation2 + $0x60] sm:$0xe]  ;;  %v8315_v4 = vld [vmem:[#allocation2 + $0x6c] sm:$0xff]  }
 0x15c   : > { %v9426_v22 = vsel %vm8976_vm9, %v2271_v3, %v2272_v51  ;;  %v428_v34 = vmul.f32 %v8739_v23, %v365_v8  ;;  %v2263_v29 = vsel %vm8976_vm9, %v6968_v31, %v2262_v7  ;;  %v2270_v53 = vsel %vm8976_vm9, %v6969_v62, %v2269_v61  ;;  %v9446_v59 = vld [vmem:[#allocation2 + $0x70] sm:$0xf]  ;;  %v4906_v26 = vld [vmem:[#allocation2 + $0x18] sm:$0xf]  ;;  %v8469_v60 = vld [vmem:[%s10386_s4 + $0x10] sm:$0xf] }
 0x15d   : > { %7853 = vmatmul.mubr.msk.bf16.gmra.mrb[4].mxu0 %vm1070_vm3, %v8311_v0  ;;  %v6971_v37 = vrot.slane %v2158_v36, 9  ;;  %v2290_v38 = vrot.slane %v9420_v40, 5  ;;  %v6984_v42 = vcombine.low %v2263_v29, %v2266_v17  ;;  %v6985_v55 = vcombine.low %v2270_v53, %v9426_v22  ;;  %v2166_v45 = vld [vmem:[#allocation2 + $0x68] sm:$0x1]  ;;  %v2167_v3 = vld [vmem:[#allocation2 + $0x6c] sm:$0xe] }
 0x15e   : > { %7856 = vmatprep.mubr.msk.bf16.mxu0 %vm1070_vm3, %v8312_v35  ;;  %v2279_v43 = vrot.slane %v2157_v58, 5  ;;  %v2286_v11 = vrot.slane %v2160_v16, 5  ;;  %v9455_v7 = vsel %vm8976_vm9, %v6970_v56, %v2276_v25  ;;  %v2278_v61 = vrot.slane %v2276_v25, 4  ;;  %v4907_v35 = vld [vmem:[#allocation2 + $0x1c] sm:$0xf] }
 0x15f   : > { %v2285_v0 = vrot.slane %v2283_v32, 4  ;;  %v6972_v46 = vrot.slane %v9429_v24, 9  ;;  %v2297_v1 = vrot.slane %v9439_v48, 5  ;;  %v429_v21 = vmul.f32 %v8739_v23, %v366_v47  ;;  %v9470_v30 = vld [vmem:[#allocation2 + $0x7c] sm:$0xf] }
 0x160   : > { %v546_v27 = vmul.f32 %v8779_v52, %v483_v39  ;;  %v547_v15 = vmul.f32 %v8779_v52, %v484_v41  ;;  %v9465_v44 = vsel %vm8976_vm9, %v6971_v37, %v2283_v32  ;;  %v2292_v33 = vrot.slane %v2290_v38, 4  ;;  %v2169_v58 = vld [vmem:[#allocation2 + $0x74] sm:$0x1]  ;;  %v2170_v16 = vld [vmem:[#allocation2 + $0x78] sm:$0xe] }
 0x161   : > { %7713 = vmatmul.mubr.msk.bf16.vlgmr.msra.gmra.mrb[0].mxu1 %vm1070_vm3, %v6982_v9  ;;  %v2304_v2 = vrot.slane %v9446_v59, 5  ;;  %v4955_v50 = vshrl.u32 %v4906_v26, 16  ;;  %v4958_v31 = vshll.u32 %v4906_v26, 16  ;;  %v4964_v36 = vshll.u32 %v4907_v35, 16  ;;  %v9480_v56 = vld [vmem:[#allocation2 + $0x88] sm:$0xf] }
 0x162   : > { %7716 = vmatprep.mubr.msk.bf16.mxu1 %vm1070_vm3, %v6983_v12  ;;  %7745 = vmatpush3.bf16.msra.mxu1 %v2903_v14  ;;  %v600_v20 = vadd.f32 %v546_v27, %v428_v34  ;;  %v601_v13 = vadd.f32 %v547_v15, %v429_v21  ;;  %v2280_v49 = vsel %vm8976_vm9, %v2278_v61, %v2279_v43  ;;  %v2293_v62 = vrot.slane %v2163_v54, 5  ;;  %v8316_v17 = vld [vmem:[#allocation2 + $0x78] sm:$0xff]   ;;  %v4909_v40 = vld [vmem:[#allocation2 + $0x24] sm:$0xf]  ;;  %v2175_v26 = vld [vmem:[#allocation2 + $0x8c] sm:$0x1] }
 0x163   : > { %8211 = vmatprep.subr.msk.bf16.mxu1 %vm1119_vm0, %v8469_v60  ;;  %v9476_v28 = vsel %vm8976_vm9, %v2285_v0, %v2286_v11  ;;  %v6973_v51 = vrot.slane %v9444_v63, 9  ;;  %v2299_v8 = vrot.slane %v2297_v1, 4  ;;  %v4968_v14 = vshrl.u32 %v4907_v35, 16  ;;  %v8317_v21 = vld [vmem:[#allocation2 + $0x84] sm:$0xff]  }
 0x164   : > { %v7359_v9 = vpack.c.bf16 %v600_v20, %v600_v20  ;;  %v7360_v12 = vpack.c.bf16 %v601_v13, %v601_v13  ;;  %v9487_v22 = vsel %vm8976_vm9, %v2292_v33, %v2293_v62  ;;  %v2300_v25 = vrot.slane %v2166_v45, 5  ;;  %v2176_v45 = vld [vmem:[#allocation2 + $0x90] sm:$0xe] }
 0x165   : > { %7857 = vmatmul.mubr.msk.bf16.gmra.mrb[8].mxu0 %vm1070_vm3, %v8313_v57  ;;  %v9482_v57 = vld [vmem:[#allocation2 + $0x94] sm:$0xf]  ;;  %v2306_v32 = vrot.slane %v2304_v2, 4  ;;  %v2311_v24 = vrot.slane %v9470_v30, 5  ;;  %v4957_v47 = vrot.slane %v4955_v50, 4  ;;  %v4960_v34 = vrot.slane %v4958_v31, 5 }
 0x166   : > { %7860 = vmatprep.mubr.msk.bf16.mxu0 %vm1070_vm3, %v8314_v19  ;;  %v2172_v19 = vld [vmem:[#allocation2 + $0x80] sm:$0x1]  ;;  %890 = vst.msk [vmem:[#allocation2 + $0xcc] sm:$0xf] %vm837_vm1, %v7359_v9  ;;  %891 = vst.msk [vmem:[#allocation2 + $0xd0] sm:$0xf] %vm837_vm1, %v7360_v12  ;;  %v6986_v37 = vcombine.low %v9455_v7, %v2280_v49  ;;  %v6987_v48 = vcombine.low %v9465_v44, %v9476_v28  ;;  %v9502_v39 = vsel %vm8976_vm9, %v6972_v46, %v2290_v38 }
 0x167   : > { %v9492_v29 = vrot.slane %v4964_v36, 5  ;;  %v4970_v53 = vrot.slane %v4968_v14, 4  ;;  %v6974_v41 = vrot.slane %v2167_v3, 9  ;;  %v9507_v43 = vsel %vm8976_vm9, %v6973_v51, %v2297_v1  ;;  %v2178_v1 = vld [vmem:[#allocation2 + $0x98] sm:$0x1]  ;;  %v8318_v30 = vld [vmem:[#allocation2 + $0x90] sm:$0xff]  }
 0x168   : > { %v9511_v11 = vsel %vm8976_vm9, %v2299_v8, %v2300_v25  ;;  %v2307_v54 = vrot.slane %v2169_v58, 5  ;;  %v6975_v63 = vrot.slane %v2170_v16, 9  ;;  %v6988_v38 = vcombine.low %v9502_v39, %v9487_v22  ;;  %v4910_v44 = vld [vmem:[#allocation2 + $0x28] sm:$0xf]  ;;  %v4912_v3 = vld [vmem:[#allocation2 + $0x30] sm:$0xf] }
 0x169   : > { %7717 = vmatmul.mubr.msk.bf16.gmra.mrb[4].mxu1 %vm1070_vm3, %v6984_v42  ;;  %v4908_v42 = vld [vmem:[#allocation2 + $0x20] sm:$0x1]  ;;  %v2313_v59 = vrot.slane %v2311_v24, 4  ;;  %v2318_v60 = vrot.slane %v9480_v56, 5  ;;  %v2325_v7 = vrot.slane %v9482_v57, 5  ;;  %v2314_v0 = vrot.slane %v2172_v19, 5 }
 0x16a   : > { %7720 = vmatprep.mubr.msk.bf16.mxu1 %vm1070_vm3, %v6985_v55  ;;  %v2173_v55 = vld [vmem:[#allocation2 + $0x84] sm:$0xe]  ;;  %v9519_v61 = vsel %vm8976_vm9, %v2306_v32, %v2307_v54  ;;  %v4961_v46 = vor.u32 %v4960_v34, %v4957_v47  ;;  %v4971_v35 = vor.u32 %v4970_v53, %v9492_v29  ;;  %v6989_v27 = vcombine.low %v9507_v43, %v9511_v11  ;;  %v4913_v8 = vld [vmem:[#allocation2 + $0x34] sm:$0xf]  ;;  %v4911_v9 = vld [vmem:[#allocation2 + $0x2c] sm:$0x1] }
 0x16b   : > { %v9526_v15 = vsel %vm8976_vm9, %v6974_v41, %v2304_v2  ;;  %v4979_v33 = vshrl.u32 %v4909_v40, 16  ;;  %v4982_v50 = vshll.u32 %v4909_v40, 16  ;;  %v9531_v20 = vsel %vm8976_vm9, %v6975_v63, %v2311_v24  ;;  %v9561_v41 = vld [vmem:[#allocation2 + $0x38] sm:$0x1]  ;;  %v4916_v63 = vld [vmem:[#allocation2 + $0x40] sm:$0xf] }
 0x16c   : > { %v4974_v13 = vshll.u32 %v4908_v42, 16  ;;  %v6976_v31 = vrot.slane %v2173_v55, 9  ;;  %v2321_v36 = vrot.slane %v2175_v26, 5  ;;  %v6990_v2 = vcombine.low %v9526_v15, %v9519_v61  ;;  %v8319_v42 = vld [vmem:[#allocation2 + $0x9c] sm:$0xff]  }
 0x16d   : > { %7861 = vmatmul.mubr.msk.bf16.gmra.mrb[12].mxu0 %vm1070_vm3, %v8315_v4  ;;  %v9538_v4 = vsel %vm8976_vm9, %v2313_v59, %v2314_v0  ;;  %v2320_v49 = vrot.slane %v2318_v60, 4  ;;  %v2327_v28 = vrot.slane %v2325_v7, 4  ;;  %v4962_v62 = vrot.slane %v4961_v46, 4  ;;  %v2180_v0 = vld [vmem:[#allocation2 + $0xa0] sm:$0xf] }
 0x16e   : > { %7864 = vmatprep.mubr.msk.bf16.mxu0 %vm1070_vm3, %v8316_v17  ;;  %v4972_v51 = vrot.slane %v4971_v35, 4  ;;  %v6977_v58 = vrot.slane %v2176_v45, 9  ;;  %v2328_v16 = vrot.slane %v2178_v1, 5  ;;  %v4981_v12 = vrot.slane %v4979_v33, 4  ;;  %v4918_v46 = vld [vmem:[#allocation2 + $0x48] sm:$0xf] }
 0x16f   : > { %v4984_v14 = vrot.slane %v4982_v50, 5  ;;  %v4988_v56 = vshll.u32 %v4910_v44, 16  ;;  %v4992_v57 = vshrl.u32 %v4910_v44, 16  ;;  %v6991_v17 = vcombine.low %v9531_v20, %v9538_v4 }
 0x170   : > { %v4976_v22 = vrot.slane %v4974_v13, 5  ;;  %v5003_v25 = vshrl.u32 %v4912_v3, 16  ;;  %v5006_v32 = vshll.u32 %v4912_v3, 16  ;;  %v9546_v19 = vsel %vm8976_vm9, %v2320_v49, %v2321_v36 }
 0x171   : > { %7721 = vmatmul.mubr.msk.bf16.gmra.mrb[8].mxu1 %vm1070_vm3, %v6986_v37  ;;  %v9550_v24 = vsel %vm8976_vm9, %v2327_v28, %v2328_v16  ;;  %v5012_v47 = vshll.u32 %v4913_v8, 16  ;;  %v5016_v34 = vshrl.u32 %v4913_v8, 16  ;;  %v4967_v53 = vsel %vm8877_vm6, %v4962_v62, %v9492_v29  ;;  %v4915_v29 = vld [vmem:[#allocation2 + $0x3c] sm:$0xf]  ;;  %v9591_v28 = vld [vmem:[#allocation2 + $0xac] sm:$0xf] }
 0x172   : > { %7724 = vmatprep.mubr.msk.bf16.mxu1 %vm1070_vm3, %v6987_v48  ;;  %v4977_v37 = vsel %vm8877_vm6, %v4972_v51, %v4976_v22  ;;  %v9559_v48 = vsel %vm8976_vm9, %v6976_v31, %v2318_v60  ;;  %v4998_v39 = vshll.u32 %v4911_v9, 16  ;;  %v9565_v55 = vsel %vm8976_vm9, %v6977_v58, %v2325_v7  ;;  %v8320_v7 = vld [vmem:[#allocation2 + $0xa8] sm:$0xff]  }
 0x173   : > { %v4985_v43 = vor.u32 %v4984_v14, %v4981_v12  ;;  %v9567_v11 = vrot.slane %v4988_v56, 5  ;;  %v4994_v54 = vrot.slane %v4992_v57, 4  ;;  %v6992_v40 = vcombine.low %v9559_v48, %v9546_v19  ;;  %v2181_v12 = vld [vmem:[#allocation2 + $0xa4] sm:$0x1] }
 0x174   : > { %v6993_v59 = vcombine.low %v9565_v55, %v9550_v24  ;;  %v5005_v26 = vrot.slane %v5003_v25, 4  ;;  %v5008_v60 = vrot.slane %v5006_v32, 5  ;;  %v9575_v35 = vcombine.low %v4967_v53, %v4977_v37  ;;  %v2186_v37 = vld [vmem:[#allocation2 + $0xb8] sm:$0xf]  ;;  %v4925_v24 = vld [vmem:[#allocation2 + $0x64] sm:$0xf] }
 0x175   : > { %7865 = vmatmul.mubr.msk.bf16.gmra.mrb[16].mxu0 %vm1070_vm3, %v8317_v21  ;;  %v9579_v45 = vsel %vm1119_vm0, %v9384_v18, 0  ;;  %v5018_v1 = vrot.slane %v5016_v34, 4  ;;  %v2179_v21 = vld [vmem:[#allocation2 + $0x9c] sm:$0xe]  ;;  %v9583_v44 = vrot.slane %v4998_v39, 5  ;;  %v5027_v33 = vshrl.u32 %v4915_v29, 16 }
 0x176   : > { %7868 = vmatprep.mubr.msk.bf16.mxu0 %vm1070_vm3, %v8318_v30  ;;  %v5030_v50 = vshll.u32 %v4915_v29, 16  ;;  %v5036_v3 = vshll.u32 %v4916_v63, 16  ;;  %v9586_v30 = vrot.slane %v4985_v43, 4  ;;  %v5022_v13 = vshll.u32 %v9561_v41, 16  ;;  %v4919_v18 = vld [vmem:[#allocation2 + $0x4c] sm:$0xf] }
 0x177   : > { %v5040_v31 = vshrl.u32 %v4916_v63, 16  ;;  %v5009_v36 = vor.u32 %v5008_v60, %v5005_v26  ;;  %v2332_v49 = vrot.slane %v2180_v0, 5  ;;  %v5029_v62 = vrot.slane %v5027_v33, 4  ;;  %v2182_v39 = vld [vmem:[#allocation2 + $0xa8] sm:$0xe]  ;;  %v8321_v29 = vld [vmem:[#allocation2 + $0xb4] sm:$0xff]  }
 0x178   : > { %v5032_v51 = vrot.slane %v5030_v50, 5  ;;  %v9594_v16 = vrot.slane %v5036_v3, 5  ;;  %v5051_v9 = vshrl.u32 %v4918_v46, 16  ;;  %v6978_v14 = vrot.slane %v2179_v21, 9  ;;  %v2184_v26 = vld [vmem:[#allocation2 + $0xb0] sm:$0x1] }
 0x179   : > { %7725 = vmatmul.mubr.msk.bf16.gmra.mrb[12].mxu1 %vm1070_vm3, %v6988_v38  ;;  %v9581_v38 = vrot.slane %v5012_v47, 5  ;;  %v5042_v8 = vrot.slane %v5040_v31, 4  ;;  %v5054_v56 = vshll.u32 %v4918_v46, 16  ;;  %v5060_v57 = vshll.u32 %v4919_v18, 16  ;;  %v4917_v47 = vld [vmem:[#allocation2 + $0x44] sm:$0x1] }
 0x17a   : > { %7728 = vmatprep.mubr.msk.bf16.mxu1 %vm1070_vm3, %v6989_v27  ;;  %v4995_v27 = vor.u32 %v4994_v54, %v9567_v11  ;;  %v5064_v22 = vshrl.u32 %v4919_v18, 16  ;;  %v2339_v32 = vrot.slane %v9591_v28, 5  ;;  %v5033_v34 = vor.u32 %v5032_v51, %v5029_v62  ;;  %v8322_v60 = vld [vmem:[#allocation2 + $0xc0] sm:$0xff]   ;;  %v2185_v33 = vld [vmem:[#allocation2 + $0xb4] sm:$0xe] }
 0x17b   : > { %v5019_v58 = vor.u32 %v5018_v1, %v9581_v38  ;;  %v5043_v53 = vor.u32 %v5042_v8, %v9594_v16  ;;  %v5053_v41 = vrot.slane %v5051_v9, 4  ;;  %v9602_v43 = vrot.slane %v5060_v57, 5  ;;  %v4920_v1 = vld [vmem:[#allocation2 + $0x50] sm:$0x1]  ;;  %v4921_v31 = vld [vmem:[#allocation2 + $0x54] sm:$0xf] }
 0x17c   : > { %v4996_v25 = vrot.slane %v4995_v27, 4  ;;  %v5066_v54 = vrot.slane %v5064_v22, 4  ;;  %v4991_v63 = vsel %vm8877_vm6, %v9586_v30, %v9567_v11  ;;  %v5010_v61 = vrot.slane %v5009_v36, 4  ;;  %v4927_v55 = vld [vmem:[#allocation2 + $0x6c] sm:$0xf] }
 0x17d   : > { %7869 = vmatmul.mubr.msk.bf16.gmra.mrb[20].mxu0 %vm1070_vm3, %v8319_v42  ;;  %v5056_v42 = vrot.slane %v5054_v56, 5  ;;  %v5020_v15 = vrot.slane %v5019_v58, 4  ;;  %v5024_v0 = vrot.slane %v5022_v13, 5  ;;  %v9614_v46 = vsel %vm8976_vm9, %v6978_v14, %v2332_v49  ;;  %v2187_v13 = vld [vmem:[#allocation2 + $0xbc] sm:$0x1] }
 0x17e   : > { %7872 = vmatprep.mubr.msk.bf16.mxu0 %vm1070_vm3, %v8320_v7  ;;  %v5046_v7 = vshll.u32 %v4917_v47, 16  ;;  %v2346_v20 = vrot.slane %v2186_v37, 5  ;;  %v5001_v4 = vsel %vm8877_vm6, %v4996_v25, %v9583_v44  ;;  %v6979_v11 = vrot.slane %v2182_v39, 9  ;;  %v4922_v25 = vld [vmem:[#allocation2 + $0x58] sm:$0xf]  ;;  %v8323_v47 = vld [vmem:[#allocation2 + $0xcc] sm:$0xff]  }
 0x17f   : > { %v2341_v21 = vrot.slane %v2339_v32, 4  ;;  %v5034_v50 = vrot.slane %v5033_v34, 4  ;;  %v5044_v3 = vrot.slane %v5043_v53, 4  ;;  %v5057_v30 = vor.u32 %v5056_v42, %v5053_v41  ;;  %v4924_v34 = vld [vmem:[#allocation2 + $0x60] sm:$0xf] }
 0x180   : > { %v5067_v27 = vor.u32 %v5066_v54, %v9602_v43  ;;  %v5015_v18 = vsel %vm8877_vm6, %v5010_v61, %v9581_v38  ;;  %v5025_v44 = vsel %vm8877_vm6, %v5020_v15, %v5024_v0  ;;  %v5048_v28 = vrot.slane %v5046_v7, 5  ;;  %v4923_v15 = vld [vmem:[#allocation2 + $0x5c] sm:$0x1] }
 0x181   : > { %7729 = vmatmul.mubr.msk.bf16.gmra.mrb[16].mxu1 %vm1070_vm3, %v6990_v2  ;;  %v2334_v2 = vrot.slane %v2332_v49, 4  ;;  %v2342_v49 = vrot.slane %v2184_v26, 5  ;;  %v5070_v62 = vshll.u32 %v4920_v1, 16  ;;  %v6980_v51 = vrot.slane %v2185_v33, 9 }
 0x182   : > { %7732 = vmatprep.mubr.msk.bf16.mxu1 %vm1070_vm3, %v6991_v17  ;;  %v2335_v17 = vrot.slane %v2181_v12, 5  ;;  %v2348_v58 = vrot.slane %v2346_v20, 4  ;;  %v2349_v9 = vrot.slane %v2187_v13, 5  ;;  %v5075_v12 = vshrl.u32 %v4921_v31, 16 }
 0x183   : > { %v2343_v8 = vsel %vm8976_vm9, %v2341_v21, %v2342_v49  ;;  %v5078_v14 = vshll.u32 %v4921_v31, 16  ;;  %v5039_v38 = vsel %vm8877_vm6, %v5034_v50, %v9594_v16  ;;  %v5049_v56 = vsel %vm8877_vm6, %v5044_v3, %v5048_v28  ;;  %v4933_v28 = vld [vmem:[#allocation2 + $0x84] sm:$0xf] }
 0x184   : > { %v2336_v36 = vsel %vm8976_vm9, %v2334_v2, %v2335_v17  ;;  %v9640_v57 = vrot.slane %v5057_v30, 4  ;;  %v9642_v22 = vrot.slane %v5067_v27, 4  ;;  %v7158_v19 = vcombine.low %v4991_v63, %v5001_v4  ;;  %v4926_v30 = vld [vmem:[#allocation2 + $0x68] sm:$0x1] }
 0x185   : > { %7873 = vmatmul.mubr.msk.bf16.gmra.mrb[24].mxu0 %vm1070_vm3, %v8321_v29  ;;  %v7159_v48 = vcombine.low %v5015_v18, %v5025_v44  ;;  %v2340_v16 = vsel %vm8976_vm9, %v6979_v11, %v2339_v32  ;;  %v5072_v37 = vrot.slane %v5070_v62, 5  ;;  %v9653_v39 = vsel %vm8976_vm9, %v6980_v51, %v2346_v20  ;;  %v4928_v29 = vld [vmem:[#allocation2 + $0x70] sm:$0xf] }
 0x186   : > { %7876 = vmatprep.mubr.msk.bf16.mxu0 %vm1070_vm3, %v8322_v60  ;;  %v6995_v53 = vcombine.low %v2340_v16, %v2343_v8  ;;  %v9657_v41 = vsel %vm8976_vm9, %v2348_v58, %v2349_v9  ;;  %v5077_v42 = vrot.slane %v5075_v12, 4  ;;  %v5080_v54 = vrot.slane %v5078_v14, 5  ;;  %v4930_v60 = vld [vmem:[#allocation2 + $0x78] sm:$0xf]  ;;  %v4934_v9 = vld [vmem:[#allocation2 + $0x88] sm:$0xf] }
 0x187   : > { %v5084_v32 = vshll.u32 %v4922_v25, 16  ;;  %v5063_v63 = vsel %vm8877_vm6, %v9640_v57, %v9602_v43  ;;  %v5073_v61 = vsel %vm8877_vm6, %v9642_v22, %v5072_v37  ;;  %v5088_v2 = vshrl.u32 %v4922_v25, 16  ;;  %v4929_v12 = vld [vmem:[#allocation2 + $0x74] sm:$0x1]  ;;  %v4936_v37 = vld [vmem:[#allocation2 + $0x90] sm:$0xf] }
 0x188   : > { %v5099_v26 = vshrl.u32 %v4924_v34, 16  ;;  %v6996_v0 = vcombine.low %v9653_v39, %v9657_v41  ;;  %v5108_v7 = vshll.u32 %v4925_v24, 16  ;;  %v5112_v1 = vshrl.u32 %v4925_v24, 16 }
 0x189   : > { %7733 = vmatmul.mubr.msk.bf16.gmra.mrb[20].mxu1 %vm1070_vm3, %v6992_v40  ;;  %v6994_v40 = vcombine.low %v9614_v46, %v2336_v36  ;;  %v5102_v46 = vshll.u32 %v4924_v34, 16  ;;  %v5123_v20 = vshrl.u32 %v4927_v55, 16  ;;  %v5126_v4 = vshll.u32 %v4927_v55, 16 }
 0x18a   : > { %7736 = vmatprep.mubr.msk.bf16.mxu1 %vm1070_vm3, %v6993_v59  ;;  %v9660_v59 = vcombine.low %v5039_v38, %v5049_v56  ;;  %v5132_v17 = vshll.u32 %v4928_v29, 16  ;;  %v5136_v11 = vshrl.u32 %v4928_v29, 16  ;;  %v5081_v43 = vor.u32 %v5080_v54, %v5077_v42  ;;  %v8324_v42 = vld [vmem:[#allocation2 + $0xc] sm:$0xff]  }
 0x18b   : > { %v9673_v21 = vrot.slane %v5084_v32, 5  ;;  %v5094_v33 = vshll.u32 %v4923_v15, 16  ;;  %v5147_v50 = vshrl.u32 %v4930_v60, 16  ;;  %v5090_v3 = vrot.slane %v5088_v2, 4 }
 0x18c   : > { %v5101_v27 = vrot.slane %v5099_v26, 4  ;;  %v5150_v13 = vshll.u32 %v4930_v60, 16  ;;  %v5104_v18 = vrot.slane %v5102_v46, 5  ;;  %v9677_v44 = vrot.slane %v5108_v7, 5 }
 0x18d   : > { %7877 = vmatmul.mubr.msk.bf16.gmra.mrb[28].mxu0 %vm1070_vm3, %v8323_v47  ;;  %v5114_v36 = vrot.slane %v5112_v1, 4  ;;  %v5125_v62 = vrot.slane %v5123_v20, 4  ;;  %v5128_v51 = vrot.slane %v5126_v4, 5  ;;  %v9679_v58 = vrot.slane %v5132_v17, 5 }
 0x18e   : > { %7882 = vmatprep.mubr.msk.bf16.mxu0 %vm1070_vm3, %v9575_v35  ;;  %v4931_v35 = vld [vmem:[#allocation2 + $0x7c] sm:$0xf]  ;;  %v5138_v8 = vrot.slane %v5136_v11, 4  ;;  %v5149_v14 = vrot.slane %v5147_v50, 4  ;;  %v5152_v38 = vrot.slane %v5150_v13, 5  ;;  %v7161_v22 = vcombine.low %v5063_v63, %v5073_v61 }
 0x18f   : > { %v5156_v31 = vshll.u32 %v4931_v35, 16  ;;  %v5160_v49 = vshrl.u32 %v4931_v35, 16  ;;  %v9686_v25 = vrot.slane %v5094_v33, 5  ;;  %v5171_v47 = vshrl.u32 %v4933_v28, 16  ;;  %v4935_v50 = vld [vmem:[#allocation2 + $0x8c] sm:$0x1] }
 0x190   : > { %v9688_v16 = vrot.slane %v5081_v43, 4  ;;  %v5091_v34 = vor.u32 %v5090_v3, %v9673_v21  ;;  %v5105_v39 = vor.u32 %v5104_v18, %v5101_v27  ;;  %v5115_v41 = vor.u32 %v5114_v36, %v9677_v44 }
 0x191   : > { %7737 = vmatmul.mubr.msk.bf16.gmra.mrb[24].mxu1 %vm1070_vm3, %v6994_v40  ;;  %v9682_v56 = vrot.slane %v5156_v31, 5  ;;  %v5162_v57 = vrot.slane %v5160_v49, 4  ;;  %v5174_v40 = vshll.u32 %v4933_v28, 16  ;;  %v5129_v24 = vor.u32 %v5128_v51, %v5125_v62  ;;  %v4939_v28 = vld [vmem:[#allocation2 + $0x9c] sm:$0xf] }
 0x192   : > { %7740 = vmatprep.mubr.msk.bf16.mxu1 %vm1070_vm3, %v6995_v53  ;;  %v5180_v53 = vshll.u32 %v4934_v9, 16  ;;  %v5142_v55 = vshll.u32 %v4929_v12, 16  ;;  %v5153_v54 = vor.u32 %v5152_v38, %v5149_v14  ;;  %v5184_v29 = vshrl.u32 %v4934_v9, 16  ;;  %v8326_v12 = vld [vmem:[#allocation2 + $0x24] sm:$0xff]  }
 0x193   : > { %v5163_v32 = vor.u32 %v5162_v57, %v9682_v56  ;;  %v5173_v63 = vrot.slane %v5171_v47, 4  ;;  %v5176_v61 = vrot.slane %v5174_v40, 5  ;;  %v5195_v15 = vshrl.u32 %v4936_v37, 16 }
 0x194   : > { %v5198_v2 = vshll.u32 %v4936_v37, 16  ;;  %v5087_v26 = vsel %vm8877_vm6, %v9688_v16, %v9673_v21  ;;  %v9700_v46 = vrot.slane %v5180_v53, 5  ;;  %v5186_v7 = vrot.slane %v5184_v29, 4  ;;  %v4940_v16 = vld [vmem:[#allocation2 + $0xa0] sm:$0xf] }
 0x195   : > { %7883 = vmatmul.mubr.msk.bf16.vlgmr.msra.gmra.mrb[0].mxu0 %vm1070_vm3, %v7158_v19  ;;  %v5118_v19 = vshll.u32 %v4926_v30, 16  ;;  %v5092_v1 = vrot.slane %v5091_v34, 4  ;;  %v5106_v35 = vrot.slane %v5105_v39, 4  ;;  %v5116_v20 = vrot.slane %v5115_v41, 4  ;;  %v4938_v30 = vld [vmem:[#allocation2 + $0x98] sm:$0x1] }
 0x196   : > { %7915 = vmatpush3.bf16.msra.mxu0 %v9579_v45  ;;  %7886 = vmatprep.mubr.msk.bf16.mxu0 %vm1070_vm3, %v7159_v48  ;;  %v4932_v45 = vld [vmem:[#allocation2 + $0x80] sm:$0x1]  ;;  %v5139_v48 = vor.u32 %v5138_v8, %v9679_v58  ;;  %v5130_v4 = vrot.slane %v5129_v24, 4  ;;  %v5154_v43 = vrot.slane %v5153_v54, 4  ;;  %v5164_v33 = vrot.slane %v5163_v32, 4  ;;  %v8325_v8 = vld [vmem:[#allocation2 + $0x18] sm:$0xff]  }
 0x197   : > { %v5166_v60 = vshll.u32 %v4932_v45, 16  ;;  %v5120_v17 = vrot.slane %v5118_v19, 5  ;;  %v5144_v21 = vrot.slane %v5142_v55, 5  ;;  %v5177_v3 = vor.u32 %v5176_v61, %v5173_v63  ;;  %v4942_v41 = vld [vmem:[#allocation2 + $0xa8] sm:$0xf] }
 0x198   : > { %v5140_v11 = vrot.slane %v5139_v48, 4  ;;  %v5197_v27 = vrot.slane %v5195_v15, 4  ;;  %v5200_v13 = vrot.slane %v5198_v2, 5  ;;  %v5187_v18 = vor.u32 %v5186_v7, %v9700_v46  ;;  %v9734_v48 = vld [vmem:[#allocation2 + $0xa4] sm:$0x1] }
 0x199   : > { %7741 = vmatmul.mubr.msk.bf16.gmra.mrb[28].mxu1 %vm1070_vm3, %v6996_v0  ;;  %v4937_v0 = vld [vmem:[#allocation2 + $0x94] sm:$0xf]  ;;  %v5168_v31 = vrot.slane %v5166_v60, 5  ;;  %v5111_v62 = vsel %vm8877_vm6, %v5106_v35, %v9677_v44  ;;  %v5121_v51 = vsel %vm8877_vm6, %v5116_v20, %v5120_v17  ;;  %v5135_v9 = vsel %vm8877_vm6, %v5130_v4, %v9679_v58  ;;  %v4943_v32 = vld [vmem:[#allocation2 + $0xac] sm:$0xf]  ;;  %v8328_v20 = vld [vmem:[#allocation2 + $0x3c] sm:$0xff]  }
 0x19a   : > { %7746 = vmatprep.mubr.msk.bf16.mxu1 %vm1070_vm3, %v8324_v42  ;;  %v5204_v36 = vshll.u32 %v4937_v0, 16  ;;  %v5208_v49 = vshrl.u32 %v4937_v0, 16  ;;  %v5145_v14 = vsel %vm8877_vm6, %v5140_v11, %v5144_v21  ;;  %v5159_v38 = vsel %vm8877_vm6, %v5154_v43, %v9682_v56  ;;  %v4945_v61 = vld [vmem:[#allocation2 + $0xb4] sm:$0xf]  ;;  %v4946_v7 = vld [vmem:[#allocation2 + $0xb8] sm:$0xf] }
 0x19b   : > { %v5169_v57 = vsel %vm8877_vm6, %v5164_v33, %v5168_v31  ;;  %v5190_v44 = vshll.u32 %v4935_v50, 16  ;;  %v5201_v47 = vor.u32 %v5200_v13, %v5197_v27  ;;  %v5214_v40 = vshll.u32 %v4938_v30, 16  ;;  %v8327_v35 = vld [vmem:[#allocation2 + $0x30] sm:$0xff]   ;;  %v4949_v21 = vld [vmem:[#allocation2 + $0xc4] sm:$0xf] }
 0x19c   : > { %v5219_v58 = vshrl.u32 %v4939_v28, 16  ;;  %v5188_v19 = vrot.slane %v5187_v18, 4  ;;  %v9728_v53 = vrot.slane %v5204_v36, 5  ;;  %v5210_v56 = vrot.slane %v5208_v49, 4 }
 0x19d   : > { %7887 = vmatmul.mubr.msk.bf16.gmra.mrb[4].mxu0 %vm1070_vm3, %v9660_v59  ;;  %v5097_v59 = vsel %vm8877_vm6, %v5092_v1, %v9686_v25  ;;  %v5178_v25 = vrot.slane %v5177_v3, 4  ;;  %v7163_v37 = vcombine.low %v5111_v62, %v5121_v51  ;;  %v5222_v39 = vshll.u32 %v4939_v28, 16  ;;  %v4948_v1 = vld [vmem:[#allocation2 + $0xc0] sm:$0xf] }
 0x19e   : > { %7890 = vmatprep.mubr.msk.bf16.mxu0 %vm1070_vm3, %v7161_v22  ;;  %v367_v22 = vld [vmem:[%s8710_s12 + $0x1a8] sm:$0x3]  ;;  %v7162_v34 = vcombine.low %v5087_v26, %v5097_v59  ;;  %v7164_v55 = vcombine.low %v5135_v9, %v5145_v14  ;;  %v7165_v45 = vcombine.low %v5159_v38, %v5169_v57  ;;  %v5192_v42 = vrot.slane %v5190_v44, 5  ;;  %s10330_s12 = scalar_lea.sflag [#allocation5], %s293_s30 }
 0x19f   : > { %v9731_v24 = vmul.f32 %v8739_v23, %v367_v22  ;;  %v5228_v54 = vshll.u32 %v4940_v16, 16  ;;  %v9740_v29 = vrot.slane %v5201_v47, 4  ;;  %v9742_v63 = vrot.slane %v5214_v40, 5  ;;  %v4951_v47 = vld [vmem:[#allocation2 + $0xcc] sm:$0xf] }
 0x1a0   : > { %v5221_v23 = vrot.slane %v5219_v58, 4  ;;  %v5193_v15 = vsel %vm8877_vm6, %v5188_v19, %v5192_v42  ;;  %v5211_v2 = vor.u32 %v5210_v56, %v9728_v53  ;;  %v5232_v26 = vshrl.u32 %v4940_v16, 16  ;;  %v4944_v40 = vld [vmem:[#allocation2 + $0xb0] sm:$0x1]  ;;  %v8329_v56 = vld [vmem:[#allocation2 + $0x48] sm:$0xff]  }
 0x1a1   : > { %7747 = vmatmul.mubr.msk.bf16.vlgmr.msra.gmra.mrb[0].mxu1 %vm1070_vm3, %v8325_v8  ;;  %v5243_v60 = vshrl.u32 %v4942_v41, 16  ;;  %v5224_v4 = vrot.slane %v5222_v39, 5  ;;  %v5246_v0 = vshll.u32 %v4942_v41, 16  ;;  %v5256_v17 = vshrl.u32 %v4943_v32, 16  ;;  %v485_v8 = vld [vmem:[%s8719_s16 + $0x1a8] sm:$0x3] }
 0x1a2   : > { %7750 = vmatprep.mubr.msk.bf16.mxu1 %vm1070_vm3, %v8326_v12  ;;  %7949 = vmatpush3.bf16.msra.mxu1 %v8694_v6  ;;  %v5183_v6 = vsel %vm8877_vm6, %v5178_v25, %v9700_v46  ;;  %v5252_v46 = vshll.u32 %v4943_v32, 16  ;;  %v9747_v11 = vrot.slane %v5228_v54, 5  ;;  %v5238_v43 = vshll.u32 %v9734_v48, 16  ;;  %s8470_s16 = scalar_lea.vmem %s10324_s20, 2048 }
 0x1a3   : > { %v5267_v33 = vshrl.u32 %v4945_v61, 16  ;;  %v5270_v50 = vshll.u32 %v4945_v61, 16  ;;  %v7166_v3 = vcombine.low %v5183_v6, %v5193_v15  ;;  %v5276_v30 = vshll.u32 %v4946_v7, 16  ;;  %p8471_p0 = scmp.ne.s32.totalorder %s10324_s20, %s8470_s16  ;;  %p8478_p5 = scmp.lt.s32.totalorder %s8476_s17, %s8470_s16 }
 0x1a4   : > { %v5280_v27 = vshrl.u32 %v4946_v7, 16  ;;  %v5291_v13 = vshrl.u32 %v4948_v1, 16  ;;  %v5212_v31 = vrot.slane %v5211_v2, 4  ;;  %v5234_v18 = vrot.slane %v5232_v26, 4 }
 0x1a5   : > { %7891 = vmatmul.mubr.msk.bf16.gmra.mrb[8].mxu0 %vm1070_vm3, %v7162_v34  ;;  %v5245_v36 = vrot.slane %v5243_v60, 4  ;;  %v5294_v49 = vshll.u32 %v4948_v1, 16  ;;  %v5248_v28 = vrot.slane %v5246_v0, 5  ;;  %v9752_v59 = vrot.slane %v5252_v46, 5  ;;  %v4952_v60 = vld [vmem:[#allocation2 + $0xd0] sm:$0xf]  ;;  %p8472_p1 = pnand %p8471_p0, %p8656_p3  ;;  %p8479_p6 = por %p8478_p5, %p8477_p4 }
 0x1a6   : > { %7894 = vmatprep.mubr.msk.bf16.mxu0 %vm1070_vm3, %v7163_v37  ;;  %v5258_v62 = vrot.slane %v5256_v17, 4  ;;  %v5300_v51 = vshll.u32 %v4949_v21, 16  ;;  %v5207_v9 = vsel %vm8877_vm6, %v9740_v29, %v9728_v53  ;;  %v5269_v12 = vrot.slane %v5267_v33, 4 }
 0x1a7   : > { %v5272_v14 = vrot.slane %v5270_v50, 5  ;;  %v5304_v38 = vshrl.u32 %v4949_v21, 16  ;;  %v5225_v57 = vor.u32 %v5224_v4, %v5221_v23  ;;  %v9761_v44 = vrot.slane %v5276_v30, 5  ;;  %v4950_v23 = vld [vmem:[#allocation2 + $0xc8] sm:$0x1]  ;;  %p8473_p2 = pneg %p8472_p1 }
 0x1a8   : > { %v5282_v22 = vrot.slane %v5280_v27, 4  ;;  %v5293_v25 = vrot.slane %v5291_v13, 4  ;;  %v5296_v16 = vrot.slane %v5294_v49, 5  ;;  %v9763_v58 = vrot.slane %v5300_v51, 5  ;;  %v5696_v21 = vld [vmem:[#allocation2 + $0x1c] sm:$0xf] }
 0x1a9   : > { %7751 = vmatmul.mubr.msk.bf16.gmra.mrb[4].mxu1 %vm1070_vm3, %v8327_v35  ;;  %v5306_v34 = vrot.slane %v5304_v38, 4  ;;  %v548_v19 = vmul.f32 %v8779_v52, %v485_v8  ;;  %v5217_v53 = vsel %vm8877_vm6, %v5212_v31, %v9742_v63  ;;  %v5235_v37 = vor.u32 %v5234_v18, %v9747_v11  ;;  %v8331_v49 = vld [vmem:[#allocation2 + $0x60] sm:$0xff]   ;;  %v8332_v51 = vld [vmem:[#allocation2 + $0x6c] sm:$0xff]   ;;  %p8480_p7 = pnand %p8479_p6, %p8473_p2 }
 0x1aa   : > { %7754 = vmatprep.mubr.msk.bf16.mxu1 %vm1070_vm3, %v8328_v20  ;;  %v5249_v39 = vor.u32 %v5248_v28, %v5245_v36  ;;  %v5259_v41 = vor.u32 %v5258_v62, %v9752_v59  ;;  %v5273_v42 = vor.u32 %v5272_v14, %v5269_v12  ;;  %v5315_v54 = vshrl.u32 %v4951_v47, 16  ;;  %v5695_v62 = vld [vmem:[#allocation2 + $0x18] sm:$0xe]  ;;  %v5698_v14 = vld [vmem:[#allocation2 + $0x24] sm:$0xe] }
 0x1ab   : > { %v602_v48 = vadd.f32 %v548_v19, %v9731_v24  ;;  %v5318_v32 = vshll.u32 %v4951_v47, 16  ;;  %v5226_v52 = vrot.slane %v5225_v57, 4  ;;  %v5240_v6 = vrot.slane %v5238_v43, 5  ;;  %v5702_v19 = vld [vmem:[#allocation2 + $0x34] sm:$0xf] }
 0x1ac   : > { %v5262_v29 = vshll.u32 %v4944_v40, 16  ;;  %v5283_v63 = vor.u32 %v5282_v22, %v9761_v44  ;;  %v7167_v61 = vcombine.low %v5207_v9, %v5217_v53  ;;  %v5297_v15 = vor.u32 %v5296_v16, %v5293_v25  ;;  %v5697_v22 = vld [vmem:[#allocation2 + $0x20] sm:$0x1] }
 0x1ad   : > { %7895 = vmatmul.mubr.msk.bf16.gmra.mrb[12].mxu0 %vm1070_vm3, %v7164_v55  ;;  %v8330_v55 = vld [vmem:[#allocation2 + $0x54] sm:$0xff]   ;;  %v5307_v2 = vor.u32 %v5306_v34, %v9763_v58  ;;  %v7361_v26 = vpack.c.bf16 %v602_v48, %v602_v48  ;;  %v5236_v7 = vrot.slane %v5235_v37, 4  ;;  %v5250_v24 = vrot.slane %v5249_v39, 4  ;;  %v5700_v34 = vld [vmem:[#allocation2 + $0x2c] sm:$0x1] }
 0x1ae   : > { %7898 = vmatprep.mubr.msk.bf16.mxu0 %vm1070_vm3, %v7165_v45  ;;  %v4947_v45 = vld [vmem:[#allocation2 + $0xbc] sm:$0x1]  ;;  %v5260_v1 = vrot.slane %v5259_v41, 4  ;;  %v5274_v20 = vrot.slane %v5273_v42, 4  ;;  %v5310_v4 = vshll.u32 %v4950_v23, 16  ;;  %v5317_v0 = vrot.slane %v5315_v54, 4 }
 0x1af   : > { %v5286_v35 = vshll.u32 %v4947_v45, 16  ;;  %892 = vst.msk [vmem:[#allocation2 + $0xd4] sm:$0x1] %vm840_vm2, %v7361_v26  ;;  %v5320_v46 = vrot.slane %v5318_v32, 5  ;;  %v5264_v17 = vrot.slane %v5262_v29, 5  ;;  %v5284_v43 = vrot.slane %v5283_v63, 4 }
 0x1b0   : > { %v5324_v33 = vshll.u32 %v4952_v60, 16  ;;  %v5328_v50 = vshrl.u32 %v4952_v60, 16  ;;  %v5231_v30 = vsel %vm8877_vm6, %v5226_v52, %v9747_v11  ;;  %v5298_v27 = vrot.slane %v5297_v15, 4  ;;  %v9803_v37 = vld [vmem:[#allocation2 + $0x40] sm:$0xf]  ;;  %v8333_v63 = vld [vmem:[#allocation2 + $0x78] sm:$0xff]  }
 0x1b1   : > { %7755 = vmatmul.mubr.msk.bf16.gmra.mrb[8].mxu1 %vm1070_vm3, %v8329_v56  ;;  %v5308_v13 = vrot.slane %v5307_v2, 4  ;;  %v5241_v31 = vsel %vm8877_vm6, %v5236_v7, %v5240_v6  ;;  %v5255_v18 = vsel %vm8877_vm6, %v5250_v24, %v9752_v59  ;;  %v5265_v36 = vsel %vm8877_vm6, %v5260_v1, %v5264_v17  ;;  %v3154_v39 = vld [vmem:[#allocation2 + $0x6c] sm:$0xf]  ;;  %v3155_v48 = vld [vmem:[#allocation2 + $0x70] sm:$0xf]  ;;  %v8334_v60 = vld [vmem:[#allocation2 + $0x84] sm:$0xff]  }
 0x1b2   : > { %7758 = vmatprep.mubr.msk.bf16.mxu1 %vm1070_vm3, %v8330_v55  ;;  %v5288_v28 = vrot.slane %v5286_v35, 5  ;;  %v5279_v11 = vsel %vm8877_vm6, %v5274_v20, %v9761_v44  ;;  %v5312_v8 = vrot.slane %v5310_v4, 5  ;;  %v5321_v9 = vor.u32 %v5320_v46, %v5317_v0  ;;  %v5701_v52 = vld [vmem:[#allocation2 + $0x30] sm:$0xe]  ;;  %v9810_v29 = vld [vmem:[#allocation2 + $0x4c] sm:$0xf] }
 0x1b3   : > { %v5793_v12 = vrot.slane %v5696_v21, 5  ;;  %v9795_v38 = vrot.slane %v5324_v33, 5  ;;  %v5330_v57 = vrot.slane %v5328_v50, 4  ;;  %v7168_v47 = vcombine.low %v5231_v30, %v5241_v31  ;;  %v5704_v1 = vld [vmem:[#allocation2 + $0x3c] sm:$0xe] }
 0x1b4   : > { %v5289_v59 = vsel %vm8877_vm6, %v5284_v43, %v5288_v28  ;;  %v5303_v44 = vsel %vm8877_vm6, %v5298_v27, %v9763_v58  ;;  %v5313_v40 = vsel %vm8877_vm6, %v5308_v13, %v5312_v8  ;;  %v7189_v16 = vrot.slane %v5695_v62, 9  ;;  %v5703_v46 = vld [vmem:[#allocation2 + $0x38] sm:$0x1]  ;;  %v5706_v43 = vld [vmem:[#allocation2 + $0x44] sm:$0x1] }
 0x1b5   : > { %7899 = vmatmul.mubr.msk.bf16.gmra.mrb[16].mxu0 %vm1070_vm3, %v7166_v3  ;;  %v5699_v3 = vld [vmem:[#allocation2 + $0x28] sm:$0xf]  ;;  %v7169_v53 = vcombine.low %v5255_v18, %v5265_v36  ;;  %v7190_v56 = vrot.slane %v5698_v14, 9  ;;  %v7170_v41 = vcombine.low %v5279_v11, %v5289_v59  ;;  %v9806_v55 = vrot.slane %v5321_v9, 4  ;;  %v5709_v18 = vld [vmem:[#allocation2 + $0x50] sm:$0x1] }
 0x1b6   : > { %7902 = vmatprep.mubr.msk.bf16.mxu0 %vm1070_vm3, %v7167_v61  ;;  %v5800_v25 = vrot.slane %v5699_v3, 5  ;;  %v5795_v45 = vrot.slane %v5793_v12, 4  ;;  %v5796_v42 = vrot.slane %v5697_v22, 5  ;;  %v7171_v58 = vcombine.low %v5303_v44, %v5313_v40  ;;  %v4953_v23 = vld [vmem:[#allocation2 + $0xd4] sm:$0x1] }
 0x1b7   : > { %v5331_v54 = vor.u32 %v5330_v57, %v9795_v38  ;;  %v5807_v6 = vrot.slane %v5702_v19, 5  ;;  %v9814_v61 = vsel %vm8976_vm9, %v7189_v16, %v5793_v12  ;;  %v5814_v15 = vrot.slane %v9803_v37, 5  ;;  %v9835_v13 = vld [vmem:[#allocation2 + $0x48] sm:$0xe]  ;;  %v3157_v57 = vld [vmem:[#allocation2 + $0x78] sm:$0xf] }
 0x1b8   : > { %v5802_v32 = vrot.slane %v5800_v25, 4  ;;  %v3371_v2 = vshrl.u32 %v3154_v39, 16  ;;  %v3374_v26 = vshll.u32 %v3154_v39, 16  ;;  %v9819_v7 = vsel %vm8976_vm9, %v7190_v56, %v5800_v25  ;;  %v3158_v40 = vld [vmem:[#allocation2 + $0x7c] sm:$0xf] }
 0x1b9   : > { %7759 = vmatmul.mubr.msk.bf16.gmra.mrb[12].mxu1 %vm1070_vm3, %v8331_v49  ;;  %v5803_v24 = vrot.slane %v5700_v34, 5  ;;  %v3380_v35 = vshll.u32 %v3155_v48, 16  ;;  %v3384_v20 = vshrl.u32 %v3155_v48, 16  ;;  %v5327_v4 = vsel %vm8877_vm6, %v9806_v55, %v9795_v38  ;;  %v9851_v38 = vld [vmem:[#allocation2 + $0x58] sm:$0xf] }
 0x1ba   : > { %7762 = vmatprep.mubr.msk.bf16.mxu1 %vm1070_vm3, %v8332_v51  ;;  %v9827_v0 = vsel %vm8976_vm9, %v5795_v45, %v5796_v42  ;;  %v7191_v17 = vrot.slane %v5701_v52, 9  ;;  %v5821_v33 = vrot.slane %v9810_v29, 5  ;;  %v5332_v50 = vrot.slane %v5331_v54, 4  ;;  %v3156_v51 = vld [vmem:[#allocation2 + $0x74] sm:$0x1] }
 0x1bb   : > { %v5334_v21 = vshll.u32 %v4953_v23, 16  ;;  %v9833_v30 = vsel %vm8976_vm9, %v5802_v32, %v5803_v24  ;;  %v5809_v27 = vrot.slane %v5807_v6, 4  ;;  %v7192_v3 = vrot.slane %v5704_v1, 9  ;;  %v3160_v56 = vld [vmem:[#allocation2 + $0x84] sm:$0xf] }
 0x1bc   : > { %v5816_v31 = vrot.slane %v5814_v15, 4  ;;  %v3373_v36 = vrot.slane %v3371_v2, 4  ;;  %v3376_v49 = vrot.slane %v3374_v26, 5  ;;  %v7205_v28 = vcombine.low %v9814_v61, %v9827_v0  ;;  %v3161_v37 = vld [vmem:[#allocation2 + $0x88] sm:$0xf] }
 0x1bd   : > { %7903 = vmatmul.mubr.msk.bf16.gmra.mrb[20].mxu0 %vm1070_vm3, %v7168_v47  ;;  %v5810_v62 = vrot.slane %v5703_v46, 5  ;;  %v9840_v11 = vrot.slane %v3380_v35, 5  ;;  %v3386_v8 = vrot.slane %v3384_v20, 4  ;;  %v7206_v9 = vcombine.low %v9819_v7, %v9833_v30  ;;  %v5710_v45 = vld [vmem:[#allocation2 + $0x54] sm:$0xe]  ;;  %v8339_v30 = vld [vmem:[#allocation2 + $0xc0] sm:$0xff]  }
 0x1be   : > { %7906 = vmatprep.mubr.msk.bf16.mxu0 %vm1070_vm3, %v7169_v53  ;;  %v9847_v12 = vsel %vm8976_vm9, %v7191_v17, %v5807_v6  ;;  %v5817_v14 = vrot.slane %v5706_v43, 5  ;;  %v5823_v59 = vrot.slane %v5821_v33, 4  ;;  %v5336_v22 = vrot.slane %v5334_v21, 5  ;;  %v5714_v52 = vld [vmem:[#allocation2 + $0x64] sm:$0xf] }
 0x1bf   : > { %v9856_v25 = vsel %vm8976_vm9, %v5809_v27, %v5810_v62  ;;  %v7193_v47 = vrot.slane %v9835_v13, 9  ;;  %v5824_v44 = vrot.slane %v5709_v18, 5  ;;  %v9861_v16 = vsel %vm8976_vm9, %v7192_v3, %v5814_v15  ;;  %v5713_v23 = vld [vmem:[#allocation2 + $0x60] sm:$0xe]  ;;  %v5712_v0 = vld [vmem:[#allocation2 + $0x5c] sm:$0x1] }
 0x1c0   : > { %v9865_v34 = vsel %vm8976_vm9, %v5816_v31, %v5817_v14  ;;  %v3377_v19 = vor.u32 %v3376_v49, %v3373_v36  ;;  %v3390_v53 = vshll.u32 %v3156_v51, 16  ;;  %v5337_v39 = vsel %vm8877_vm6, %v5332_v50, %v5336_v22  ;;  %v3164_v22 = vld [vmem:[#allocation2 + $0x94] sm:$0xf] }
 0x1c1   : > { %7763 = vmatmul.mubr.msk.bf16.gmra.mrb[16].mxu1 %vm1070_vm3, %v8333_v63  ;;  %v3387_v55 = vor.u32 %v3386_v8, %v9840_v11  ;;  %v3395_v42 = vshrl.u32 %v3157_v57, 16  ;;  %v3398_v48 = vshll.u32 %v3157_v57, 16  ;;  %v9872_v54 = vsel %vm8976_vm9, %v5823_v59, %v5824_v44  ;;  %v3163_v57 = vld [vmem:[#allocation2 + $0x90] sm:$0xf]  ;;  %v3159_v44 = vld [vmem:[#allocation2 + $0x80] sm:$0x1] }
 0x1c2   : > { %7766 = vmatprep.mubr.msk.bf16.mxu1 %vm1070_vm3, %v8334_v60  ;;  %v5828_v32 = vrot.slane %v9851_v38, 5  ;;  %v3404_v6 = vshll.u32 %v3158_v40, 16  ;;  %v3408_v63 = vshrl.u32 %v3158_v40, 16  ;;  %v3419_v61 = vshrl.u32 %v3160_v56, 16 }
 0x1c3   : > { %v3422_v15 = vshll.u32 %v3160_v56, 16  ;;  %v3428_v2 = vshll.u32 %v3161_v37, 16  ;;  %v3432_v26 = vshrl.u32 %v3161_v37, 16  ;;  %v7172_v60 = vcombine.low %v5327_v4, %v5337_v39  ;;  %v5715_v4 = vld [vmem:[#allocation2 + $0x68] sm:$0x1] }
 0x1c4   : > { %v3378_v24 = vrot.slane %v3377_v19, 4  ;;  %v3392_v1 = vrot.slane %v3390_v53, 5  ;;  %v7194_v35 = vrot.slane %v5710_v45, 9  ;;  %v3388_v20 = vrot.slane %v3387_v55, 4  ;;  %v3166_v39 = vld [vmem:[#allocation2 + $0x9c] sm:$0xf] }
 0x1c5   : > { %7907 = vmatmul.mubr.msk.bf16.gmra.mrb[24].mxu0 %vm1070_vm3, %v7170_v41  ;;  %v8335_v41 = vld [vmem:[#allocation2 + $0x90] sm:$0xff]   ;;  %v5835_v46 = vrot.slane %v5714_v52, 5  ;;  %v3397_v17 = vrot.slane %v3395_v42, 4  ;;  %v3400_v43 = vrot.slane %v3398_v48, 5  ;;  %v5830_v50 = vrot.slane %v5828_v32, 4 }
 0x1c6   : > { %7910 = vmatprep.mubr.msk.bf16.mxu0 %vm1070_vm3, %v7171_v58  ;;  %v8336_v58 = vld [vmem:[#allocation2 + $0x9c] sm:$0xff]   ;;  %v7195_v21 = vrot.slane %v5713_v23, 9  ;;  %v9878_v27 = vrot.slane %v3404_v6, 5  ;;  %v3410_v13 = vrot.slane %v3408_v63, 4  ;;  %v3421_v3 = vrot.slane %v3419_v61, 4 }
 0x1c7   : > { %v3424_v31 = vrot.slane %v3422_v15, 5  ;;  %v9881_v18 = vrot.slane %v3428_v2, 5  ;;  %v3434_v36 = vrot.slane %v3432_v26, 4  ;;  %v7207_v49 = vcombine.low %v9847_v12, %v9856_v25  ;;  %v8338_v25 = vld [vmem:[#allocation2 + $0xb4] sm:$0xff]   ;;  %v3167_v48 = vld [vmem:[#allocation2 + $0xa0] sm:$0xf] }
 0x1c8   : > { %v7208_v62 = vcombine.low %v9861_v16, %v9865_v34  ;;  %v9891_v51 = vsel %vm8976_vm9, %v7193_v47, %v5821_v33  ;;  %v5831_v8 = vrot.slane %v5712_v0, 5  ;;  %v3383_v14 = vsel %vm8877_vm6, %v3378_v24, %v9840_v11  ;;  %v3162_v11 = vld [vmem:[#allocation2 + $0x8c] sm:$0x1]  ;;  %v5716_v23 = vld [vmem:[#allocation2 + $0x6c] sm:$0xe] }
 0x1c9   : > { %7767 = vmatmul.mubr.msk.bf16.gmra.mrb[20].mxu1 %vm1070_vm3, %v8335_v41  ;;  %v3393_v59 = vsel %vm8877_vm6, %v3388_v20, %v3392_v1  ;;  %v5837_v38 = vrot.slane %v5835_v46, 4  ;;  %v3401_v12 = vor.u32 %v3400_v43, %v3397_v17  ;;  %v7209_v29 = vcombine.low %v9891_v51, %v9872_v54  ;;  %v5717_v24 = vld [vmem:[#allocation2 + $0x70] sm:$0xf]  ;;  %v9925_v20 = vld [vmem:[#allocation2 + $0x74] sm:$0x1] }
 0x1ca   : > { %7770 = vmatprep.mubr.msk.bf16.mxu1 %vm1070_vm3, %v8336_v58  ;;  %v9902_v33 = vsel %vm8976_vm9, %v7194_v35, %v5828_v32  ;;  %v5838_v47 = vrot.slane %v5715_v4, 5  ;;  %v3411_v40 = vor.u32 %v3410_v13, %v9878_v27  ;;  %v9908_v19 = vsel %vm8976_vm9, %v5830_v50, %v5831_v8  ;;  %v9931_v50 = vld [vmem:[#allocation2 + $0x78] sm:$0xe]  ;;  %v9940_v8 = vld [vmem:[#allocation2 + $0x80] sm:$0x1] }
 0x1cb   : > { %v9912_v53 = vsel %vm8976_vm9, %v7195_v21, %v5835_v46  ;;  %v3425_v56 = vor.u32 %v3424_v31, %v3421_v3  ;;  %v3435_v37 = vor.u32 %v3434_v36, %v9881_v18  ;;  %v7053_v41 = vcombine.low %v3383_v14, %v3393_v59  ;;  %v3173_v34 = vld [vmem:[#allocation2 + $0xb8] sm:$0xf] }
 0x1cc   : > { %v3443_v55 = vshrl.u32 %v3163_v57, 16  ;;  %v3446_v45 = vshll.u32 %v3163_v57, 16  ;;  %v3452_v42 = vshll.u32 %v3164_v22, 16  ;;  %v9918_v58 = vsel %vm8976_vm9, %v5837_v38, %v5838_v47 }
 0x1cd   : > { %7911 = vmatmul.mubr.msk.bf16.gmra.mrb[28].mxu0 %vm1070_vm3, %v7172_v60  ;;  %v3402_v32 = vrot.slane %v3401_v12, 4  ;;  %v3414_v52 = vshll.u32 %v3159_v44, 16  ;;  %v3438_v6 = vshll.u32 %v3162_v11, 16  ;;  %v3412_v63 = vrot.slane %v3411_v40, 4  ;;  %v3169_v12 = vld [vmem:[#allocation2 + $0xa8] sm:$0xf] }
 0x1ce   : > { %7916 = vmatprep.mubr.msk.bf16.mxu0 %vm1070_vm3, %v7205_v28  ;;  %v8337_v28 = vld [vmem:[#allocation2 + $0xa8] sm:$0xff]   ;;  %v3456_v61 = vshrl.u32 %v3164_v22, 16  ;;  %v3467_v15 = vshrl.u32 %v3166_v39, 16  ;;  %v3470_v2 = vshll.u32 %v3166_v39, 16  ;;  %v3426_v26 = vrot.slane %v3425_v56, 4 }
 0x1cf   : > { %v3436_v60 = vrot.slane %v3435_v37, 4  ;;  %v3476_v1 = vshll.u32 %v3167_v48, 16  ;;  %v3480_v35 = vshrl.u32 %v3167_v48, 16  ;;  %v3445_v0 = vrot.slane %v3443_v55, 4  ;;  %v3165_v22 = vld [vmem:[#allocation2 + $0x98] sm:$0x1] }
 0x1d0   : > { %v3448_v46 = vrot.slane %v3446_v45, 5  ;;  %v9927_v17 = vrot.slane %v3452_v42, 5  ;;  %v3458_v7 = vrot.slane %v3456_v61, 4  ;;  %v3416_v43 = vrot.slane %v3414_v52, 5  ;;  %v3168_v44 = vld [vmem:[#allocation2 + $0xa4] sm:$0x1] }
 0x1d1   : > { %7771 = vmatmul.mubr.msk.bf16.gmra.mrb[24].mxu1 %vm1070_vm3, %v8337_v28  ;;  %v3469_v21 = vrot.slane %v3467_v15, 4  ;;  %v3472_v13 = vrot.slane %v3470_v2, 5  ;;  %v7211_v4 = vcombine.low %v9912_v53, %v9918_v58  ;;  %v3407_v3 = vsel %vm8877_vm6, %v3402_v32, %v9878_v27  ;;  %v3170_v39 = vld [vmem:[#allocation2 + $0xac] sm:$0xf]  ;;  %v3172_v42 = vld [vmem:[#allocation2 + $0xb4] sm:$0xf] }
 0x1d2   : > { %7774 = vmatprep.mubr.msk.bf16.mxu1 %vm1070_vm3, %v8338_v25  ;;  %v3440_v31 = vrot.slane %v3438_v6, 5  ;;  %v7196_v36 = vrot.slane %v5716_v23, 9  ;;  %v3417_v28 = vsel %vm8877_vm6, %v3412_v63, %v3416_v43  ;;  %v5842_v14 = vrot.slane %v5717_v24, 5 }
 0x1d3   : > { %v9945_v59 = vrot.slane %v3476_v1, 5  ;;  %v3482_v38 = vrot.slane %v3480_v35, 4  ;;  %v3431_v27 = vsel %vm8877_vm6, %v3426_v26, %v9881_v18  ;;  %v3449_v25 = vor.u32 %v3448_v46, %v3445_v0  ;;  %v9972_v35 = vld [vmem:[#allocation2 + $0x88] sm:$0xf] }
 0x1d4   : > { %v3441_v57 = vsel %vm8877_vm6, %v3436_v60, %v3440_v31  ;;  %v3459_v47 = vor.u32 %v3458_v7, %v9927_v17  ;;  %v5845_v40 = vrot.slane %v9925_v20, 5  ;;  %v7197_v11 = vrot.slane %v9931_v50, 9 }
 0x1d5   : > { %7917 = vmatmul.mubr.msk.bf16.vlgmr.msra.gmra.mrb[0].mxu0 %vm1070_vm3, %v7206_v9  ;;  %v7210_v9 = vcombine.low %v9902_v33, %v9908_v19  ;;  %v3473_v37 = vor.u32 %v3472_v13, %v3469_v21  ;;  %v7054_v18 = vcombine.low %v3407_v3, %v3417_v28  ;;  %v3491_v55 = vshrl.u32 %v3169_v12, 16  ;;  %v9982_v3 = vld [vmem:[#allocation2 + $0x94] sm:$0xf] }
 0x1d6   : > { %7920 = vmatprep.mubr.msk.bf16.mxu0 %vm1070_vm3, %v7207_v49  ;;  %v9938_v49 = vld [vmem:[#allocation2 + $0x7c] sm:$0xf]  ;;  %v3494_v45 = vshll.u32 %v3169_v12, 16  ;;  %v7055_v48 = vcombine.low %v3431_v27, %v3441_v57  ;;  %v9968_v32 = vsel %vm8976_vm9, %v7196_v36, %v5842_v14  ;;  %v5844_v52 = vrot.slane %v5842_v14, 4 }
 0x1d7   : > { %v5849_v56 = vrot.slane %v9938_v49, 5  ;;  %v3483_v16 = vor.u32 %v3482_v38, %v9945_v59  ;;  %v3460_v6 = vrot.slane %v3459_v47, 4  ;;  %v3462_v63 = vshll.u32 %v3165_v22, 16  ;;  %v3174_v14 = vld [vmem:[#allocation2 + $0xbc] sm:$0x1] }
 0x1d8   : > { %v3486_v23 = vshll.u32 %v3168_v44, 16  ;;  %v3474_v61 = vrot.slane %v3473_v37, 4  ;;  %v3500_v15 = vshll.u32 %v3170_v39, 16  ;;  %v3504_v2 = vshrl.u32 %v3170_v39, 16  ;;  %v3175_v38 = vld [vmem:[#allocation2 + $0xc0] sm:$0xf] }
 0x1d9   : > { %7775 = vmatmul.mubr.msk.bf16.gmra.mrb[28].mxu1 %vm1070_vm3, %v8339_v30  ;;  %v3515_v26 = vshrl.u32 %v3172_v42, 16  ;;  %v3493_v54 = vrot.slane %v3491_v55, 4  ;;  %v3496_v51 = vrot.slane %v3494_v45, 5  ;;  %v3524_v60 = vshll.u32 %v3173_v34, 16  ;;  %v3171_v30 = vld [vmem:[#allocation2 + $0xb0] sm:$0x1] }
 0x1da   : > { %7796 = vmatprep.mubr.msk.bf16.mxu1 %vm1070_vm3, %v7053_v41  ;;  %v5852_v41 = vrot.slane %v9940_v8, 5  ;;  %v5851_v24 = vrot.slane %v5849_v56, 4  ;;  %v3484_v1 = vrot.slane %v3483_v16, 4  ;;  %v9974_v20 = vrot.slane %v3500_v15, 5  ;;  %v5722_v37 = vld [vmem:[#allocation2 + $0x84] sm:$0xe] }
 0x1db   : > { %v3506_v0 = vrot.slane %v3504_v2, 4  ;;  %v5846_v46 = vsel %vm8976_vm9, %v5844_v52, %v5845_v40  ;;  %v3464_v7 = vrot.slane %v3462_v63, 5  ;;  %v3517_v43 = vrot.slane %v3515_v26, 4  ;;  %v5724_v39 = vld [vmem:[#allocation2 + $0x8c] sm:$0x1] }
 0x1dc   : > { %v3488_v13 = vrot.slane %v3486_v23, 5  ;;  %v9984_v31 = vrot.slane %v3524_v60, 5  ;;  %v3528_v36 = vshrl.u32 %v3173_v34, 16  ;;  %v3479_v8 = vsel %vm8877_vm6, %v3474_v61, %v9945_v59  ;;  %v3177_v61 = vld [vmem:[#allocation2 + $0xc8] sm:$0x1] }
 0x1dd   : > { %7921 = vmatmul.mubr.msk.bf16.gmra.mrb[4].mxu0 %vm1070_vm3, %v7208_v62  ;;  %v3450_v62 = vrot.slane %v3449_v25, 4  ;;  %v3465_v49 = vsel %vm8877_vm6, %v3460_v6, %v3464_v7  ;;  %v3497_v28 = vor.u32 %v3496_v51, %v3493_v54  ;;  %v3510_v19 = vshll.u32 %v3171_v30, 16  ;;  %v5729_v26 = vld [vmem:[#allocation2 + $0xa0] sm:$0xf] }
 0x1de   : > { %7924 = vmatprep.mubr.msk.bf16.mxu0 %vm1070_vm3, %v7209_v29  ;;  %v3518_v29 = vshll.u32 %v3172_v42, 16  ;;  %v3489_v33 = vsel %vm8877_vm6, %v3484_v1, %v3488_v13  ;;  %v3530_v12 = vrot.slane %v3528_v36, 4  ;;  %v5850_v27 = vsel %vm8976_vm9, %v7197_v11, %v5849_v56  ;;  %v5732_v1 = vld [vmem:[#allocation2 + $0xac] sm:$0xf] }
 0x1df   : > { %v3455_v21 = vsel %vm8877_vm6, %v3450_v62, %v9927_v17  ;;  %v3507_v17 = vor.u32 %v3506_v0, %v9974_v20  ;;  %v5853_v59 = vsel %vm8976_vm9, %v5851_v24, %v5852_v41  ;;  %v5856_v57 = vrot.slane %v9972_v35, 5  ;;  %v5725_v41 = vld [vmem:[#allocation2 + $0x90] sm:$0xe] }
 0x1e0   : > { %v3520_v50 = vrot.slane %v3518_v29, 5  ;;  %v5863_v22 = vrot.slane %v9982_v3, 5  ;;  %v7056_v25 = vcombine.low %v3455_v21, %v3465_v49  ;;  %v3531_v53 = vor.u32 %v3530_v12, %v9984_v31  ;;  %v5731_v12 = vld [vmem:[#allocation2 + $0xa8] sm:$0xe] }
 0x1e1   : > { %7797 = vmatmul.mubr.msk.bf16.vlgmr.msra.gmra.mrb[16].mxu1 %vm1070_vm3, %v7054_v18  ;;  %v3534_v58 = vshll.u32 %v3174_v14, 16  ;;  %v3539_v47 = vshrl.u32 %v3175_v38, 16  ;;  %v7212_v44 = vcombine.low %v9968_v32, %v5846_v46  ;;  %v7057_v40 = vcombine.low %v3479_v8, %v3489_v33  ;;  %v5728_v14 = vld [vmem:[#allocation2 + $0x9c] sm:$0xe] }
 0x1e2   : > { %7800 = vmatprep.mubr.msk.bf16.mxu1 %vm1070_vm3, %v7055_v48  ;;  %v3498_v18 = vrot.slane %v3497_v28, 4  ;;  %v3508_v11 = vrot.slane %v3507_v17, 4  ;;  %v7213_v56 = vcombine.low %v5850_v27, %v5853_v59  ;;  %v3512_v55 = vrot.slane %v3510_v19, 5  ;;  %v5727_v48 = vld [vmem:[#allocation2 + $0x98] sm:$0x1] }
 0x1e3   : > { %v3532_v42 = vrot.slane %v3531_v53, 4  ;;  %v3541_v52 = vrot.slane %v3539_v47, 4  ;;  %v3542_v16 = vshll.u32 %v3175_v38, 16  ;;  %v7198_v32 = vrot.slane %v5722_v37, 9  ;;  %v5730_v38 = vld [vmem:[#allocation2 + $0xa4] sm:$0x1] }
 0x1e4   : > { %v5858_v6 = vrot.slane %v5856_v57, 4  ;;  %v5865_v63 = vrot.slane %v5863_v22, 4  ;;  %v3536_v23 = vrot.slane %v3534_v58, 5  ;;  %v3503_v15 = vsel %vm8877_vm6, %v3498_v18, %v9974_v20  ;;  %v5733_v27 = vld [vmem:[#allocation2 + $0xb0] sm:$0x1] }
 0x1e5   : > { %7925 = vmatmul.mubr.msk.bf16.gmra.mrb[8].mxu0 %vm1070_vm3, %v7210_v9  ;;  %v3521_v9 = vor.u32 %v3520_v50, %v3517_v43  ;;  %v3513_v2 = vsel %vm8877_vm6, %v3508_v11, %v3512_v55  ;;  %v3544_v54 = vrot.slane %v3542_v16, 5  ;;  %v5859_v29 = vrot.slane %v5724_v39, 5  ;;  %v5735_v53 = vld [vmem:[#allocation2 + $0xb8] sm:$0xf]  ;;  %v5734_v55 = vld [vmem:[#allocation2 + $0xb4] sm:$0xe] }
 0x1e6   : > { %7928 = vmatprep.mubr.msk.bf16.mxu0 %vm1070_vm3, %v7211_v4  ;;  %v3176_v4 = vld [vmem:[#allocation2 + $0xc4] sm:$0xf]  ;;  %v3537_v24 = vsel %vm8877_vm6, %v3532_v42, %v3536_v23  ;;  %v7199_v0 = vrot.slane %v5725_v41, 9  ;;  %v5866_v20 = vrot.slane %v5727_v48, 5  ;;  %v3558_v7 = vshll.u32 %v3177_v61, 16 }
 0x1e7   : > { %v3522_v45 = vrot.slane %v3521_v9, 4  ;;  %v3548_v34 = vshll.u32 %v3176_v4, 16  ;;  %v3552_v62 = vshrl.u32 %v3176_v4, 16  ;;  %v3545_v46 = vor.u32 %v3544_v54, %v3541_v52  ;;  %v5738_v4 = vld [vmem:[#allocation2 + $0xc4] sm:$0xf] }
 0x1e8   : > { %v5860_v30 = vsel %vm8976_vm9, %v5858_v6, %v5859_v29  ;;  %v7058_v43 = vcombine.low %v3503_v15, %v3513_v2  ;;  %v5870_v50 = vrot.slane %v5729_v26, 5  ;;  %v5867_v13 = vsel %vm8976_vm9, %v5865_v63, %v5866_v20  ;;  %v5737_v52 = vld [vmem:[#allocation2 + $0xc0] sm:$0xe]  ;;  %v5739_v16 = vld [vmem:[#allocation2 + $0xc8] sm:$0x1] }
 0x1e9   : > { %7801 = vmatmul.mubr.msk.bf16.gmra.mrb[20].mxu1 %vm1070_vm3, %v7056_v25  ;;  %v3550_v51 = vrot.slane %v3548_v34, 5  ;;  %v3527_v60 = vsel %vm8877_vm6, %v3522_v45, %v9984_v31  ;;  %v3554_v35 = vrot.slane %v3552_v62, 4  ;;  %v5877_v31 = vrot.slane %v5732_v1, 5  ;;  %v5736_v45 = vld [vmem:[#allocation2 + $0xbc] sm:$0x1] }
 0x1ea   : > { %7804 = vmatprep.mubr.msk.bf16.mxu1 %vm1070_vm3, %v7057_v40  ;;  %v7059_v3 = vcombine.low %v3527_v60, %v3537_v24  ;;  %v3546_v36 = vrot.slane %v3545_v46, 4  ;;  %v5857_v49 = vsel %vm8976_vm9, %v7198_v32, %v5856_v57  ;;  %v5864_v17 = vsel %vm8976_vm9, %v7199_v0, %v5863_v22  ;;  %v5741_v62 = vld [vmem:[#allocation2 + $0xd0] sm:$0xf]  ;;  %v5740_v29 = vld [vmem:[#allocation2 + $0xcc] sm:$0xe] }
 0x1eb   : > { %v3555_v21 = vor.u32 %v3554_v35, %v3550_v51  ;;  %v7214_v28 = vcombine.low %v5857_v49, %v5860_v30  ;;  %v3560_v33 = vrot.slane %v3558_v7, 5  ;;  %v7215_v19 = vcombine.low %v5864_v17, %v5867_v13  ;;  %v5742_v60 = vld [vmem:[#allocation2 + $0xd4] sm:$0x1] }
 0x1ec   : > { %v5872_v9 = vrot.slane %v5870_v50, 4  ;;  %v5879_v59 = vrot.slane %v5877_v31, 4  ;;  %v3551_v57 = vsel %vm8877_vm6, %v3546_v36, %v3550_v51  ;;  %v7200_v22 = vrot.slane %v5728_v14, 9 }
 0x1ed   : > { %7929 = vmatmul.mubr.msk.bf16.gmra.mrb[12].mxu0 %vm1070_vm3, %v7212_v44  ;;  %v3556_v8 = vrot.slane %v3555_v21, 4  ;;  %v5873_v58 = vrot.slane %v5730_v38, 5  ;;  %v7201_v47 = vrot.slane %v5731_v12, 9  ;;  %v5880_v44 = vrot.slane %v5733_v27, 5 }
 0x1ee   : > { %7932 = vmatprep.mubr.msk.bf16.mxu0 %vm1070_vm3, %v7213_v56  ;;  %v5884_v39 = vrot.slane %v5735_v53, 5  ;;  %v5891_v11 = vrot.slane %v5738_v4, 5  ;;  %v5871_v10 = vsel %vm8976_vm9, %v7200_v22, %v5870_v50  ;;  %v7202_v32 = vrot.slane %v5734_v55, 9 }
 0x1ef   : > { %v3561_v25 = vsel %vm8877_vm6, %v3556_v8, %v3560_v33  ;;  %v5874_v40 = vsel %vm8976_vm9, %v5872_v9, %v5873_v58  ;;  %v5881_v18 = vsel %vm8976_vm9, %v5879_v59, %v5880_v44  ;;  %v5878_v41 = vsel %vm8976_vm9, %v7201_v47, %v5877_v31  ;;  %v10079_v9 = vld [vmem:[%s10387_s5] ss:$0 sm:$0xff] }
 0x1f0   : > { %v7060_v37 = vcombine.low %v3551_v57, %v3561_v25  ;;  %v7216_v56 = vcombine.low %v5871_v10, %v5874_v40  ;;  %v7217_v42 = vcombine.low %v5878_v41, %v5881_v18  ;;  %v5886_v48 = vrot.slane %v5884_v39, 4 }
 0x1f1   : > { %7805 = vmatmul.mubr.msk.bf16.gmra.mrb[24].mxu1 %vm1070_vm3, %v7058_v43  ;;  %v5893_v34 = vrot.slane %v5891_v11, 4  ;;  %v5887_v6 = vrot.slane %v5736_v45, 5  ;;  %v7203_v63 = vrot.slane %v5737_v52, 9  ;;  %v5894_v23 = vrot.slane %v5739_v16, 5 }
 0x1f2   : > { %7808 = vmatprep.mubr.msk.bf16.mxu1 %vm1070_vm3, %v7059_v3  ;;  %v5898_v15 = vrot.slane %v5741_v62, 5  ;;  %v5885_v26 = vsel %vm8976_vm9, %v7202_v32, %v5884_v39  ;;  %v7204_v35 = vrot.slane %v5740_v29, 9  ;;  %v5901_v0 = vrot.slane %v5742_v60, 5 }
 0x1f3   : > { %v5888_v61 = vsel %vm8976_vm9, %v5886_v48, %v5887_v6  ;;  %v5895_v2 = vsel %vm8976_vm9, %v5893_v34, %v5894_v23  ;;  %v5892_v51 = vsel %vm8976_vm9, %v7203_v63, %v5891_v11 }
 0x1f4   : > { %v7218_v54 = vcombine.low %v5885_v26, %v5888_v61  ;;  %v7219_v24 = vcombine.low %v5892_v51, %v5895_v2  ;;  %v5900_v1 = vrot.slane %v5898_v15, 4  ;;  %v5899_v46 = vsel %vm8976_vm9, %v7204_v35, %v5898_v15 }
 0x1f5   : > { %7933 = vmatmul.mubr.msk.bf16.gmra.mrb[16].mxu0 %vm1070_vm3, %v7214_v28 }
 0x1f6   : > { %7936 = vmatprep.mubr.msk.bf16.mxu0 %vm1070_vm3, %v7215_v19  ;;  %v5902_v20 = vsel %vm8976_vm9, %v5900_v1, %v5901_v0 }
 0x1f7   : > { %v7220_v7 = vcombine.low %v5899_v46, %v5902_v20 }
 0x1f9   : > { %7809 = vmatmul.mubr.msk.bf16.gmra.mrb[28].mxu1 %vm1070_vm3, %v7060_v37 }
 0x1fd   : > { %7937 = vmatmul.mubr.msk.bf16.gmra.mrb[20].mxu0 %vm1070_vm3, %v7216_v56 }
 0x1fe   : > { %7940 = vmatprep.mubr.msk.bf16.mxu0 %vm1070_vm3, %v7217_v42 }
 0x205   : > { %7941 = vmatmul.mubr.msk.bf16.gmra.mrb[24].mxu0 %vm1070_vm3, %v7218_v54 }
 0x206   : > { %7944 = vmatprep.mubr.msk.bf16.mxu0 %vm1070_vm3, %v7219_v24 }
 0x20d   : > { %7945 = vmatmul.mubr.msk.bf16.gmra.mrb[28].mxu0 %vm1070_vm3, %v7220_v7 }
 0x274   : > { %v7748_v30 = vpop.f32.mrb[0].mxu1 }
 0x275   : > { %v2939_v43 = vpop.f32.mrb[1].mxu1 }
 0x276   : > { %v7749_v50 = vpop.f32.mrb[2].mxu1 }
 0x277   : > { %v2942_v21 = vpop.f32.mrb[3].mxu1 }
 0x27c   : > { %v7752_v13 = vpop.f32.mrb[4].mxu1 }
 0x27d   : > { %v2955_v3 = vpop.f32.mrb[5].mxu1 }
 0x27e   : > { %v7753_v31 = vpop.f32.mrb[6].mxu1 }
 0x27f   : > { %v2958_v36 = vpop.f32.mrb[7].mxu1 }
 0x284   : > { %v7756_v49 = vpop.f32.mrb[8].mxu1 }
 0x285   : > { %v2971_v8 = vpop.f32.mrb[9].mxu1 }
 0x286   : > { %v7757_v28 = vpop.f32.mrb[10].mxu1 }
 0x287   : > { %v10066_v17 = vpop.f32.mrb[11].mxu1 }
 0x28c   : > { %v10068_v14 = vpop.f32.mrb[12].mxu1 }
 0x28d   : > { %v10070_v5 = vpop.f32.mrb[13].mxu1 }
 0x28e   : > { %v10072_v38 = vpop.f32.mrb[14].mxu1 }
 0x28f   : > { %v10074_v33 = vpop.f32.mrb[15].mxu1 }
 0x2a8   : > { %v7918_v19 = vpop.f32.mrb[0].mxu0 }
 0x2a9   : > { %v7950_v12 = vadd.f32 %v7918_v19, %v7748_v30  ;;  %v6069_v27 = vpop.f32.mrb[1].mxu0 }
 0x2aa   : > { %v7951_v59 = vadd.f32 %v6069_v27, %v2939_v43  ;;  %v7919_v57 = vpop.f32.mrb[2].mxu0 }
 0x2ab   : > { %v10082_v25 = vadd.f32 %v7950_v12, %v10079_v9  ;;  %v7952_v53 = vadd.f32 %v7919_v57, %v7749_v50  ;;  %v6072_v22 = vpop.f32.mrb[3].mxu0 }
 0x2ac   : > { %v10085_v58 = vadd.f32 %v7951_v59, %v10079_v9  ;;  %v7953_v4 = vadd.f32 %v6072_v22, %v2942_v21 }
 0x2ad   : > { %v7240_v47 = vmul.f32 -1.442695, %v10082_v25  ;;  %v10089_v44 = vadd.f32 %v7952_v53, %v10079_v9 }
 0x2ae   : > { %v7238_v40 = vmul.f32 -1.442695, %v10085_v58  ;;  %v10093_v37 = vadd.f32 %v7953_v4, %v10079_v9 }
 0x2af   : > { %8340 = vpow2.f32 %v7240_v47  ;;  %v7241_v39 = vmul.f32 -1.442695, %v10089_v44 }
 0x2b0   : > { %8342 = vpow2.f32 %v7238_v40  ;;  %v7239_v18 = vmul.f32 -1.442695, %v10093_v37  ;;  %v7922_v11 = vpop.f32.mrb[4].mxu0 }
 0x2b1   : > { %8344 = vpow2.f32 %v7241_v39  ;;  %v7954_v10 = vadd.f32 %v7922_v11, %v7752_v13  ;;  %v6085_v56 = vpop.f32.mrb[5].mxu0 }
 0x2b2   : > { %8346 = vpow2.f32 %v7239_v18  ;;  %v7955_v41 = vadd.f32 %v6085_v56, %v2955_v3  ;;  %v7923_v55 = vpop.f32.mrb[6].mxu0 }
 0x2b3   : > { %v10098_v45 = vadd.f32 %v7954_v10, %v10079_v9  ;;  %v7956_v42 = vadd.f32 %v7923_v55, %v7753_v31  ;;  %v6088_v48 = vpop.f32.mrb[7].mxu0 }
 0x2b4   : > { %v10101_v52 = vadd.f32 %v7955_v41, %v10079_v9  ;;  %v7957_v16 = vadd.f32 %v6088_v48, %v2958_v36  ;;  %v10107_v32 = vpop.f32.mrb[16].mxu1 }
 0x2b5   : > { %v7244_v34 = vmul.f32 -1.442695, %v10098_v45  ;;  %v10105_v62 = vadd.f32 %v7956_v42, %v10079_v9  ;;  %v10113_v23 = vpop.f32.mrb[17].mxu1 }
 0x2b6   : > { %v7242_v6 = vmul.f32 -1.442695, %v10101_v52  ;;  %v10111_v63 = vadd.f32 %v7957_v16, %v10079_v9  ;;  %v10116_v15 = vpop.f32.mrb[18].mxu1 }
 0x2b7   : > { %8348 = vpow2.f32 %v7244_v34  ;;  %v7245_v61 = vmul.f32 -1.442695, %v10105_v62  ;;  %v10119_v54 = vpop.f32.mrb[19].mxu1 }
 0x2b8   : > { %8350 = vpow2.f32 %v7242_v6  ;;  %v7243_v2 = vmul.f32 -1.442695, %v10111_v63  ;;  %v7926_v26 = vpop.f32.mrb[8].mxu0 }
 0x2b9   : > { %v8341_v51 = vpop.eup %8340  ;;  %8352 = vpow2.f32 %v7245_v61  ;;  %v7958_v29 = vadd.f32 %v7926_v26, %v7756_v49  ;;  %v6101_v60 = vpop.f32.mrb[9].mxu0 }
 0x2ba   : > { %v8343_v24 = vpop.eup %8342  ;;  %v6429_v1 = vadd.f32 1.0, %v8341_v51  ;;  %8354 = vpow2.f32 %v7243_v2  ;;  %v7959_v35 = vadd.f32 %v6101_v60, %v2971_v8  ;;  %v7927_v0 = vpop.f32.mrb[10].mxu0 }
 0x2bb   : > { %v8345_v20 = vpop.eup %8344  ;;  %v6427_v46 = vadd.f32 1.0, %v8343_v24  ;;  %v10122_v7 = vadd.f32 %v7958_v29, %v10079_v9  ;;  %v7960_v30 = vadd.f32 %v7927_v0, %v7757_v28  ;;  %v6104_v43 = vpop.f32.mrb[11].mxu0 }
 0x2bc   : > { %v8347_v50 = vpop.eup %8346  ;;  %8356 = vrcp.f32 %v6429_v1  ;;  %v6430_v21 = vadd.f32 1.0, %v8345_v20  ;;  %v10125_v13 = vadd.f32 %v7959_v35, %v10079_v9  ;;  %v7961_v3 = vadd.f32 %v6104_v43, %v10066_v17  ;;  %v10132_v8 = vpop.f32.mrb[20].mxu1 }
 0x2bd   : > { %8358 = vrcp.f32 %v6427_v46  ;;  %v6428_v31 = vadd.f32 1.0, %v8347_v50  ;;  %v7248_v36 = vmul.f32 -1.442695, %v10122_v7  ;;  %v10130_v49 = vadd.f32 %v7960_v30, %v10079_v9  ;;  %v10138_v12 = vpop.f32.mrb[21].mxu1 }
 0x2be   : > { %8360 = vrcp.f32 %v6430_v21  ;;  %v7246_v28 = vmul.f32 -1.442695, %v10125_v13  ;;  %v10136_v19 = vadd.f32 %v7961_v3, %v10079_v9  ;;  %v10141_v27 = vpop.f32.mrb[22].mxu1 }
 0x2bf   : > { %8362 = vrcp.f32 %v6428_v31  ;;  %v7249_v17 = vmul.f32 -1.442695, %v10130_v49  ;;  %v10144_v53 = vpop.f32.mrb[23].mxu1 }
 0x2c0   : > { %8364 = vpow2.f32 %v7248_v36  ;;  %v7247_v59 = vmul.f32 -1.442695, %v10136_v19  ;;  %v7930_v57 = vpop.f32.mrb[12].mxu0 }
 0x2c1   : > { %v8349_v22 = vpop.eup %8348  ;;  %8366 = vpow2.f32 %v7246_v28  ;;  %v7962_v4 = vadd.f32 %v7930_v57, %v10068_v14  ;;  %v6117_v47 = vpop.f32.mrb[13].mxu0 }
 0x2c2   : > { %v8351_v40 = vpop.eup %8350  ;;  %v6433_v39 = vadd.f32 1.0, %v8349_v22  ;;  %8368 = vpow2.f32 %v7249_v17  ;;  %v7963_v18 = vadd.f32 %v6117_v47, %v10070_v5  ;;  %v7931_v11 = vpop.f32.mrb[14].mxu0 }
 0x2c3   : > { %v8353_v10 = vpop.eup %8352  ;;  %v6431_v56 = vadd.f32 1.0, %v8351_v40  ;;  %8370 = vpow2.f32 %v7247_v59  ;;  %v10149_v41 = vadd.f32 %v7962_v4, %v10079_v9  ;;  %v7964_v55 = vadd.f32 %v7931_v11, %v10072_v38  ;;  %v6120_v42 = vpop.f32.mrb[15].mxu0 }
 0x2c4   : > { %v8355_v48 = vpop.eup %8354  ;;  %8372 = vrcp.f32 %v6433_v39  ;;  %v6434_v14 = vadd.f32 1.0, %v8353_v10  ;;  %v10154_v16 = vadd.f32 %v7963_v18, %v10079_v9  ;;  %v7965_v5 = vadd.f32 %v6120_v42, %v10074_v33  ;;  %v10161_v2 = vpop.f32.mrb[24].mxu1 }
 0x2c5   : > { %8374 = vrcp.f32 %v6431_v56  ;;  %v6432_v34 = vadd.f32 1.0, %v8355_v48  ;;  %v7252_v6 = vmul.f32 -1.442695, %v10149_v41  ;;  %v10159_v61 = vadd.f32 %v7964_v55, %v10079_v9  ;;  %v10167_v29 = vpop.f32.mrb[25].mxu1 }
 0x2c6   : > { %v8357_v38 = vpop.eup %8356  ;;  %8376 = vrcp.f32 %v6434_v14  ;;  %v7250_v26 = vmul.f32 -1.442695, %v10154_v16  ;;  %v10165_v51 = vadd.f32 %v7965_v5, %v10079_v9  ;;  %v10174_v24 = vpop.f32.mrb[26].mxu1 }
 0x2c7   : > { %v8359_v60 = vpop.eup %8358  ;;  %8378 = vrcp.f32 %v6432_v34  ;;  %v7253_v33 = vmul.f32 -1.442695, %v10159_v61  ;;  %v10177_v20 = vpop.f32.mrb[27].mxu1  ;;  %v6525_v30 = vmul.f32 %v8357_v38, %v10082_v25 }
 0x2c8   : > { %v8361_v1 = vpop.eup %8360  ;;  %8380 = vpow2.f32 %v7252_v6  ;;  %v7251_v35 = vmul.f32 -1.442695, %v10165_v51  ;;  %v7934_v0 = vpop.f32.mrb[16].mxu0  ;;  %v6523_v31 = vmul.f32 %v8359_v60, %v10085_v58 }
 0x2c9   : > { %v8363_v46 = vpop.eup %8362  ;;  %v6526_v43 = vmul.f32 %v8361_v1, %v10089_v44  ;;  %8382 = vpow2.f32 %v7250_v26  ;;  %v7966_v50 = vadd.f32 %v7934_v0, %v10107_v32  ;;  %v6133_v21 = vpop.f32.mrb[17].mxu0 }
 0x2ca   : > { %v8365_v3 = vpop.eup %8364  ;;  %v6524_v36 = vmul.f32 %v8363_v46, %v10093_v37  ;;  %8384 = vpow2.f32 %v7253_v33  ;;  %v7967_v28 = vadd.f32 %v6133_v21, %v10113_v23  ;;  %v7935_v17 = vpop.f32.mrb[18].mxu0 }
 0x2cb   : > { %v8367_v59 = vpop.eup %8366  ;;  %v7402_v57 = vpack.c.bf16 %v6526_v43, %v6525_v30  ;;  %v6437_v22 = vadd.f32 1.0, %v8365_v3  ;;  %8386 = vpow2.f32 %v7251_v35  ;;  %v10186_v25 = vadd.f32 %v7966_v50, %v10079_v9  ;;  %v6136_v44 = vpop.f32.mrb[19].mxu0 }
 0x2cc   : > { %v8369_v32 = vpop.eup %8368  ;;  %v7397_v4 = vpack.c.bf16 %v6524_v36, %v6523_v31  ;;  %v6435_v47 = vadd.f32 1.0, %v8367_v59  ;;  %v10189_v58 = vadd.f32 %v7967_v28, %v10079_v9  ;;  %v7968_v37 = vadd.f32 %v7935_v17, %v10116_v15  ;;  %v10198_v11 = vpop.f32.mrb[28].mxu1 }
 0x2cd   : > { %v8371_v40 = vpop.eup %8370  ;;  %7474 = vst [vmem:[%s10193_s13 + $0x8] sm:$0xff] %v7402_v57   ;;  %8388 = vrcp.f32 %v6437_v22  ;;  %v6438_v23 = vadd.f32 1.0, %v8369_v32  ;;  %v7256_v39 = vmul.f32 -1.442695, %v10186_v25  ;;  %v7969_v18 = vadd.f32 %v6136_v44, %v10119_v54  ;;  %v10205_v42 = vpop.f32.mrb[29].mxu1 }
 0x2ce   : > { %v8373_v10 = vpop.eup %8372  ;;  %7398 = vst [vmem:[%s10193_s13] sm:$0xff] %v7397_v4   ;;  %8390 = vrcp.f32 %v6435_v47  ;;  %v6436_v56 = vadd.f32 1.0, %v8371_v40  ;;  %v7254_v15 = vmul.f32 -1.442695, %v10189_v58  ;;  %v10203_v55 = vadd.f32 %v7968_v37, %v10079_v9  ;;  %v10210_v5 = vpop.f32.mrb[30].mxu1 }
 0x2cf   : > { %v8375_v48 = vpop.eup %8374  ;;  %8392 = vrcp.f32 %v6438_v23  ;;  %v10208_v14 = vadd.f32 %v7969_v18, %v10079_v9  ;;  %v6529_v34 = vmul.f32 %v8373_v10, %v10098_v45  ;;  %v10214_v26 = vpop.f32.mrb[31].mxu1 }
 0x2d0   : > { %v8377_v54 = vpop.eup %8376  ;;  %8394 = vrcp.f32 %v6436_v56  ;;  %v7257_v6 = vmul.f32 -1.442695, %v10203_v55  ;;  %v7938_v38 = vpop.f32.mrb[20].mxu0  ;;  %v6527_v30 = vmul.f32 %v8375_v48, %v10101_v52 }
 0x2d1   : > { %v8379_v60 = vpop.eup %8378  ;;  %v6530_v33 = vmul.f32 %v8377_v54, %v10105_v62  ;;  %8396 = vpow2.f32 %v7256_v39  ;;  %v7255_v1 = vmul.f32 -1.442695, %v10208_v14  ;;  %v7970_v35 = vadd.f32 %v7938_v38, %v10132_v8  ;;  %v6149_v0 = vpop.f32.mrb[21].mxu0 }
 0x2d2   : > { %v8381_v46 = vpop.eup %8380  ;;  %v6528_v45 = vmul.f32 %v8379_v60, %v10111_v63  ;;  %8398 = vpow2.f32 %v7254_v15  ;;  %v7971_v43 = vadd.f32 %v6149_v0, %v10138_v12  ;;  %v7939_v50 = vpop.f32.mrb[22].mxu0 }
 0x2d3   : > { %v8383_v21 = vpop.eup %8382  ;;  %v7412_v3 = vpack.c.bf16 %v6530_v33, %v6529_v34  ;;  %v6441_v62 = vadd.f32 1.0, %v8381_v46  ;;  %8400 = vpow2.f32 %v7257_v6  ;;  %v10223_v31 = vadd.f32 %v7970_v35, %v10079_v9  ;;  %v6152_v8 = vpop.f32.mrb[23].mxu0 }
 0x2d4   : > { %v8385_v36 = vpop.eup %8384  ;;  %v7407_v28 = vpack.c.bf16 %v6528_v45, %v6527_v30  ;;  %v6439_v17 = vadd.f32 1.0, %v8383_v21  ;;  %8402 = vpow2.f32 %v7255_v1  ;;  %v10226_v52 = vadd.f32 %v7971_v43, %v10079_v9 }
 0x2d5   : > { %v8387_v63 = vpop.eup %8386  ;;  %7476 = vst [vmem:[%s10193_s13 + $0x18] sm:$0xff] %v7412_v3   ;;  %8404 = vrcp.f32 %v6441_v62  ;;  %v6442_v12 = vadd.f32 1.0, %v8385_v36  ;;  %v7260_v59 = vmul.f32 -1.442695, %v10223_v31  ;;  %v7972_v57 = vadd.f32 %v7939_v50, %v10141_v27 }
 0x2d6   : > { %7475 = vst [vmem:[%s10193_s13 + $0x10] sm:$0xff] %v7407_v28   ;;  %8406 = vrcp.f32 %v6439_v17  ;;  %v6440_v22 = vadd.f32 1.0, %v8387_v63  ;;  %v7258_v44 = vmul.f32 -1.442695, %v10226_v52  ;;  %v7973_v32 = vadd.f32 %v6152_v8, %v10144_v53 }
 0x2d7   : > { %v8389_v4 = vpop.eup %8388  ;;  %8408 = vrcp.f32 %v6442_v12  ;;  %v10235_v47 = vadd.f32 %v7972_v57, %v10079_v9 }
 0x2d8   : > { %v8391_v37 = vpop.eup %8390  ;;  %v6533_v40 = vmul.f32 %v8389_v4, %v10122_v7  ;;  %8410 = vrcp.f32 %v6440_v22  ;;  %v10239_v23 = vadd.f32 %v7973_v32, %v10079_v9  ;;  %v7942_v27 = vpop.f32.mrb[24].mxu0 }
 0x2d9   : > { %v8393_v39 = vpop.eup %8392  ;;  %v6531_v18 = vmul.f32 %v8391_v37, %v10125_v13  ;;  %8412 = vpow2.f32 %v7260_v59  ;;  %v7261_v10 = vmul.f32 -1.442695, %v10235_v47  ;;  %v7974_v53 = vadd.f32 %v7942_v27, %v10161_v2  ;;  %v6165_v56 = vpop.f32.mrb[25].mxu0 }
 0x2da   : > { %v8395_v15 = vpop.eup %8394  ;;  %v6534_v48 = vmul.f32 %v8393_v39, %v10130_v49  ;;  %8414 = vpow2.f32 %v7258_v44  ;;  %v7259_v7 = vmul.f32 -1.442695, %v10239_v23  ;;  %v7975_v54 = vadd.f32 %v6165_v56, %v10167_v29  ;;  %v7943_v34 = vpop.f32.mrb[26].mxu0 }
 0x2db   : > { %v8397_v6 = vpop.eup %8396  ;;  %v6532_v38 = vmul.f32 %v8395_v15, %v10136_v19  ;;  %8416 = vpow2.f32 %v7261_v10  ;;  %v10249_v13 = vadd.f32 %v7974_v53, %v10079_v9  ;;  %v7976_v2 = vadd.f32 %v7943_v34, %v10174_v24  ;;  %v6168_v60 = vpop.f32.mrb[27].mxu0 }
 0x2dc   : > { %v8399_v33 = vpop.eup %8398  ;;  %v7422_v49 = vpack.c.bf16 %v6534_v48, %v6533_v40  ;;  %v6445_v1 = vadd.f32 1.0, %v8397_v6  ;;  %8418 = vpow2.f32 %v7259_v7  ;;  %v10253_v35 = vadd.f32 %v7975_v54, %v10079_v9 }
 0x2dd   : > { %v8401_v29 = vpop.eup %8400  ;;  %v7417_v0 = vpack.c.bf16 %v6532_v38, %v6531_v18  ;;  %v6443_v46 = vadd.f32 1.0, %v8399_v33  ;;  %v10256_v19 = vadd.f32 %v7976_v2, %v10079_v9  ;;  %v7264_v24 = vmul.f32 -1.442695, %v10249_v13 }
 0x2de   : > { %v8403_v30 = vpop.eup %8402  ;;  %7478 = vst [vmem:[%s10193_s13 + $0x28] sm:$0xff] %v7422_v49   ;;  %8420 = vrcp.f32 %v6445_v1  ;;  %v6446_v45 = vadd.f32 1.0, %v8401_v29  ;;  %v7977_v43 = vadd.f32 %v6168_v60, %v10177_v20  ;;  %v7262_v3 = vmul.f32 -1.442695, %v10253_v35 }
 0x2df   : > { %v8405_v50 = vpop.eup %8404  ;;  %7477 = vst [vmem:[%s10193_s13 + $0x20] sm:$0xff] %v7417_v0   ;;  %8422 = vrcp.f32 %v6443_v46  ;;  %v6444_v21 = vadd.f32 1.0, %v8403_v30  ;;  %v7265_v8 = vmul.f32 -1.442695, %v10256_v19 }
 0x2e0   : > { %v8407_v62 = vpop.eup %8406  ;;  %8424 = vrcp.f32 %v6446_v45  ;;  %v10265_v36 = vadd.f32 %v7977_v43, %v10079_v9  ;;  %v7946_v28 = vpop.f32.mrb[28].mxu0  ;;  %v6537_v63 = vmul.f32 %v8405_v50, %v10149_v41 }
 0x2e1   : > { %v8409_v17 = vpop.eup %8408  ;;  %v6535_v12 = vmul.f32 %v8407_v62, %v10154_v16  ;;  %8426 = vrcp.f32 %v6444_v21  ;;  %v7978_v20 = vadd.f32 %v7946_v28, %v10198_v11  ;;  %v6181_v59 = vpop.f32.mrb[29].mxu0 }
 0x2e2   : > { %v8411_v57 = vpop.eup %8410  ;;  %v6538_v22 = vmul.f32 %v8409_v17, %v10159_v61  ;;  %8428 = vpow2.f32 %v7264_v24  ;;  %v7263_v44 = vmul.f32 -1.442695, %v10265_v36  ;;  %v7979_v32 = vadd.f32 %v6181_v59, %v10205_v42  ;;  %v7947_v4 = vpop.f32.mrb[30].mxu0 }
 0x2e3   : > { %v8413_v37 = vpop.eup %8412  ;;  %v6536_v40 = vmul.f32 %v8411_v57, %v10165_v51  ;;  %8430 = vpow2.f32 %v7262_v3  ;;  %v10275_v41 = vadd.f32 %v7978_v20, %v10079_v9  ;;  %v7980_v16 = vadd.f32 %v7947_v4, %v10210_v5  ;;  %v6184_v11 = vpop.f32.mrb[31].mxu0 }
 0x2e4   : > { %v8415_v27 = vpop.eup %8414  ;;  %v7432_v61 = vpack.c.bf16 %v6538_v22, %v6537_v63  ;;  %v6449_v39 = vadd.f32 1.0, %v8413_v37  ;;  %8432 = vpow2.f32 %v7265_v8  ;;  %v10279_v18 = vadd.f32 %v7979_v32, %v10079_v9 }
 0x2e5   : > { %v8417_v42 = vpop.eup %8416  ;;  %v7427_v10 = vpack.c.bf16 %v6536_v40, %v6535_v12  ;;  %v6447_v53 = vadd.f32 1.0, %v8415_v27  ;;  %8434 = vpow2.f32 %v7263_v44  ;;  %v7268_v15 = vmul.f32 -1.442695, %v10275_v41 }
 0x2e6   : > { %v8419_v51 = vpop.eup %8418  ;;  %7480 = vst [vmem:[%s10193_s13 + $0x38] sm:$0xff] %v7432_v61   ;;  %8436 = vrcp.f32 %v6449_v39  ;;  %v6450_v56 = vadd.f32 1.0, %v8417_v42  ;;  %v10284_v5 = vadd.f32 %v7980_v16, %v10079_v9  ;;  %v7266_v7 = vmul.f32 -1.442695, %v10279_v18 }
 0x2e7   : > { %7479 = vst [vmem:[%s10193_s13 + $0x30] sm:$0xff] %v7427_v10   ;;  %8438 = vrcp.f32 %v6447_v53  ;;  %v6448_v48 = vadd.f32 1.0, %v8419_v51  ;;  %v7981_v54 = vadd.f32 %v6184_v11, %v10214_v26 }
 0x2e8   : > { %v8421_v34 = vpop.eup %8420  ;;  %8440 = vrcp.f32 %v6450_v56  ;;  %v7269_v6 = vmul.f32 -1.442695, %v10284_v5 }
 0x2e9   : > { %v8423_v38 = vpop.eup %8422  ;;  %8442 = vrcp.f32 %v6448_v48  ;;  %v10291_v2 = vadd.f32 %v7981_v54, %v10079_v9  ;;  %v6541_v49 = vmul.f32 %v8421_v34, %v10186_v25 }
 0x2ea   : > { %v8425_v60 = vpop.eup %8424  ;;  %8444 = vpow2.f32 %v7268_v15  ;;  %v6539_v0 = vmul.f32 %v8423_v38, %v10189_v58 }
 0x2eb   : > { %v8427_v33 = vpop.eup %8426  ;;  %v6542_v1 = vmul.f32 %v8425_v60, %v10203_v55  ;;  %8446 = vpow2.f32 %v7266_v7  ;;  %v7267_v26 = vmul.f32 -1.442695, %v10291_v2 }
 0x2ec   : > { %v8429_v29 = vpop.eup %8428  ;;  %v6540_v46 = vmul.f32 %v8427_v33, %v10208_v14  ;;  %8448 = vpow2.f32 %v7269_v6 }
 0x2ed   : > { %v8431_v9 = vpop.eup %8430  ;;  %v7442_v30 = vpack.c.bf16 %v6542_v1, %v6541_v49  ;;  %v6453_v45 = vadd.f32 1.0, %v8429_v29  ;;  %8450 = vpow2.f32 %v7267_v26 }
 0x2ee   : > { %v8433_v24 = vpop.eup %8432  ;;  %v7437_v43 = vpack.c.bf16 %v6540_v46, %v6539_v0  ;;  %v6451_v25 = vadd.f32 1.0, %v8431_v9 }
 0x2ef   : > { %v8435_v50 = vpop.eup %8434  ;;  %7482 = vst [vmem:[%s10193_s13 + $0x48] sm:$0xff] %v7442_v30   ;;  %8452 = vrcp.f32 %v6453_v45  ;;  %v6454_v55 = vadd.f32 1.0, %v8433_v24 }
 0x2f0   : > { %v8437_v21 = vpop.eup %8436  ;;  %7481 = vst [vmem:[%s10193_s13 + $0x40] sm:$0xff] %v7437_v43   ;;  %8454 = vrcp.f32 %v6451_v25  ;;  %v6452_v3 = vadd.f32 1.0, %v8435_v50 }
 0x2f1   : > { %v8439_v62 = vpop.eup %8438  ;;  %8456 = vrcp.f32 %v6454_v55  ;;  %v6545_v8 = vmul.f32 %v8437_v21, %v10223_v31 }
 0x2f2   : > { %v8441_v58 = vpop.eup %8440  ;;  %8458 = vrcp.f32 %v6452_v3  ;;  %v6543_v63 = vmul.f32 %v8439_v62, %v10226_v52 }
 0x2f3   : > { %v8443_v14 = vpop.eup %8442  ;;  %v6546_v28 = vmul.f32 %v8441_v58, %v10235_v47 }
 0x2f4   : > { %v8445_v17 = vpop.eup %8444  ;;  %v6544_v12 = vmul.f32 %v8443_v14, %v10239_v23 }
 0x2f5   : > { %v8447_v20 = vpop.eup %8446  ;;  %v7452_v59 = vpack.c.bf16 %v6546_v28, %v6545_v8  ;;  %v6457_v57 = vadd.f32 1.0, %v8445_v17 }
 0x2f6   : > { %v8449_v22 = vpop.eup %8448  ;;  %v7447_v44 = vpack.c.bf16 %v6544_v12, %v6543_v63  ;;  %v6455_v32 = vadd.f32 1.0, %v8447_v20 }
 0x2f7   : > { %v8451_v4 = vpop.eup %8450  ;;  %7484 = vst [vmem:[%s10193_s13 + $0x58] sm:$0xff] %v7452_v59   ;;  %8460 = vrcp.f32 %v6457_v57  ;;  %v6458_v37 = vadd.f32 1.0, %v8449_v22 }
 0x2f8   : > { %7483 = vst [vmem:[%s10193_s13 + $0x50] sm:$0xff] %v7447_v44   ;;  %8462 = vrcp.f32 %v6455_v32  ;;  %v6456_v31 = vadd.f32 1.0, %v8451_v4 }
 0x2f9   : > { %v8453_v47 = vpop.eup %8452  ;;  %8464 = vrcp.f32 %v6458_v37 }
 0x2fa   : > { %v8455_v52 = vpop.eup %8454  ;;  %8466 = vrcp.f32 %v6456_v31  ;;  %v6549_v16 = vmul.f32 %v8453_v47, %v10249_v13 }
 0x2fb   : > { %v8457_v23 = vpop.eup %8456  ;;  %v6547_v27 = vmul.f32 %v8455_v52, %v10253_v35 }
 0x2fc   : > { %v8459_v40 = vpop.eup %8458  ;;  %v6550_v11 = vmul.f32 %v8457_v23, %v10256_v19 }
 0x2fd   : > { %v6548_v61 = vmul.f32 %v8459_v40, %v10265_v36 }
 0x2fe   : > { %v7462_v39 = vpack.c.bf16 %v6550_v11, %v6549_v16 }
 0x2ff   : > { %v7457_v42 = vpack.c.bf16 %v6548_v61, %v6547_v27 }
 0x300   : > { %7486 = vst [vmem:[%s10193_s13 + $0x68] sm:$0xff] %v7462_v39  }
 0x301   : > { %v8461_v10 = vpop.eup %8460  ;;  %7485 = vst [vmem:[%s10193_s13 + $0x60] sm:$0xff] %v7457_v42  }
 0x302   : > { %v8463_v53 = vpop.eup %8462  ;;  %v6553_v35 = vmul.f32 %v8461_v10, %v10275_v41 }
 0x303   : > { %v8465_v51 = vpop.eup %8464  ;;  %v6551_v36 = vmul.f32 %v8463_v53, %v10279_v18 }
 0x304   : > { %v8467_v13 = vpop.eup %8466  ;;  %v6554_v19 = vmul.f32 %v8465_v51, %v10284_v5 }
 0x305   : > { %v6552_v56 = vmul.f32 %v8467_v13, %v10291_v2 }
 0x306   : > { %v7472_v15 = vpack.c.bf16 %v6554_v19, %v6553_v35 }
 0x307   : > { %v7467_v48 = vpack.c.bf16 %v6552_v56, %v6551_v36 }
 0x308   : > { %7488 = vst [vmem:[%s10193_s13 + $0x78] sm:$0xff] %v7472_v15  }
 0x309   : > { %7487 = vst [vmem:[%s10193_s13 + $0x70] sm:$0xff] %v7467_v48  }
 0x30a   : > { %8483 = shalt.err (!%p8480_p7)
}
 0x30b   : > { %s8484_s30 = scalar_lea.hbm %s10322_s29, 2048  ;;  %s8488_s19 = scalar_lea.hbm %s10388_s6, 8192 }
 0x30c   : > { %p8485_p9 = scmp.ne.s32.totalorder %s10322_s29, %s8484_s30  ;;  %p8489_p12 = scmp.lt.u32.totalorder %s10322_s29, %s10388_s6 }
 0x30d   : > { %p8490_p13 = scmp.lt.u32.totalorder %s8488_s19, %s8484_s30  ;;  %p8492_p1 = scmp.lt.u32.totalorder %s8484_s30, %s10322_s29 }
 0x30e   : > { %p8486_p10 = pnand %p8485_p9, %p8656_p3 }
 0x30f   : > { %p8491_p0 = por %p8490_p13, %p8489_p12 }
 0x310   : > { %p8487_p11 = pneg %p8486_p10 }
 0x311   : > { %p8493_p2 = por %p8492_p1, %p8491_p0 }
 0x313   : > { %p8494_p4 = pnand %p8493_p2, %p8487_p11 }
 0x315   : > { %8497 = shalt.err (!%p8494_p4)
}
 0x316   : > { %s8568_s16 = smov 64   ;;  %s8569_s9 = smov 4  }
 0x317   : > { %8217 = dma.vmem_to_hbm [thread:$0]  (%p8656_p3), %s10324_s20, 2048, %s10322_s29, %s10330_s12, %s8568_s16, %s8568_s16, %s8569_s9  }
 0x318 PF: > { %p8223_p5 = scmp.ge.s32.totalorder %s8564_s28, 2  ;;  %s6746_s14 = sand.u32 1, %s8536_s21  }
 0x319   : > { %s6747_s17 = scalar_lea.sflag [#allocation5], %s6746_s14 }
 0x31a   : > { %p8220_p6 = pnand %p8223_p5, %p8665_p8 }
 0x31c   : > { %8531 = dma.done.wait (!%p8220_p6), %s6747_s17, 2048  }
 0x31d   : > { %8533 = vsyncadd (!%p8220_p6), %s6747_s17, 4294965248  ;;  %s19_s28 = sadd.s32 1, %s8564_s28   ;;  %s10395_s21 = smov %s8540_s22 }
 0x31e   : > { %p16_p7 = scmp.ge.s32.totalorder %s19_s28, 6   ;;  %s10396_s22 = smov %s8544_s23 }
 0x31f   : > { %s10397_s23 = smov %s8674_s15  ;;  %s10398_s24 = smov %s8556_s26 }
 0x320   : > { %s10399_s25 = smov %s8560_s27  ;;  %s10400_s26 = smov %s10403_s7 }
 0x321   : > { %s10401_s27 = smov %s10407_s8  ;;  %18 = sbr.rel (!%p16_p7) target bundleno = 5 (0x5), region = 90 }
 0x328   :  { %6752 = vsyncpa [#allocation5], 1 }
 0x329   :  { %6754 = vsyncpa [#allocation5 + $0x1], 1 }

</bundles_post_ra>
